<compile_context>
chip_gen: v6e
topology: v6e:2x2x1
jax: 0.10.0
libtpu: 0.0.40
codegen_flags: <defaults>
</compile_context>

<pallas_src>
import jax
import jax.numpy as jnp
import numpy as np
from jax.experimental import pallas as pl
from jax.experimental.pallas import tpu as pltpu

# ----- module hyper-parameters (small, consistent with the torch __init__) -----
B, T, L = 4, 8, 6                 # batch, encoder length, max label length
VOCAB, EMBED, KV, HID, MLP_HID = 16, 32, 32, 32, 64
N_LAYERS = 2                      # kernel is written for exactly 2 LSTMCell layers
PAD_VALUE = 0
SOS_TOKEN = 1


# ------------------------------- Pallas kernel --------------------------------
def decoder_kernel(kproj_ref, kbias_ref, value_ref, embc_ref,
                   w0_ref, w1_ref, b1_ref,
                   wm1_ref, bm1_ref, wm2_ref, bm2_ref,
                   yhat_ref, attn_ref):
    H = HID
    f32 = jnp.float32

    # loop-invariant tensors: load once
    kproj = kproj_ref[...]                                        # (B, T, H) masked key @ wfc^T
    kbias = kbias_ref[...]                                        # (B, T)    masked key @ bfc
    value = value_ref[...]                                        # (B, T, K)
    w0 = w0_ref[...]                                              # (K+H, 4H) = [wih0c; whh0]
    w1 = w1_ref[...]                                              # (2H, 4H)  = [wih1; whh1]
    # hoisted bias broadcast (JAX does not CSE broadcast_in_dim)
    b1 = jnp.broadcast_to(b1_ref[...], (B, 4 * H))

    def lstm_gates(gates, c_prev):
        # PyTorch LSTMCell gate order: i, f, g, o
        i = jax.nn.sigmoid(gates[:, 0 * H:1 * H])
        f = jax.nn.sigmoid(gates[:, 1 * H:2 * H])
        g = jnp.tanh(gates[:, 2 * H:3 * H])
        o = jax.nn.sigmoid(gates[:, 3 * H:4 * H])
        c_new = f * c_prev + i * g
        return o * jnp.tanh(c_new), c_new

    # init_states: zeros for hidden/memory/attention_context
    h0 = jnp.zeros((B, H), f32)
    c0 = jnp.zeros((B, H), f32)
    h1 = jnp.zeros((B, H), f32)
    c1 = jnp.zeros((B, H), f32)
    ctx = jnp.zeros((B, KV), f32)

    h1s, ctxs, atts = [], [], []
    # Fully unrolled decode loop: L is small and static, so the scheduler sees
    # across timesteps and the recurrent state never leaves vregs.
    # Per-step critical path: 2 MXU matmuls (layer-0, layer-1) + VPU/XLU/EUP attention.
    for t in range(L):
        # ---- layer 0 LSTMCell: emb contribution precomputed; one 64->128 matmul ----
        x0 = jnp.concatenate([ctx, h0], axis=1)                   # (B, K+H)
        g0 = embc_ref[t] + jnp.dot(x0, w0, preferred_element_type=f32)
        h0, c0 = lstm_gates(g0, c0)

        # ---- layer 1 LSTMCell: ONE fused matmul of [h0 | h1_prev] ----
        x1 = jnp.concatenate([h0, h1], axis=1)                    # (B, 2H)
        g1 = jnp.dot(x1, w1, preferred_element_type=f32) + b1
        h1, c1 = lstm_gates(g1, c1)

        # ---- attention with wfc folded into the key (no in-loop MXU matmul):
        #      masked_energy = (key @ (wfc h1 + bfc)) * mask
        #                    = sum_h (key_proj*mask) * h1 + (key_bias*mask)
        masked = jnp.sum(kproj * h1[:, None, :], axis=2) + kbias  # (B, T)
        m = jnp.max(masked, axis=1, keepdims=True)
        e = jnp.exp(masked - m)
        attn = e / jnp.sum(e, axis=1, keepdims=True)              # exact divide (torch parity)

        # ---- attention_context = bmm(attn^T, value) ----
        ctx = jnp.sum(attn[:, :, None] * value, axis=1)           # (B, K)

        h1s.append(h1)
        ctxs.append(ctx)
        atts.append(attn)

    # ---- deferred output head (off the critical path), batched over all L*B rows:
    #      hid = query @ wm1q + ctx @ wm1c + bm1   with query = h1 @ wfc + bfc
    #          = [h1 | ctx] @ [wfc@wm1q ; wm1c] + (bfc@wm1q + bm1)   (wrapper-packed)
    h1_all = jnp.concatenate(h1s, axis=0)                         # (L*B, H)
    ctx_all = jnp.concatenate(ctxs, axis=0)                       # (L*B, K)
    xm = jnp.concatenate([h1_all, ctx_all], axis=1)               # (L*B, H+K)
    hid = (jnp.dot(xm, wm1_ref[...], preferred_element_type=f32)
           + jnp.broadcast_to(bm1_ref[...], (L * B, MLP_HID)))
    hid = jnp.where(hid >= 0, hid, 0.9 * hid)                     # LeakyReLU(0.9)
    y = (jnp.dot(hid, wm2_ref[...], preferred_element_type=f32)
         + jnp.broadcast_to(bm2_ref[...], (L * B, VOCAB)))

    # single stacked store per output
    yhat_ref[...] = y
    attn_ref[...] = jnp.concatenate(atts, axis=0)                 # (L*B, T)


# ------------------------------- wrapper (glue) --------------------------------
def decoder_forward(params, key, value, labels_padded, final_seq_lens):
    """labels_padded: (L, B) int32 (pad_sequence layout). Returns torch-style outputs."""
    emb_tab = params["embedding"]                                  # (VOCAB, EMBED)
    lab_emb = emb_tab[labels_padded]                               # (L, B, E)
    sos_emb = emb_tab[jnp.full((B,), SOS_TOKEN, jnp.int32)]        # (B, E)
    # teacher forcing ratio = 1.0: step-t input embedding is SOS for t=0, else labels[t-1]
    emb_seq = jnp.concatenate([sos_emb[None], lab_emb[:L - 1]], axis=0)      # (L, B, E)
    key_mask = (jnp.arange(T)[None, :] < final_seq_lens[:, None]).astype(jnp.float32)  # (B, T)

    # ---- wrapper-side precomputation (all loop-invariant, off the serial chain) ----
    # layer-0: embedding contribution (includes b0); remaining weight is [wih0c; whh0]
    emb_contrib = (jnp.einsum("lbe,eg->lbg", emb_seq, params["wih0e"])
                   + params["b0"][None])                           # (L, B, 4H)
    w0 = jnp.concatenate([params["wih0c"], params["whh0"]], axis=0)            # (K+H, 4H)
    w1 = jnp.concatenate([params["wih1"], params["whh1"]], axis=0)             # (2H, 4H)
    # fold fc (query projection) into the attention key, with the mask pre-applied
    key_proj = jnp.einsum("btk,hk->bth", key, params["wfc"]) * key_mask[:, :, None]  # (B, T, H)
    key_bias = jnp.einsum("btk,k->bt", key, params["bfc"][0]) * key_mask              # (B, T)
    # fold fc into mlp.fc1:  [wfc@wm1q ; wm1c],  bfc@wm1q + bm1
    wm1 = jnp.concatenate([params["wfc"] @ params["wm1q"], params["wm1c"]], axis=0)  # (H+K, MLP_HID)
    bm1 = params["bfc"] @ params["wm1q"] + params["bm1"]                              # (1, MLP_HID)

    args = (key_proj, key_bias, value, emb_contrib,
            w0, w1, params["b1"],
            wm1, bm1, params["wm2"], params["bm2"])

    yhat_flat, attn_flat = pl.pallas_call(
        decoder_kernel,
        out_shape=(jax.ShapeDtypeStruct((L * B, VOCAB), jnp.float32),
                   jax.ShapeDtypeStruct((L * B, T), jnp.float32)),
        compiler_params=pltpu.CompilerParams(dimension_semantics=()),
    )(*args)

    yhat_lbv = yhat_flat.reshape(L, B, VOCAB)
    attn_lbt = attn_flat.reshape(L, B, T)
    y_hat = jnp.transpose(yhat_lbv, (1, 0, 2))             # (B, L, VOCAB)
    attentions = jnp.transpose(attn_lbt, (1, 2, 0))        # (B, T, L)  == torch.cat(dim=2)
    y_hat_label = jnp.argmax(y_hat, axis=2).astype(jnp.int32)      # (B, L)
    labels_out = jnp.transpose(labels_padded, (1, 0))              # (B, L)
    return y_hat, y_hat_label, labels_out, attentions


# ------------------------- pure-JAX reference (for check) ----------------------
def decoder_reference(params, key, value, labels_padded, final_seq_lens):
    emb_tab = params["embedding"]
    lab_emb = emb_tab[labels_padded]
    sos_emb = emb_tab[jnp.full((B,), SOS_TOKEN, jnp.int32)]
    key_mask = (jnp.arange(T)[None, :] < final_seq_lens[:, None]).astype(jnp.float32)

    def lstm(gates, c_prev):
        H = HID
        i = jax.nn.sigmoid(gates[:, 0 * H:1 * H])
        f = jax.nn.sigmoid(gates[:, 1 * H:2 * H])
        g = jnp.tanh(gates[:, 2 * H:3 * H])
        o = jax.nn.sigmoid(gates[:, 3 * H:4 * H])
        c_new = f * c_prev + i * g
        return o * jnp.tanh(c_new), c_new

    h = [jnp.zeros((B, HID)), jnp.zeros((B, HID))]
    c = [jnp.zeros((B, HID)), jnp.zeros((B, HID))]
    emb = sos_emb
    ctx = jnp.zeros((B, KV))
    ys, atts = [], []
    for t in range(L):
        g0 = emb @ params["wih0e"] + ctx @ params["wih0c"] + h[0] @ params["whh0"] + params["b0"]
        h[0], c[0] = lstm(g0, c[0])
        g1 = h[0] @ params["wih1"] + h[1] @ params["whh1"] + params["b1"]
        h[1], c[1] = lstm(g1, c[1])
        query = h[1] @ params["wfc"] + params["bfc"]
        energy = jnp.einsum("btk,bk->bt", key, query)
        attn = jax.nn.softmax(energy * key_mask, axis=1)
        ctx = jnp.einsum("bt,btk->bk", attn, value)
        hid = query @ params["wm1q"] + ctx @ params["wm1c"] + params["bm1"]
        hid = jnp.where(hid >= 0, hid, 0.9 * hid)
        ys.append(hid @ params["wm2"] + params["bm2"])
        atts.append(attn)
        emb = lab_emb[t]
    return jnp.stack(ys, axis=1), jnp.stack(atts, axis=2)


# --------------------------------- parameters ----------------------------------
def init_params(rng):
    def nrm(key, shape, scale=0.1):
        return scale * jax.random.normal(key, shape, dtype=jnp.float32)

    ks = jax.random.split(rng, 16)
    # embedding
    embedding = nrm(ks[0], (VOCAB, EMBED), 1.0)
    # LSTMCell 0: input = EMBED + KV ; weights stored transposed for x @ W
    wih0 = nrm(ks[1], (EMBED + KV, 4 * HID))
    whh0 = nrm(ks[2], (HID, 4 * HID))
    b0 = nrm(ks[3], (1, 4 * HID)) + nrm(ks[4], (1, 4 * HID))   # b_ih + b_hh
    # LSTMCell 1
    wih1 = nrm(ks[5], (HID, 4 * HID))
    whh1 = nrm(ks[6], (HID, 4 * HID))
    b1 = nrm(ks[7], (1, 4 * HID)) + nrm(ks[8], (1, 4 * HID))
    # fc: Linear(HID -> KV)
    wfc = nrm(ks[9], (HID, KV))
    bfc = nrm(ks[10], (1, KV))
    # mlp: Linear(2K -> MLP_HID), LeakyReLU(0.9), Linear(MLP_HID -> VOCAB)
    wm1 = nrm(ks[11], (2 * KV, MLP_HID))
    bm1 = nrm(ks[12], (1, MLP_HID))
    wm2 = nrm(ks[13], (MLP_HID, VOCAB))
    bm2 = nrm(ks[14], (1, VOCAB))
    return {
        "embedding": embedding,
        "wih0e": wih0[:EMBED], "wih0c": wih0[EMBED:], "whh0": whh0, "b0": b0,
        "wih1": wih1, "whh1": whh1, "b1": b1,
        "wfc": wfc, "bfc": bfc,
        "wm1q": wm1[:KV], "wm1c": wm1[KV:], "bm1": bm1,
        "wm2": wm2, "bm2": bm2,
    }


if __name__ == "__main__":
    rng = jax.random.PRNGKey(0)
    k_param, k_key, k_val, k_lab = jax.random.split(rng, 4)

    params = init_params(k_param)
    key = jax.random.normal(k_key, (B, T, KV), dtype=jnp.float32)
    value = jax.random.normal(k_val, (B, T, KV), dtype=jnp.float32)
    final_seq_lens = jnp.array([8, 5, 7, 3], dtype=jnp.int32)

    # variable-length labels, padded like pad_sequence -> (L, B)
    labels_lens = [6, 4, 5, 3]
    raw = jax.random.randint(k_lab, (L, B), 1, VOCAB, dtype=jnp.int32)
    time_ix = jnp.arange(L)[:, None]
    labels_padded = jnp.where(time_ix < jnp.array(labels_lens)[None, :], raw, PAD_VALUE)

    y_hat, y_hat_label, labels_out, attentions = decoder_forward(
        params, key, value, labels_padded, final_seq_lens)
    jax.block_until_ready((y_hat, y_hat_label, labels_out, attentions))

    # correctness check against a pure-JAX reference of the same forward pass
    # (exact softmax divide now; small slack left for the algebraic refactoring
    #  of the fused/composed matmuls, which reassociates f32 sums)
    y_ref, attn_ref = decoder_reference(params, key, value, labels_padded, final_seq_lens)
    np.testing.assert_allclose(np.asarray(y_hat), np.asarray(y_ref), atol=1e-3, rtol=1e-3)
    np.testing.assert_allclose(np.asarray(attentions), np.asarray(attn_ref), atol=1e-3, rtol=1e-3)

    assert y_hat.shape == (B, L, VOCAB)
    assert y_hat_label.shape == (B, L)
    assert labels_out.shape == (B, L)
    assert attentions.shape == (B, T, L)
    print("KERNEL_OK")
</pallas_src>

<mosaic_0001>
module attributes {stable_mosaic.version = 11 : i64} {
  func.func @decoder_kernel(%arg0: memref<4x8x32xf32, #tpu.memory_space<vmem>>, %arg1: memref<4x8xf32, #tpu.memory_space<vmem>>, %arg2: memref<4x8x32xf32, #tpu.memory_space<vmem>>, %arg3: memref<6x4x128xf32, #tpu.memory_space<vmem>>, %arg4: memref<64x128xf32, #tpu.memory_space<vmem>>, %arg5: memref<64x128xf32, #tpu.memory_space<vmem>>, %arg6: memref<1x128xf32, #tpu.memory_space<vmem>>, %arg7: memref<64x64xf32, #tpu.memory_space<vmem>>, %arg8: memref<1x64xf32, #tpu.memory_space<vmem>>, %arg9: memref<64x16xf32, #tpu.memory_space<vmem>>, %arg10: memref<1x16xf32, #tpu.memory_space<vmem>>, %arg11: memref<24x16xf32, #tpu.memory_space<vmem>>, %arg12: memref<24x8xf32, #tpu.memory_space<vmem>>) attributes {dimension_semantics = [], scalar_prefetch = 0 : i64, scratch_operands = 0 : i64, tpu.core_type = #tpu.core_type<tc>} {
    %c0 = arith.constant 0 : index
    %c0_0 = arith.constant 0 : index
    %c0_1 = arith.constant 0 : index
    %0 = vector.load %arg0[%c0, %c0_0, %c0_1] : memref<4x8x32xf32, #tpu.memory_space<vmem>>, vector<4x8x32xf32>
    %c0_2 = arith.constant 0 : index
    %c0_3 = arith.constant 0 : index
    %1 = vector.load %arg1[%c0_2, %c0_3] : memref<4x8xf32, #tpu.memory_space<vmem>>, vector<4x8xf32>
    %c0_4 = arith.constant 0 : index
    %c0_5 = arith.constant 0 : index
    %c0_6 = arith.constant 0 : index
    %2 = vector.load %arg2[%c0_4, %c0_5, %c0_6] : memref<4x8x32xf32, #tpu.memory_space<vmem>>, vector<4x8x32xf32>
    %c0_7 = arith.constant 0 : index
    %c0_8 = arith.constant 0 : index
    %3 = vector.load %arg4[%c0_7, %c0_8] : memref<64x128xf32, #tpu.memory_space<vmem>>, vector<64x128xf32>
    %c0_9 = arith.constant 0 : index
    %c0_10 = arith.constant 0 : index
    %4 = vector.load %arg5[%c0_9, %c0_10] : memref<64x128xf32, #tpu.memory_space<vmem>>, vector<64x128xf32>
    %c0_11 = arith.constant 0 : index
    %c0_12 = arith.constant 0 : index
    %5 = vector.load %arg6[%c0_11, %c0_12] : memref<1x128xf32, #tpu.memory_space<vmem>>, vector<1x128xf32>
    %6 = vector.shape_cast %5 : vector<1x128xf32> to vector<1x128xf32>
    %7 = vector.broadcast %6 : vector<1x128xf32> to vector<4x128xf32>
    %cst = arith.constant 0.000000e+00 : f32
    %8 = vector.broadcast %cst : f32 to vector<4x32xf32>
    %cst_13 = arith.constant 0.000000e+00 : f32
    %9 = vector.broadcast %cst_13 : f32 to vector<4x32xf32>
    %cst_14 = arith.constant 0.000000e+00 : f32
    %10 = vector.broadcast %cst_14 : f32 to vector<4x32xf32>
    %cst_15 = arith.constant 0.000000e+00 : f32
    %11 = vector.broadcast %cst_15 : f32 to vector<4x32xf32>
    %cst_16 = arith.constant 0.000000e+00 : f32
    %12 = vector.broadcast %cst_16 : f32 to vector<4x32xf32>
    %13 = tpu.concatenate %12, %8 in 1 : vector<4x32xf32>, vector<4x32xf32> -> vector<4x64xf32>
    %c0_17 = arith.constant 0 : index
    %c0_18 = arith.constant 0 : index
    %c0_19 = arith.constant 0 : index
    %14 = vector.load %arg3[%c0_17, %c0_18, %c0_19] : memref<6x4x128xf32, #tpu.memory_space<vmem>>, vector<1x4x128xf32>
    %15 = vector.shape_cast %14 : vector<1x4x128xf32> to vector<4x128xf32>
    %cst_20 = arith.constant dense<0.000000e+00> : vector<4x128xf32>
    %16 = tpu.matmul %13, %3, %cst_20 {dimension_numbers = #tpu.dot_dimension_numbers<[1], [0], [0], [1], [0, 0, 1, 1], [], []>} : vector<4x64xf32>, vector<64x128xf32>, vector<4x128xf32> -> vector<4x128xf32>
    %17 = arith.addf %15, %16 : vector<4x128xf32>
    %18 = vector.extract_strided_slice %17 {offsets = [0, 0], sizes = [4, 32], strides = [1, 1]} : vector<4x128xf32> to vector<4x32xf32>
    %19 = arith.negf %18 : vector<4x32xf32>
    %20 = math.exp %19 : vector<4x32xf32>
    %cst_21 = arith.constant 1.000000e+00 : f32
    %21 = vector.broadcast %cst_21 : f32 to vector<4x32xf32>
    %22 = arith.addf %21, %20 : vector<4x32xf32>
    %23 = arith.divf %21, %22 : vector<4x32xf32>
    %24 = vector.extract_strided_slice %17 {offsets = [0, 32], sizes = [4, 32], strides = [1, 1]} : vector<4x128xf32> to vector<4x32xf32>
    %25 = arith.negf %24 : vector<4x32xf32>
    %26 = math.exp %25 : vector<4x32xf32>
    %cst_22 = arith.constant 1.000000e+00 : f32
    %27 = vector.broadcast %cst_22 : f32 to vector<4x32xf32>
    %28 = arith.addf %27, %26 : vector<4x32xf32>
    %29 = arith.divf %27, %28 : vector<4x32xf32>
    %30 = vector.extract_strided_slice %17 {offsets = [0, 64], sizes = [4, 32], strides = [1, 1]} : vector<4x128xf32> to vector<4x32xf32>
    %31 = math.tanh %30 : vector<4x32xf32>
    %32 = vector.extract_strided_slice %17 {offsets = [0, 96], sizes = [4, 32], strides = [1, 1]} : vector<4x128xf32> to vector<4x32xf32>
    %33 = arith.negf %32 : vector<4x32xf32>
    %34 = math.exp %33 : vector<4x32xf32>
    %cst_23 = arith.constant 1.000000e+00 : f32
    %35 = vector.broadcast %cst_23 : f32 to vector<4x32xf32>
    %36 = arith.addf %35, %34 : vector<4x32xf32>
    %37 = arith.divf %35, %36 : vector<4x32xf32>
    %38 = arith.mulf %29, %9 : vector<4x32xf32>
    %39 = arith.mulf %23, %31 : vector<4x32xf32>
    %40 = arith.addf %38, %39 : vector<4x32xf32>
    %41 = math.tanh %40 : vector<4x32xf32>
    %42 = arith.mulf %37, %41 : vector<4x32xf32>
    %43 = tpu.concatenate %42, %10 in 1 : vector<4x32xf32>, vector<4x32xf32> -> vector<4x64xf32>
    %cst_24 = arith.constant dense<0.000000e+00> : vector<4x128xf32>
    %44 = tpu.matmul %43, %4, %cst_24 {dimension_numbers = #tpu.dot_dimension_numbers<[1], [0], [0], [1], [0, 0, 1, 1], [], []>} : vector<4x64xf32>, vector<64x128xf32>, vector<4x128xf32> -> vector<4x128xf32>
    %45 = arith.addf %44, %7 : vector<4x128xf32>
    %46 = vector.extract_strided_slice %45 {offsets = [0, 0], sizes = [4, 32], strides = [1, 1]} : vector<4x128xf32> to vector<4x32xf32>
    %47 = arith.negf %46 : vector<4x32xf32>
    %48 = math.exp %47 : vector<4x32xf32>
    %cst_25 = arith.constant 1.000000e+00 : f32
    %49 = vector.broadcast %cst_25 : f32 to vector<4x32xf32>
    %50 = arith.addf %49, %48 : vector<4x32xf32>
    %51 = arith.divf %49, %50 : vector<4x32xf32>
    %52 = vector.extract_strided_slice %45 {offsets = [0, 32], sizes = [4, 32], strides = [1, 1]} : vector<4x128xf32> to vector<4x32xf32>
    %53 = arith.negf %52 : vector<4x32xf32>
    %54 = math.exp %53 : vector<4x32xf32>
    %cst_26 = arith.constant 1.000000e+00 : f32
    %55 = vector.broadcast %cst_26 : f32 to vector<4x32xf32>
    %56 = arith.addf %55, %54 : vector<4x32xf32>
    %57 = arith.divf %55, %56 : vector<4x32xf32>
    %58 = vector.extract_strided_slice %45 {offsets = [0, 64], sizes = [4, 32], strides = [1, 1]} : vector<4x128xf32> to vector<4x32xf32>
    %59 = math.tanh %58 : vector<4x32xf32>
    %60 = vector.extract_strided_slice %45 {offsets = [0, 96], sizes = [4, 32], strides = [1, 1]} : vector<4x128xf32> to vector<4x32xf32>
    %61 = arith.negf %60 : vector<4x32xf32>
    %62 = math.exp %61 : vector<4x32xf32>
    %cst_27 = arith.constant 1.000000e+00 : f32
    %63 = vector.broadcast %cst_27 : f32 to vector<4x32xf32>
    %64 = arith.addf %63, %62 : vector<4x32xf32>
    %65 = arith.divf %63, %64 : vector<4x32xf32>
    %66 = arith.mulf %57, %11 : vector<4x32xf32>
    %67 = arith.mulf %51, %59 : vector<4x32xf32>
    %68 = arith.addf %66, %67 : vector<4x32xf32>
    %69 = math.tanh %68 : vector<4x32xf32>
    %70 = arith.mulf %65, %69 : vector<4x32xf32>
    %71 = vector.shape_cast %70 : vector<4x32xf32> to vector<4x1x32xf32>
    %72 = vector.broadcast %71 : vector<4x1x32xf32> to vector<4x8x32xf32>
    %73 = arith.mulf %0, %72 : vector<4x8x32xf32>
    %cst_28 = arith.constant dense<0.000000e+00> : vector<4x8xf32>
    %74 = vector.multi_reduction <add>, %73, %cst_28 [2] : vector<4x8x32xf32> to vector<4x8xf32>
    %75 = arith.addf %74, %1 : vector<4x8xf32>
    %cst_29 = arith.constant dense<0xFF800000> : vector<4xf32>
    %76 = vector.multi_reduction <maximumf>, %75, %cst_29 [1] : vector<4x8xf32> to vector<4xf32>
    %77 = vector.shape_cast %76 : vector<4xf32> to vector<4x1xf32>
    %78 = vector.broadcast %77 : vector<4x1xf32> to vector<4x8xf32>
    %79 = arith.subf %75, %78 : vector<4x8xf32>
    %80 = math.exp %79 : vector<4x8xf32>
    %cst_30 = arith.constant dense<0.000000e+00> : vector<4xf32>
    %81 = vector.multi_reduction <add>, %80, %cst_30 [1] : vector<4x8xf32> to vector<4xf32>
    %82 = vector.shape_cast %81 : vector<4xf32> to vector<4x1xf32>
    %83 = vector.broadcast %82 : vector<4x1xf32> to vector<4x8xf32>
    %84 = arith.divf %80, %83 : vector<4x8xf32>
    %85 = vector.shape_cast %84 : vector<4x8xf32> to vector<4x8x1xf32>
    %86 = vector.broadcast %85 : vector<4x8x1xf32> to vector<4x8x32xf32>
    %87 = arith.mulf %86, %2 : vector<4x8x32xf32>
    %cst_31 = arith.constant dense<0.000000e+00> : vector<4x32xf32>
    %88 = vector.multi_reduction <add>, %87, %cst_31 [1] : vector<4x8x32xf32> to vector<4x32xf32>
    %89 = tpu.concatenate %88, %42 in 1 : vector<4x32xf32>, vector<4x32xf32> -> vector<4x64xf32>
    %c1 = arith.constant 1 : index
    %c0_32 = arith.constant 0 : index
    %c0_33 = arith.constant 0 : index
    %90 = vector.load %arg3[%c1, %c0_32, %c0_33] : memref<6x4x128xf32, #tpu.memory_space<vmem>>, vector<1x4x128xf32>
    %91 = vector.shape_cast %90 : vector<1x4x128xf32> to vector<4x128xf32>
    %cst_34 = arith.constant dense<0.000000e+00> : vector<4x128xf32>
    %92 = tpu.matmul %89, %3, %cst_34 {dimension_numbers = #tpu.dot_dimension_numbers<[1], [0], [0], [1], [0, 0, 1, 1], [], []>} : vector<4x64xf32>, vector<64x128xf32>, vector<4x128xf32> -> vector<4x128xf32>
    %93 = arith.addf %91, %92 : vector<4x128xf32>
    %94 = vector.extract_strided_slice %93 {offsets = [0, 0], sizes = [4, 32], strides = [1, 1]} : vector<4x128xf32> to vector<4x32xf32>
    %95 = arith.negf %94 : vector<4x32xf32>
    %96 = math.exp %95 : vector<4x32xf32>
    %cst_35 = arith.constant 1.000000e+00 : f32
    %97 = vector.broadcast %cst_35 : f32 to vector<4x32xf32>
    %98 = arith.addf %97, %96 : vector<4x32xf32>
    %99 = arith.divf %97, %98 : vector<4x32xf32>
    %100 = vector.extract_strided_slice %93 {offsets = [0, 32], sizes = [4, 32], strides = [1, 1]} : vector<4x128xf32> to vector<4x32xf32>
    %101 = arith.negf %100 : vector<4x32xf32>
    %102 = math.exp %101 : vector<4x32xf32>
    %cst_36 = arith.constant 1.000000e+00 : f32
    %103 = vector.broadcast %cst_36 : f32 to vector<4x32xf32>
    %104 = arith.addf %103, %102 : vector<4x32xf32>
    %105 = arith.divf %103, %104 : vector<4x32xf32>
    %106 = vector.extract_strided_slice %93 {offsets = [0, 64], sizes = [4, 32], strides = [1, 1]} : vector<4x128xf32> to vector<4x32xf32>
    %107 = math.tanh %106 : vector<4x32xf32>
    %108 = vector.extract_strided_slice %93 {offsets = [0, 96], sizes = [4, 32], strides = [1, 1]} : vector<4x128xf32> to vector<4x32xf32>
    %109 = arith.negf %108 : vector<4x32xf32>
    %110 = math.exp %109 : vector<4x32xf32>
    %cst_37 = arith.constant 1.000000e+00 : f32
    %111 = vector.broadcast %cst_37 : f32 to vector<4x32xf32>
    %112 = arith.addf %111, %110 : vector<4x32xf32>
    %113 = arith.divf %111, %112 : vector<4x32xf32>
    %114 = arith.mulf %105, %40 : vector<4x32xf32>
    %115 = arith.mulf %99, %107 : vector<4x32xf32>
    %116 = arith.addf %114, %115 : vector<4x32xf32>
    %117 = math.tanh %116 : vector<4x32xf32>
    %118 = arith.mulf %113, %117 : vector<4x32xf32>
    %119 = tpu.concatenate %118, %70 in 1 : vector<4x32xf32>, vector<4x32xf32> -> vector<4x64xf32>
    %cst_38 = arith.constant dense<0.000000e+00> : vector<4x128xf32>
    %120 = tpu.matmul %119, %4, %cst_38 {dimension_numbers = #tpu.dot_dimension_numbers<[1], [0], [0], [1], [0, 0, 1, 1], [], []>} : vector<4x64xf32>, vector<64x128xf32>, vector<4x128xf32> -> vector<4x128xf32>
    %121 = arith.addf %120, %7 : vector<4x128xf32>
    %122 = vector.extract_strided_slice %121 {offsets = [0, 0], sizes = [4, 32], strides = [1, 1]} : vector<4x128xf32> to vector<4x32xf32>
    %123 = arith.negf %122 : vector<4x32xf32>
    %124 = math.exp %123 : vector<4x32xf32>
    %cst_39 = arith.constant 1.000000e+00 : f32
    %125 = vector.broadcast %cst_39 : f32 to vector<4x32xf32>
    %126 = arith.addf %125, %124 : vector<4x32xf32>
    %127 = arith.divf %125, %126 : vector<4x32xf32>
    %128 = vector.extract_strided_slice %121 {offsets = [0, 32], sizes = [4, 32], strides = [1, 1]} : vector<4x128xf32> to vector<4x32xf32>
    %129 = arith.negf %128 : vector<4x32xf32>
    %130 = math.exp %129 : vector<4x32xf32>
    %cst_40 = arith.constant 1.000000e+00 : f32
    %131 = vector.broadcast %cst_40 : f32 to vector<4x32xf32>
    %132 = arith.addf %131, %130 : vector<4x32xf32>
    %133 = arith.divf %131, %132 : vector<4x32xf32>
    %134 = vector.extract_strided_slice %121 {offsets = [0, 64], sizes = [4, 32], strides = [1, 1]} : vector<4x128xf32> to vector<4x32xf32>
    %135 = math.tanh %134 : vector<4x32xf32>
    %136 = vector.extract_strided_slice %121 {offsets = [0, 96], sizes = [4, 32], strides = [1, 1]} : vector<4x128xf32> to vector<4x32xf32>
    %137 = arith.negf %136 : vector<4x32xf32>
    %138 = math.exp %137 : vector<4x32xf32>
    %cst_41 = arith.constant 1.000000e+00 : f32
    %139 = vector.broadcast %cst_41 : f32 to vector<4x32xf32>
    %140 = arith.addf %139, %138 : vector<4x32xf32>
    %141 = arith.divf %139, %140 : vector<4x32xf32>
    %142 = arith.mulf %133, %68 : vector<4x32xf32>
    %143 = arith.mulf %127, %135 : vector<4x32xf32>
    %144 = arith.addf %142, %143 : vector<4x32xf32>
    %145 = math.tanh %144 : vector<4x32xf32>
    %146 = arith.mulf %141, %145 : vector<4x32xf32>
    %147 = vector.shape_cast %146 : vector<4x32xf32> to vector<4x1x32xf32>
    %148 = vector.broadcast %147 : vector<4x1x32xf32> to vector<4x8x32xf32>
    %149 = arith.mulf %0, %148 : vector<4x8x32xf32>
    %cst_42 = arith.constant dense<0.000000e+00> : vector<4x8xf32>
    %150 = vector.multi_reduction <add>, %149, %cst_42 [2] : vector<4x8x32xf32> to vector<4x8xf32>
    %151 = arith.addf %150, %1 : vector<4x8xf32>
    %cst_43 = arith.constant dense<0xFF800000> : vector<4xf32>
    %152 = vector.multi_reduction <maximumf>, %151, %cst_43 [1] : vector<4x8xf32> to vector<4xf32>
    %153 = vector.shape_cast %152 : vector<4xf32> to vector<4x1xf32>
    %154 = vector.broadcast %153 : vector<4x1xf32> to vector<4x8xf32>
    %155 = arith.subf %151, %154 : vector<4x8xf32>
    %156 = math.exp %155 : vector<4x8xf32>
    %cst_44 = arith.constant dense<0.000000e+00> : vector<4xf32>
    %157 = vector.multi_reduction <add>, %156, %cst_44 [1] : vector<4x8xf32> to vector<4xf32>
    %158 = vector.shape_cast %157 : vector<4xf32> to vector<4x1xf32>
    %159 = vector.broadcast %158 : vector<4x1xf32> to vector<4x8xf32>
    %160 = arith.divf %156, %159 : vector<4x8xf32>
    %161 = vector.shape_cast %160 : vector<4x8xf32> to vector<4x8x1xf32>
    %162 = vector.broadcast %161 : vector<4x8x1xf32> to vector<4x8x32xf32>
    %163 = arith.mulf %162, %2 : vector<4x8x32xf32>
    %cst_45 = arith.constant dense<0.000000e+00> : vector<4x32xf32>
    %164 = vector.multi_reduction <add>, %163, %cst_45 [1] : vector<4x8x32xf32> to vector<4x32xf32>
    %165 = tpu.concatenate %164, %118 in 1 : vector<4x32xf32>, vector<4x32xf32> -> vector<4x64xf32>
    %c2 = arith.constant 2 : index
    %c0_46 = arith.constant 0 : index
    %c0_47 = arith.constant 0 : index
    %166 = vector.load %arg3[%c2, %c0_46, %c0_47] : memref<6x4x128xf32, #tpu.memory_space<vmem>>, vector<1x4x128xf32>
    %167 = vector.shape_cast %166 : vector<1x4x128xf32> to vector<4x128xf32>
    %cst_48 = arith.constant dense<0.000000e+00> : vector<4x128xf32>
    %168 = tpu.matmul %165, %3, %cst_48 {dimension_numbers = #tpu.dot_dimension_numbers<[1], [0], [0], [1], [0, 0, 1, 1], [], []>} : vector<4x64xf32>, vector<64x128xf32>, vector<4x128xf32> -> vector<4x128xf32>
    %169 = arith.addf %167, %168 : vector<4x128xf32>
    %170 = vector.extract_strided_slice %169 {offsets = [0, 0], sizes = [4, 32], strides = [1, 1]} : vector<4x128xf32> to vector<4x32xf32>
    %171 = arith.negf %170 : vector<4x32xf32>
    %172 = math.exp %171 : vector<4x32xf32>
    %cst_49 = arith.constant 1.000000e+00 : f32
    %173 = vector.broadcast %cst_49 : f32 to vector<4x32xf32>
    %174 = arith.addf %173, %172 : vector<4x32xf32>
    %175 = arith.divf %173, %174 : vector<4x32xf32>
    %176 = vector.extract_strided_slice %169 {offsets = [0, 32], sizes = [4, 32], strides = [1, 1]} : vector<4x128xf32> to vector<4x32xf32>
    %177 = arith.negf %176 : vector<4x32xf32>
    %178 = math.exp %177 : vector<4x32xf32>
    %cst_50 = arith.constant 1.000000e+00 : f32
    %179 = vector.broadcast %cst_50 : f32 to vector<4x32xf32>
    %180 = arith.addf %179, %178 : vector<4x32xf32>
    %181 = arith.divf %179, %180 : vector<4x32xf32>
    %182 = vector.extract_strided_slice %169 {offsets = [0, 64], sizes = [4, 32], strides = [1, 1]} : vector<4x128xf32> to vector<4x32xf32>
    %183 = math.tanh %182 : vector<4x32xf32>
    %184 = vector.extract_strided_slice %169 {offsets = [0, 96], sizes = [4, 32], strides = [1, 1]} : vector<4x128xf32> to vector<4x32xf32>
    %185 = arith.negf %184 : vector<4x32xf32>
    %186 = math.exp %185 : vector<4x32xf32>
    %cst_51 = arith.constant 1.000000e+00 : f32
    %187 = vector.broadcast %cst_51 : f32 to vector<4x32xf32>
    %188 = arith.addf %187, %186 : vector<4x32xf32>
    %189 = arith.divf %187, %188 : vector<4x32xf32>
    %190 = arith.mulf %181, %116 : vector<4x32xf32>
    %191 = arith.mulf %175, %183 : vector<4x32xf32>
    %192 = arith.addf %190, %191 : vector<4x32xf32>
    %193 = math.tanh %192 : vector<4x32xf32>
    %194 = arith.mulf %189, %193 : vector<4x32xf32>
    %195 = tpu.concatenate %194, %146 in 1 : vector<4x32xf32>, vector<4x32xf32> -> vector<4x64xf32>
    %cst_52 = arith.constant dense<0.000000e+00> : vector<4x128xf32>
    %196 = tpu.matmul %195, %4, %cst_52 {dimension_numbers = #tpu.dot_dimension_numbers<[1], [0], [0], [1], [0, 0, 1, 1], [], []>} : vector<4x64xf32>, vector<64x128xf32>, vector<4x128xf32> -> vector<4x128xf32>
    %197 = arith.addf %196, %7 : vector<4x128xf32>
    %198 = vector.extract_strided_slice %197 {offsets = [0, 0], sizes = [4, 32], strides = [1, 1]} : vector<4x128xf32> to vector<4x32xf32>
    %199 = arith.negf %198 : vector<4x32xf32>
    %200 = math.exp %199 : vector<4x32xf32>
    %cst_53 = arith.constant 1.000000e+00 : f32
    %201 = vector.broadcast %cst_53 : f32 to vector<4x32xf32>
    %202 = arith.addf %201, %200 : vector<4x32xf32>
    %203 = arith.divf %201, %202 : vector<4x32xf32>
    %204 = vector.extract_strided_slice %197 {offsets = [0, 32], sizes = [4, 32], strides = [1, 1]} : vector<4x128xf32> to vector<4x32xf32>
    %205 = arith.negf %204 : vector<4x32xf32>
    %206 = math.exp %205 : vector<4x32xf32>
    %cst_54 = arith.constant 1.000000e+00 : f32
    %207 = vector.broadcast %cst_54 : f32 to vector<4x32xf32>
    %208 = arith.addf %207, %206 : vector<4x32xf32>
    %209 = arith.divf %207, %208 : vector<4x32xf32>
    %210 = vector.extract_strided_slice %197 {offsets = [0, 64], sizes = [4, 32], strides = [1, 1]} : vector<4x128xf32> to vector<4x32xf32>
    %211 = math.tanh %210 : vector<4x32xf32>
    %212 = vector.extract_strided_slice %197 {offsets = [0, 96], sizes = [4, 32], strides = [1, 1]} : vector<4x128xf32> to vector<4x32xf32>
    %213 = arith.negf %212 : vector<4x32xf32>
    %214 = math.exp %213 : vector<4x32xf32>
    %cst_55 = arith.constant 1.000000e+00 : f32
    %215 = vector.broadcast %cst_55 : f32 to vector<4x32xf32>
    %216 = arith.addf %215, %214 : vector<4x32xf32>
    %217 = arith.divf %215, %216 : vector<4x32xf32>
    %218 = arith.mulf %209, %144 : vector<4x32xf32>
    %219 = arith.mulf %203, %211 : vector<4x32xf32>
    %220 = arith.addf %218, %219 : vector<4x32xf32>
    %221 = math.tanh %220 : vector<4x32xf32>
    %222 = arith.mulf %217, %221 : vector<4x32xf32>
    %223 = vector.shape_cast %222 : vector<4x32xf32> to vector<4x1x32xf32>
    %224 = vector.broadcast %223 : vector<4x1x32xf32> to vector<4x8x32xf32>
    %225 = arith.mulf %0, %224 : vector<4x8x32xf32>
    %cst_56 = arith.constant dense<0.000000e+00> : vector<4x8xf32>
    %226 = vector.multi_reduction <add>, %225, %cst_56 [2] : vector<4x8x32xf32> to vector<4x8xf32>
    %227 = arith.addf %226, %1 : vector<4x8xf32>
    %cst_57 = arith.constant dense<0xFF800000> : vector<4xf32>
    %228 = vector.multi_reduction <maximumf>, %227, %cst_57 [1] : vector<4x8xf32> to vector<4xf32>
    %229 = vector.shape_cast %228 : vector<4xf32> to vector<4x1xf32>
    %230 = vector.broadcast %229 : vector<4x1xf32> to vector<4x8xf32>
    %231 = arith.subf %227, %230 : vector<4x8xf32>
    %232 = math.exp %231 : vector<4x8xf32>
    %cst_58 = arith.constant dense<0.000000e+00> : vector<4xf32>
    %233 = vector.multi_reduction <add>, %232, %cst_58 [1] : vector<4x8xf32> to vector<4xf32>
    %234 = vector.shape_cast %233 : vector<4xf32> to vector<4x1xf32>
    %235 = vector.broadcast %234 : vector<4x1xf32> to vector<4x8xf32>
    %236 = arith.divf %232, %235 : vector<4x8xf32>
    %237 = vector.shape_cast %236 : vector<4x8xf32> to vector<4x8x1xf32>
    %238 = vector.broadcast %237 : vector<4x8x1xf32> to vector<4x8x32xf32>
    %239 = arith.mulf %238, %2 : vector<4x8x32xf32>
    %cst_59 = arith.constant dense<0.000000e+00> : vector<4x32xf32>
    %240 = vector.multi_reduction <add>, %239, %cst_59 [1] : vector<4x8x32xf32> to vector<4x32xf32>
    %241 = tpu.concatenate %240, %194 in 1 : vector<4x32xf32>, vector<4x32xf32> -> vector<4x64xf32>
    %c3 = arith.constant 3 : index
    %c0_60 = arith.constant 0 : index
    %c0_61 = arith.constant 0 : index
    %242 = vector.load %arg3[%c3, %c0_60, %c0_61] : memref<6x4x128xf32, #tpu.memory_space<vmem>>, vector<1x4x128xf32>
    %243 = vector.shape_cast %242 : vector<1x4x128xf32> to vector<4x128xf32>
    %cst_62 = arith.constant dense<0.000000e+00> : vector<4x128xf32>
    %244 = tpu.matmul %241, %3, %cst_62 {dimension_numbers = #tpu.dot_dimension_numbers<[1], [0], [0], [1], [0, 0, 1, 1], [], []>} : vector<4x64xf32>, vector<64x128xf32>, vector<4x128xf32> -> vector<4x128xf32>
    %245 = arith.addf %243, %244 : vector<4x128xf32>
    %246 = vector.extract_strided_slice %245 {offsets = [0, 0], sizes = [4, 32], strides = [1, 1]} : vector<4x128xf32> to vector<4x32xf32>
    %247 = arith.negf %246 : vector<4x32xf32>
    %248 = math.exp %247 : vector<4x32xf32>
    %cst_63 = arith.constant 1.000000e+00 : f32
    %249 = vector.broadcast %cst_63 : f32 to vector<4x32xf32>
    %250 = arith.addf %249, %248 : vector<4x32xf32>
    %251 = arith.divf %249, %250 : vector<4x32xf32>
    %252 = vector.extract_strided_slice %245 {offsets = [0, 32], sizes = [4, 32], strides = [1, 1]} : vector<4x128xf32> to vector<4x32xf32>
    %253 = arith.negf %252 : vector<4x32xf32>
    %254 = math.exp %253 : vector<4x32xf32>
    %cst_64 = arith.constant 1.000000e+00 : f32
    %255 = vector.broadcast %cst_64 : f32 to vector<4x32xf32>
    %256 = arith.addf %255, %254 : vector<4x32xf32>
    %257 = arith.divf %255, %256 : vector<4x32xf32>
    %258 = vector.extract_strided_slice %245 {offsets = [0, 64], sizes = [4, 32], strides = [1, 1]} : vector<4x128xf32> to vector<4x32xf32>
    %259 = math.tanh %258 : vector<4x32xf32>
    %260 = vector.extract_strided_slice %245 {offsets = [0, 96], sizes = [4, 32], strides = [1, 1]} : vector<4x128xf32> to vector<4x32xf32>
    %261 = arith.negf %260 : vector<4x32xf32>
    %262 = math.exp %261 : vector<4x32xf32>
    %cst_65 = arith.constant 1.000000e+00 : f32
    %263 = vector.broadcast %cst_65 : f32 to vector<4x32xf32>
    %264 = arith.addf %263, %262 : vector<4x32xf32>
    %265 = arith.divf %263, %264 : vector<4x32xf32>
    %266 = arith.mulf %257, %192 : vector<4x32xf32>
    %267 = arith.mulf %251, %259 : vector<4x32xf32>
    %268 = arith.addf %266, %267 : vector<4x32xf32>
    %269 = math.tanh %268 : vector<4x32xf32>
    %270 = arith.mulf %265, %269 : vector<4x32xf32>
    %271 = tpu.concatenate %270, %222 in 1 : vector<4x32xf32>, vector<4x32xf32> -> vector<4x64xf32>
    %cst_66 = arith.constant dense<0.000000e+00> : vector<4x128xf32>
    %272 = tpu.matmul %271, %4, %cst_66 {dimension_numbers = #tpu.dot_dimension_numbers<[1], [0], [0], [1], [0, 0, 1, 1], [], []>} : vector<4x64xf32>, vector<64x128xf32>, vector<4x128xf32> -> vector<4x128xf32>
    %273 = arith.addf %272, %7 : vector<4x128xf32>
    %274 = vector.extract_strided_slice %273 {offsets = [0, 0], sizes = [4, 32], strides = [1, 1]} : vector<4x128xf32> to vector<4x32xf32>
    %275 = arith.negf %274 : vector<4x32xf32>
    %276 = math.exp %275 : vector<4x32xf32>
    %cst_67 = arith.constant 1.000000e+00 : f32
    %277 = vector.broadcast %cst_67 : f32 to vector<4x32xf32>
    %278 = arith.addf %277, %276 : vector<4x32xf32>
    %279 = arith.divf %277, %278 : vector<4x32xf32>
    %280 = vector.extract_strided_slice %273 {offsets = [0, 32], sizes = [4, 32], strides = [1, 1]} : vector<4x128xf32> to vector<4x32xf32>
    %281 = arith.negf %280 : vector<4x32xf32>
    %282 = math.exp %281 : vector<4x32xf32>
    %cst_68 = arith.constant 1.000000e+00 : f32
    %283 = vector.broadcast %cst_68 : f32 to vector<4x32xf32>
    %284 = arith.addf %283, %282 : vector<4x32xf32>
    %285 = arith.divf %283, %284 : vector<4x32xf32>
    %286 = vector.extract_strided_slice %273 {offsets = [0, 64], sizes = [4, 32], strides = [1, 1]} : vector<4x128xf32> to vector<4x32xf32>
    %287 = math.tanh %286 : vector<4x32xf32>
    %288 = vector.extract_strided_slice %273 {offsets = [0, 96], sizes = [4, 32], strides = [1, 1]} : vector<4x128xf32> to vector<4x32xf32>
    %289 = arith.negf %288 : vector<4x32xf32>
    %290 = math.exp %289 : vector<4x32xf32>
    %cst_69 = arith.constant 1.000000e+00 : f32
    %291 = vector.broadcast %cst_69 : f32 to vector<4x32xf32>
    %292 = arith.addf %291, %290 : vector<4x32xf32>
    %293 = arith.divf %291, %292 : vector<4x32xf32>
    %294 = arith.mulf %285, %220 : vector<4x32xf32>
    %295 = arith.mulf %279, %287 : vector<4x32xf32>
    %296 = arith.addf %294, %295 : vector<4x32xf32>
    %297 = math.tanh %296 : vector<4x32xf32>
    %298 = arith.mulf %293, %297 : vector<4x32xf32>
    %299 = vector.shape_cast %298 : vector<4x32xf32> to vector<4x1x32xf32>
    %300 = vector.broadcast %299 : vector<4x1x32xf32> to vector<4x8x32xf32>
    %301 = arith.mulf %0, %300 : vector<4x8x32xf32>
    %cst_70 = arith.constant dense<0.000000e+00> : vector<4x8xf32>
    %302 = vector.multi_reduction <add>, %301, %cst_70 [2] : vector<4x8x32xf32> to vector<4x8xf32>
    %303 = arith.addf %302, %1 : vector<4x8xf32>
    %cst_71 = arith.constant dense<0xFF800000> : vector<4xf32>
    %304 = vector.multi_reduction <maximumf>, %303, %cst_71 [1] : vector<4x8xf32> to vector<4xf32>
    %305 = vector.shape_cast %304 : vector<4xf32> to vector<4x1xf32>
    %306 = vector.broadcast %305 : vector<4x1xf32> to vector<4x8xf32>
    %307 = arith.subf %303, %306 : vector<4x8xf32>
    %308 = math.exp %307 : vector<4x8xf32>
    %cst_72 = arith.constant dense<0.000000e+00> : vector<4xf32>
    %309 = vector.multi_reduction <add>, %308, %cst_72 [1] : vector<4x8xf32> to vector<4xf32>
    %310 = vector.shape_cast %309 : vector<4xf32> to vector<4x1xf32>
    %311 = vector.broadcast %310 : vector<4x1xf32> to vector<4x8xf32>
    %312 = arith.divf %308, %311 : vector<4x8xf32>
    %313 = vector.shape_cast %312 : vector<4x8xf32> to vector<4x8x1xf32>
    %314 = vector.broadcast %313 : vector<4x8x1xf32> to vector<4x8x32xf32>
    %315 = arith.mulf %314, %2 : vector<4x8x32xf32>
    %cst_73 = arith.constant dense<0.000000e+00> : vector<4x32xf32>
    %316 = vector.multi_reduction <add>, %315, %cst_73 [1] : vector<4x8x32xf32> to vector<4x32xf32>
    %317 = tpu.concatenate %316, %270 in 1 : vector<4x32xf32>, vector<4x32xf32> -> vector<4x64xf32>
    %c4 = arith.constant 4 : index
    %c0_74 = arith.constant 0 : index
    %c0_75 = arith.constant 0 : index
    %318 = vector.load %arg3[%c4, %c0_74, %c0_75] : memref<6x4x128xf32, #tpu.memory_space<vmem>>, vector<1x4x128xf32>
    %319 = vector.shape_cast %318 : vector<1x4x128xf32> to vector<4x128xf32>
    %cst_76 = arith.constant dense<0.000000e+00> : vector<4x128xf32>
    %320 = tpu.matmul %317, %3, %cst_76 {dimension_numbers = #tpu.dot_dimension_numbers<[1], [0], [0], [1], [0, 0, 1, 1], [], []>} : vector<4x64xf32>, vector<64x128xf32>, vector<4x128xf32> -> vector<4x128xf32>
    %321 = arith.addf %319, %320 : vector<4x128xf32>
    %322 = vector.extract_strided_slice %321 {offsets = [0, 0], sizes = [4, 32], strides = [1, 1]} : vector<4x128xf32> to vector<4x32xf32>
    %323 = arith.negf %322 : vector<4x32xf32>
    %324 = math.exp %323 : vector<4x32xf32>
    %cst_77 = arith.constant 1.000000e+00 : f32
    %325 = vector.broadcast %cst_77 : f32 to vector<4x32xf32>
    %326 = arith.addf %325, %324 : vector<4x32xf32>
    %327 = arith.divf %325, %326 : vector<4x32xf32>
    %328 = vector.extract_strided_slice %321 {offsets = [0, 32], sizes = [4, 32], strides = [1, 1]} : vector<4x128xf32> to vector<4x32xf32>
    %329 = arith.negf %328 : vector<4x32xf32>
    %330 = math.exp %329 : vector<4x32xf32>
    %cst_78 = arith.constant 1.000000e+00 : f32
    %331 = vector.broadcast %cst_78 : f32 to vector<4x32xf32>
    %332 = arith.addf %331, %330 : vector<4x32xf32>
    %333 = arith.divf %331, %332 : vector<4x32xf32>
    %334 = vector.extract_strided_slice %321 {offsets = [0, 64], sizes = [4, 32], strides = [1, 1]} : vector<4x128xf32> to vector<4x32xf32>
    %335 = math.tanh %334 : vector<4x32xf32>
    %336 = vector.extract_strided_slice %321 {offsets = [0, 96], sizes = [4, 32], strides = [1, 1]} : vector<4x128xf32> to vector<4x32xf32>
    %337 = arith.negf %336 : vector<4x32xf32>
    %338 = math.exp %337 : vector<4x32xf32>
    %cst_79 = arith.constant 1.000000e+00 : f32
    %339 = vector.broadcast %cst_79 : f32 to vector<4x32xf32>
    %340 = arith.addf %339, %338 : vector<4x32xf32>
    %341 = arith.divf %339, %340 : vector<4x32xf32>
    %342 = arith.mulf %333, %268 : vector<4x32xf32>
    %343 = arith.mulf %327, %335 : vector<4x32xf32>
    %344 = arith.addf %342, %343 : vector<4x32xf32>
    %345 = math.tanh %344 : vector<4x32xf32>
    %346 = arith.mulf %341, %345 : vector<4x32xf32>
    %347 = tpu.concatenate %346, %298 in 1 : vector<4x32xf32>, vector<4x32xf32> -> vector<4x64xf32>
    %cst_80 = arith.constant dense<0.000000e+00> : vector<4x128xf32>
    %348 = tpu.matmul %347, %4, %cst_80 {dimension_numbers = #tpu.dot_dimension_numbers<[1], [0], [0], [1], [0, 0, 1, 1], [], []>} : vector<4x64xf32>, vector<64x128xf32>, vector<4x128xf32> -> vector<4x128xf32>
    %349 = arith.addf %348, %7 : vector<4x128xf32>
    %350 = vector.extract_strided_slice %349 {offsets = [0, 0], sizes = [4, 32], strides = [1, 1]} : vector<4x128xf32> to vector<4x32xf32>
    %351 = arith.negf %350 : vector<4x32xf32>
    %352 = math.exp %351 : vector<4x32xf32>
    %cst_81 = arith.constant 1.000000e+00 : f32
    %353 = vector.broadcast %cst_81 : f32 to vector<4x32xf32>
    %354 = arith.addf %353, %352 : vector<4x32xf32>
    %355 = arith.divf %353, %354 : vector<4x32xf32>
    %356 = vector.extract_strided_slice %349 {offsets = [0, 32], sizes = [4, 32], strides = [1, 1]} : vector<4x128xf32> to vector<4x32xf32>
    %357 = arith.negf %356 : vector<4x32xf32>
    %358 = math.exp %357 : vector<4x32xf32>
    %cst_82 = arith.constant 1.000000e+00 : f32
    %359 = vector.broadcast %cst_82 : f32 to vector<4x32xf32>
    %360 = arith.addf %359, %358 : vector<4x32xf32>
    %361 = arith.divf %359, %360 : vector<4x32xf32>
    %362 = vector.extract_strided_slice %349 {offsets = [0, 64], sizes = [4, 32], strides = [1, 1]} : vector<4x128xf32> to vector<4x32xf32>
    %363 = math.tanh %362 : vector<4x32xf32>
    %364 = vector.extract_strided_slice %349 {offsets = [0, 96], sizes = [4, 32], strides = [1, 1]} : vector<4x128xf32> to vector<4x32xf32>
    %365 = arith.negf %364 : vector<4x32xf32>
    %366 = math.exp %365 : vector<4x32xf32>
    %cst_83 = arith.constant 1.000000e+00 : f32
    %367 = vector.broadcast %cst_83 : f32 to vector<4x32xf32>
    %368 = arith.addf %367, %366 : vector<4x32xf32>
    %369 = arith.divf %367, %368 : vector<4x32xf32>
    %370 = arith.mulf %361, %296 : vector<4x32xf32>
    %371 = arith.mulf %355, %363 : vector<4x32xf32>
    %372 = arith.addf %370, %371 : vector<4x32xf32>
    %373 = math.tanh %372 : vector<4x32xf32>
    %374 = arith.mulf %369, %373 : vector<4x32xf32>
    %375 = vector.shape_cast %374 : vector<4x32xf32> to vector<4x1x32xf32>
    %376 = vector.broadcast %375 : vector<4x1x32xf32> to vector<4x8x32xf32>
    %377 = arith.mulf %0, %376 : vector<4x8x32xf32>
    %cst_84 = arith.constant dense<0.000000e+00> : vector<4x8xf32>
    %378 = vector.multi_reduction <add>, %377, %cst_84 [2] : vector<4x8x32xf32> to vector<4x8xf32>
    %379 = arith.addf %378, %1 : vector<4x8xf32>
    %cst_85 = arith.constant dense<0xFF800000> : vector<4xf32>
    %380 = vector.multi_reduction <maximumf>, %379, %cst_85 [1] : vector<4x8xf32> to vector<4xf32>
    %381 = vector.shape_cast %380 : vector<4xf32> to vector<4x1xf32>
    %382 = vector.broadcast %381 : vector<4x1xf32> to vector<4x8xf32>
    %383 = arith.subf %379, %382 : vector<4x8xf32>
    %384 = math.exp %383 : vector<4x8xf32>
    %cst_86 = arith.constant dense<0.000000e+00> : vector<4xf32>
    %385 = vector.multi_reduction <add>, %384, %cst_86 [1] : vector<4x8xf32> to vector<4xf32>
    %386 = vector.shape_cast %385 : vector<4xf32> to vector<4x1xf32>
    %387 = vector.broadcast %386 : vector<4x1xf32> to vector<4x8xf32>
    %388 = arith.divf %384, %387 : vector<4x8xf32>
    %389 = vector.shape_cast %388 : vector<4x8xf32> to vector<4x8x1xf32>
    %390 = vector.broadcast %389 : vector<4x8x1xf32> to vector<4x8x32xf32>
    %391 = arith.mulf %390, %2 : vector<4x8x32xf32>
    %cst_87 = arith.constant dense<0.000000e+00> : vector<4x32xf32>
    %392 = vector.multi_reduction <add>, %391, %cst_87 [1] : vector<4x8x32xf32> to vector<4x32xf32>
    %393 = tpu.concatenate %392, %346 in 1 : vector<4x32xf32>, vector<4x32xf32> -> vector<4x64xf32>
    %c5 = arith.constant 5 : index
    %c0_88 = arith.constant 0 : index
    %c0_89 = arith.constant 0 : index
    %394 = vector.load %arg3[%c5, %c0_88, %c0_89] : memref<6x4x128xf32, #tpu.memory_space<vmem>>, vector<1x4x128xf32>
    %395 = vector.shape_cast %394 : vector<1x4x128xf32> to vector<4x128xf32>
    %cst_90 = arith.constant dense<0.000000e+00> : vector<4x128xf32>
    %396 = tpu.matmul %393, %3, %cst_90 {dimension_numbers = #tpu.dot_dimension_numbers<[1], [0], [0], [1], [0, 0, 1, 1], [], []>} : vector<4x64xf32>, vector<64x128xf32>, vector<4x128xf32> -> vector<4x128xf32>
    %397 = arith.addf %395, %396 : vector<4x128xf32>
    %398 = vector.extract_strided_slice %397 {offsets = [0, 0], sizes = [4, 32], strides = [1, 1]} : vector<4x128xf32> to vector<4x32xf32>
    %399 = arith.negf %398 : vector<4x32xf32>
    %400 = math.exp %399 : vector<4x32xf32>
    %cst_91 = arith.constant 1.000000e+00 : f32
    %401 = vector.broadcast %cst_91 : f32 to vector<4x32xf32>
    %402 = arith.addf %401, %400 : vector<4x32xf32>
    %403 = arith.divf %401, %402 : vector<4x32xf32>
    %404 = vector.extract_strided_slice %397 {offsets = [0, 32], sizes = [4, 32], strides = [1, 1]} : vector<4x128xf32> to vector<4x32xf32>
    %405 = arith.negf %404 : vector<4x32xf32>
    %406 = math.exp %405 : vector<4x32xf32>
    %cst_92 = arith.constant 1.000000e+00 : f32
    %407 = vector.broadcast %cst_92 : f32 to vector<4x32xf32>
    %408 = arith.addf %407, %406 : vector<4x32xf32>
    %409 = arith.divf %407, %408 : vector<4x32xf32>
    %410 = vector.extract_strided_slice %397 {offsets = [0, 64], sizes = [4, 32], strides = [1, 1]} : vector<4x128xf32> to vector<4x32xf32>
    %411 = math.tanh %410 : vector<4x32xf32>
    %412 = vector.extract_strided_slice %397 {offsets = [0, 96], sizes = [4, 32], strides = [1, 1]} : vector<4x128xf32> to vector<4x32xf32>
    %413 = arith.negf %412 : vector<4x32xf32>
    %414 = math.exp %413 : vector<4x32xf32>
    %cst_93 = arith.constant 1.000000e+00 : f32
    %415 = vector.broadcast %cst_93 : f32 to vector<4x32xf32>
    %416 = arith.addf %415, %414 : vector<4x32xf32>
    %417 = arith.divf %415, %416 : vector<4x32xf32>
    %418 = arith.mulf %409, %344 : vector<4x32xf32>
    %419 = arith.mulf %403, %411 : vector<4x32xf32>
    %420 = arith.addf %418, %419 : vector<4x32xf32>
    %421 = math.tanh %420 : vector<4x32xf32>
    %422 = arith.mulf %417, %421 : vector<4x32xf32>
    %423 = tpu.concatenate %422, %374 in 1 : vector<4x32xf32>, vector<4x32xf32> -> vector<4x64xf32>
    %cst_94 = arith.constant dense<0.000000e+00> : vector<4x128xf32>
    %424 = tpu.matmul %423, %4, %cst_94 {dimension_numbers = #tpu.dot_dimension_numbers<[1], [0], [0], [1], [0, 0, 1, 1], [], []>} : vector<4x64xf32>, vector<64x128xf32>, vector<4x128xf32> -> vector<4x128xf32>
    %425 = arith.addf %424, %7 : vector<4x128xf32>
    %426 = vector.extract_strided_slice %425 {offsets = [0, 0], sizes = [4, 32], strides = [1, 1]} : vector<4x128xf32> to vector<4x32xf32>
    %427 = arith.negf %426 : vector<4x32xf32>
    %428 = math.exp %427 : vector<4x32xf32>
    %cst_95 = arith.constant 1.000000e+00 : f32
    %429 = vector.broadcast %cst_95 : f32 to vector<4x32xf32>
    %430 = arith.addf %429, %428 : vector<4x32xf32>
    %431 = arith.divf %429, %430 : vector<4x32xf32>
    %432 = vector.extract_strided_slice %425 {offsets = [0, 32], sizes = [4, 32], strides = [1, 1]} : vector<4x128xf32> to vector<4x32xf32>
    %433 = arith.negf %432 : vector<4x32xf32>
    %434 = math.exp %433 : vector<4x32xf32>
    %cst_96 = arith.constant 1.000000e+00 : f32
    %435 = vector.broadcast %cst_96 : f32 to vector<4x32xf32>
    %436 = arith.addf %435, %434 : vector<4x32xf32>
    %437 = arith.divf %435, %436 : vector<4x32xf32>
    %438 = vector.extract_strided_slice %425 {offsets = [0, 64], sizes = [4, 32], strides = [1, 1]} : vector<4x128xf32> to vector<4x32xf32>
    %439 = math.tanh %438 : vector<4x32xf32>
    %440 = vector.extract_strided_slice %425 {offsets = [0, 96], sizes = [4, 32], strides = [1, 1]} : vector<4x128xf32> to vector<4x32xf32>
    %441 = arith.negf %440 : vector<4x32xf32>
    %442 = math.exp %441 : vector<4x32xf32>
    %cst_97 = arith.constant 1.000000e+00 : f32
    %443 = vector.broadcast %cst_97 : f32 to vector<4x32xf32>
    %444 = arith.addf %443, %442 : vector<4x32xf32>
    %445 = arith.divf %443, %444 : vector<4x32xf32>
    %446 = arith.mulf %437, %372 : vector<4x32xf32>
    %447 = arith.mulf %431, %439 : vector<4x32xf32>
    %448 = arith.addf %446, %447 : vector<4x32xf32>
    %449 = math.tanh %448 : vector<4x32xf32>
    %450 = arith.mulf %445, %449 : vector<4x32xf32>
    %451 = vector.shape_cast %450 : vector<4x32xf32> to vector<4x1x32xf32>
    %452 = vector.broadcast %451 : vector<4x1x32xf32> to vector<4x8x32xf32>
    %453 = arith.mulf %0, %452 : vector<4x8x32xf32>
    %cst_98 = arith.constant dense<0.000000e+00> : vector<4x8xf32>
    %454 = vector.multi_reduction <add>, %453, %cst_98 [2] : vector<4x8x32xf32> to vector<4x8xf32>
    %455 = arith.addf %454, %1 : vector<4x8xf32>
    %cst_99 = arith.constant dense<0xFF800000> : vector<4xf32>
    %456 = vector.multi_reduction <maximumf>, %455, %cst_99 [1] : vector<4x8xf32> to vector<4xf32>
    %457 = vector.shape_cast %456 : vector<4xf32> to vector<4x1xf32>
    %458 = vector.broadcast %457 : vector<4x1xf32> to vector<4x8xf32>
    %459 = arith.subf %455, %458 : vector<4x8xf32>
    %460 = math.exp %459 : vector<4x8xf32>
    %cst_100 = arith.constant dense<0.000000e+00> : vector<4xf32>
    %461 = vector.multi_reduction <add>, %460, %cst_100 [1] : vector<4x8xf32> to vector<4xf32>
    %462 = vector.shape_cast %461 : vector<4xf32> to vector<4x1xf32>
    %463 = vector.broadcast %462 : vector<4x1xf32> to vector<4x8xf32>
    %464 = arith.divf %460, %463 : vector<4x8xf32>
    %465 = vector.shape_cast %464 : vector<4x8xf32> to vector<4x8x1xf32>
    %466 = vector.broadcast %465 : vector<4x8x1xf32> to vector<4x8x32xf32>
    %467 = arith.mulf %466, %2 : vector<4x8x32xf32>
    %cst_101 = arith.constant dense<0.000000e+00> : vector<4x32xf32>
    %468 = vector.multi_reduction <add>, %467, %cst_101 [1] : vector<4x8x32xf32> to vector<4x32xf32>
    %469 = tpu.concatenate %70, %146, %222, %298, %374, %450 in 0 : vector<4x32xf32>, vector<4x32xf32>, vector<4x32xf32>, vector<4x32xf32>, vector<4x32xf32>, vector<4x32xf32> -> vector<24x32xf32>
    %470 = tpu.concatenate %88, %164, %240, %316, %392, %468 in 0 : vector<4x32xf32>, vector<4x32xf32>, vector<4x32xf32>, vector<4x32xf32>, vector<4x32xf32>, vector<4x32xf32> -> vector<24x32xf32>
    %471 = tpu.concatenate %469, %470 in 1 : vector<24x32xf32>, vector<24x32xf32> -> vector<24x64xf32>
    %c0_102 = arith.constant 0 : index
    %c0_103 = arith.constant 0 : index
    %472 = vector.load %arg7[%c0_102, %c0_103] : memref<64x64xf32, #tpu.memory_space<vmem>>, vector<64x64xf32>
    %cst_104 = arith.constant dense<0.000000e+00> : vector<24x64xf32>
    %473 = tpu.matmul %471, %472, %cst_104 {dimension_numbers = #tpu.dot_dimension_numbers<[1], [0], [0], [1], [0, 0, 1, 1], [], []>} : vector<24x64xf32>, vector<64x64xf32>, vector<24x64xf32> -> vector<24x64xf32>
    %c0_105 = arith.constant 0 : index
    %c0_106 = arith.constant 0 : index
    %474 = vector.load %arg8[%c0_105, %c0_106] : memref<1x64xf32, #tpu.memory_space<vmem>>, vector<1x64xf32>
    %475 = vector.shape_cast %474 : vector<1x64xf32> to vector<1x64xf32>
    %476 = vector.broadcast %475 : vector<1x64xf32> to vector<24x64xf32>
    %477 = arith.addf %473, %476 : vector<24x64xf32>
    %cst_107 = arith.constant 0.000000e+00 : f32
    %478 = vector.broadcast %cst_107 : f32 to vector<24x64xf32>
    %479 = arith.cmpf oge, %477, %478 : vector<24x64xf32>
    %cst_108 = arith.constant 0.899999976 : f32
    %480 = vector.broadcast %cst_108 : f32 to vector<24x64xf32>
    %481 = arith.mulf %480, %477 : vector<24x64xf32>
    %482 = arith.select %479, %477, %481 : vector<24x64xi1>, vector<24x64xf32>
    %c0_109 = arith.constant 0 : index
    %c0_110 = arith.constant 0 : index
    %483 = vector.load %arg9[%c0_109, %c0_110] : memref<64x16xf32, #tpu.memory_space<vmem>>, vector<64x16xf32>
    %cst_111 = arith.constant dense<0.000000e+00> : vector<24x16xf32>
    %484 = tpu.matmul %482, %483, %cst_111 {dimension_numbers = #tpu.dot_dimension_numbers<[1], [0], [0], [1], [0, 0, 1, 1], [], []>} : vector<24x64xf32>, vector<64x16xf32>, vector<24x16xf32> -> vector<24x16xf32>
    %c0_112 = arith.constant 0 : index
    %c0_113 = arith.constant 0 : index
    %485 = vector.load %arg10[%c0_112, %c0_113] : memref<1x16xf32, #tpu.memory_space<vmem>>, vector<1x16xf32>
    %486 = vector.shape_cast %485 : vector<1x16xf32> to vector<1x16xf32>
    %487 = vector.broadcast %486 : vector<1x16xf32> to vector<24x16xf32>
    %488 = arith.addf %484, %487 : vector<24x16xf32>
    %c0_114 = arith.constant 0 : index
    %c0_115 = arith.constant 0 : index
    %489 = vector.load %arg11[%c0_114, %c0_115] : memref<24x16xf32, #tpu.memory_space<vmem>>, vector<24x16xf32>
    tpu.vector_store %arg11[%c0_114, %c0_115], %488 {strides = array<i32>} : memref<24x16xf32, #tpu.memory_space<vmem>>, vector<24x16xf32>,
    %490 = tpu.concatenate %84, %160, %236, %312, %388, %464 in 0 : vector<4x8xf32>, vector<4x8xf32>, vector<4x8xf32>, vector<4x8xf32>, vector<4x8xf32>, vector<4x8xf32> -> vector<24x8xf32>
    %c0_116 = arith.constant 0 : index
    %c0_117 = arith.constant 0 : index
    %491 = vector.load %arg12[%c0_116, %c0_117] : memref<24x8xf32, #tpu.memory_space<vmem>>, vector<24x8xf32>
    tpu.vector_store %arg12[%c0_116, %c0_117], %490 {strides = array<i32>} : memref<24x8xf32, #tpu.memory_space<vmem>>, vector<24x8xf32>,
    return
  }
}

</mosaic_0001>

<bundles_post_ra>
// kernel: tpu_custom_call.1
= control target key start
LH: loop header
LB: loop body
LE: loop exit
PB: predicated region body
PF: predicated region fallthrough
CT: control target
= control target key end

     0   :  { %18 = vsyncpa [#allocation3], 0  ;;  %s5497_s0 = inlined_call_operand.hbm [shape: f32[4,8,32], index: 0, kind: input, shape index: {}]   ;;  %s5498_s1 = inlined_call_operand.vmem [shape: f32[4,8], index: 1, kind: input, shape index: {}]   ;;  %s5499_s2 = inlined_call_operand.hbm [shape: f32[4,8,32], index: 2, kind: input, shape index: {}]   ;;  %s5500_s3 = inlined_call_operand.hbm [shape: f32[6,4,128], index: 3, kind: input, shape index: {}]   ;;  %s5501_s4 = inlined_call_operand.vmem [shape: f32[64,128], index: 4, kind: input, shape index: {}]   ;;  %s5502_s5 = inlined_call_operand.hbm [shape: f32[64,128], index: 5, kind: input, shape index: {}]   ;;  %s5503_s6 = inlined_call_operand.vmem [shape: f32[1,128], index: 6, kind: input, shape index: {}]   ;;  %s5504_s7 = inlined_call_operand.hbm [shape: f32[64,64], index: 7, kind: input, shape index: {}]   ;;  %s5505_s8 = inlined_call_operand.vmem [shape: f32[1,64], index: 8, kind: input, shape index: {}]   ;;  %s5506_s9 = inlined_call_operand.vmem [shape: f32[64,16], index: 9, kind: input, shape index: {}]   ;;  %s5507_s10 = inlined_call_operand.vmem [shape: f32[1,16], index: 10, kind: input, shape index: {}]   ;;  %s5508_s11 = inlined_call_operand.vmem [shape: f32[24,16], index: 11, kind: output, shape index: {0}]   ;;  %s5509_s12 = inlined_call_operand.vmem [shape: f32[24,8], index: 12, kind: output, shape index: {1}]  }
   0x1   :  { %19 = vsyncpa [#allocation5], 0 }
   0x2   :  { %20 = vsyncpa [#allocation8], 0  ;;  %s4263_s21 = smov [#allocation4]   ;;  %s4264_s23 = smov [#allocation7]  }
   0x3   :  { %s40_s22 = sshll.u32 %s4263_s21, 4  ;;  %s66_s24 = sshll.u32 %s4264_s23, 4  ;;  %s41_s22 = int_to_ptr.vmem [resolvable:$true] %s40_s22  ;;  %s67_s24 = int_to_ptr.vmem [resolvable:$true] %s66_s24 }
   0x4   :  { %s4165_s25 = scalar_lea.vmem %s41_s22, 512  ;;  %p4170_p1 = scmp.lt.s32.totalorder %s41_s22, %s41_s22 }
   0x5   :  { %p4166_p0 = scmp.ne.s32.totalorder %s41_s22, %s4165_s25  ;;  %p4171_p2 = scmp.lt.s32.totalorder %s4165_s25, %s4165_s25 }
   0x7   :  { %p4172_p3 = por %p4171_p2, %p4170_p1 }
   0x9   :  { %p4173_p4 = pnand %p4172_p3, %p4166_p0 }
   0xb   :  { %4176 = shalt.err (!%p4173_p4)
}
   0xc   :  { %s4265_s26 = smov 128   ;;  %s4266_s27 = smov 8  }
   0xd   :  { %46 = dma.hbm_to_vmem [thread:$0]  %s5499_s2, 512, %s41_s22, [#allocation5], %s4265_s26, %s4265_s26, %s4266_s27  }
   0xe   :  { %s4185_s30 = scalar_lea.vmem %s67_s24, 1024  ;;  %p4190_p6 = scmp.lt.s32.totalorder %s67_s24, %s67_s24 }
   0xf   :  { %p4186_p5 = scmp.ne.s32.totalorder %s67_s24, %s4185_s30  ;;  %p4191_p7 = scmp.lt.s32.totalorder %s4185_s30, %s4185_s30 }
  0x11   :  { %p4192_p8 = por %p4191_p7, %p4190_p6 }
  0x13   :  { %p4193_p9 = pnand %p4192_p8, %p4186_p5 }
  0x15   :  { %4196 = shalt.err (!%p4193_p9)
}
  0x16   :  { %72 = dma.hbm_to_vmem [thread:$0]  %s5502_s5, 1024, %s67_s24, [#allocation8], %s4265_s26, %s4265_s26, %s4266_s27  }
  0x17   :  { %s4267_s15 = smov [#allocation2]   ;;  %s4268_s17 = smov [#allocation6]  }
  0x18   :  { %s26_s16 = sshll.u32 %s4267_s15, 4  ;;  %s52_s18 = sshll.u32 %s4268_s17, 4  ;;  %s27_s16 = int_to_ptr.vmem [resolvable:$true] %s26_s16  ;;  %s53_s18 = int_to_ptr.vmem [resolvable:$true] %s52_s18 }
  0x19   :  { %s4205_s2 = scalar_lea.vmem %s27_s16, 512  ;;  %p4210_p11 = scmp.lt.s32.totalorder %s27_s16, %s27_s16 }
  0x1a   :  { %p4206_p10 = scmp.ne.s32.totalorder %s27_s16, %s4205_s2  ;;  %p4211_p12 = scmp.lt.s32.totalorder %s4205_s2, %s4205_s2 }
  0x1c   :  { %p4212_p13 = por %p4211_p12, %p4210_p11 }
  0x1e   :  { %p4213_p0 = pnand %p4212_p13, %p4206_p10 }
  0x20   :  { %4216 = shalt.err (!%p4213_p0)
}
  0x21   :  { %32 = dma.hbm_to_vmem [thread:$0]  %s5497_s0, 512, %s27_s16, [#allocation3], %s4265_s26, %s4265_s26, %s4266_s27  }
  0x22   :  { %s4225_s5 = scalar_lea.vmem %s53_s18, 384  ;;  %p4230_p2 = scmp.lt.s32.totalorder %s53_s18, %s53_s18 }
  0x23   :  { %p4226_p1 = scmp.ne.s32.totalorder %s53_s18, %s4225_s5  ;;  %p4231_p3 = scmp.lt.s32.totalorder %s4225_s5, %s4225_s5 }
  0x25   :  { %p4232_p4 = por %p4231_p3, %p4230_p2 }
  0x27   :  { %p4233_p5 = pnand %p4232_p4, %p4226_p1 }
  0x29   :  { %4236 = shalt.err (!%p4233_p5)
}
  0x2a   :  { %s4269_s21 = smov 64   ;;  %s4270_s22 = smov 4  }
  0x2b   :  { %58 = dma.hbm_to_vmem [thread:$0]  %s5500_s3, 384, %s53_s18, [#allocation5], %s4269_s21, %s4269_s21, %s4270_s22  }
  0x2c   :  { %s4271_s25 = smov [#allocation9]  }
  0x2d   :  { %s80_s28 = sshll.u32 %s4271_s25, 4  ;;  %s81_s28 = int_to_ptr.vmem [resolvable:$true] %s80_s28 }
  0x2e   :  { %s4245_s29 = scalar_lea.vmem %s81_s28, 1024  ;;  %p4250_p7 = scmp.lt.s32.totalorder %s81_s28, %s81_s28 }
  0x2f   :  { %p4246_p6 = scmp.ne.s32.totalorder %s81_s28, %s4245_s29  ;;  %p4251_p8 = scmp.lt.s32.totalorder %s4245_s29, %s4245_s29 }
  0x31   :  { %p4252_p9 = por %p4251_p8, %p4250_p7 }
  0x33   :  { %p4253_p10 = pnand %p4252_p9, %p4246_p6 }
  0x35   :  { %4256 = shalt.err (!%p4253_p10)
}
  0x36   :  { %86 = dma.hbm_to_vmem [thread:$0]  %s5504_s7, 1024, %s81_s28, [#allocation8], %s4265_s26, %s4265_s26, %s4266_s27  }
  0x37   :  { %4257 = dma.done.wait [#allocation3], 512  }
  0x38   :  { %4258 = vsyncadd [#allocation3], 4294966784 }
  0x39   :  { %4259 = dma.done.wait [#allocation5], 896  }
  0x3a   :  { %4260 = vsyncadd [#allocation5], 4294966400 }
  0x3b   :  { %4261 = dma.done.wait [#allocation8], 2048  }
  0x3c   :  { %4262 = vsyncadd [#allocation8], 4294965248  ;;  %v5510_v0 = vmov 0.0   ;;  %vm4273_vm0 = vmmov 0   ;;  %v4380_v1 = vld [vmem:[%s5501_s4 + $0x38] sm:$0xff]  ;;  %v4385_v2 = vld [vmem:[%s5501_s4 + $0x30] sm:$0xff]  ;;  %v347_v53 = vlaneseq }
  0x3d   :  { %3637 = vmatprep.subr.mxu0 %v5510_v0  ;;  %3653 = vmatprep.mubr.msk.f32.mxu0 %vm4273_vm0, %v5510_v0  ;;  %v4392_v3 = vld [vmem:[%s5501_s4 + $0x28] sm:$0xff]  ;;  %v4399_v4 = vld [vmem:[%s5501_s4 + $0x20] sm:$0xff]  ;;  %v4406_v5 = vld [vmem:[%s5501_s4 + $0x18] sm:$0xff]  ;;  %s4274_s24 = smov 32   ;;  %vm244_vm1 = vcmask 261120   ;;  %vm141_vm2 = vcmask 523264  }
  0x3e   :  { %3656 = vmatprep.subr.mxu1 %v5510_v0  ;;  %3672 = vmatprep.mubr.msk.f32.mxu1 %vm4273_vm0, %v5510_v0  ;;  %v4413_v6 = vld [vmem:[%s5501_s4 + $0x10] sm:$0xff]  ;;  %v4420_v7 = vld [vmem:[%s5501_s4 + $0x8] sm:$0xff]  ;;  %v4427_v8 = vld [vmem:[%s5501_s4] sm:$0xff]  ;;  %v4275_v51 = vmov 1966171168   ;;  %v4527_v55 = vshrl.u32 %v347_v53, 7 }
  0x3f   :  { %3638 = vmatpush3.msra.mxu0 %v4380_v1  ;;  %v140_v9 = vld [vmem:[#allocation6] sm:$0xf]  ;;  %v4457_v23 = vld [vmem:[#allocation7 + $0x38] sm:$0xff]  ;;  %v4459_v24 = vld [vmem:[#allocation7 + $0x30] sm:$0xff]  ;;  %v345_v52 = vunpack.c.l.s4 %v4275_v51  ;;  %vm483_vm3 = vcmask 1041409   ;;  %vm485_vm4 = vcmask 1042434  }
  0x40   :  { %3639 = vmatprep.subr.mxu0 %v5510_v0  ;;  %3657 = vmatpush3.msra.mxu1 %v4457_v23  ;;  %v4463_v25 = vld [vmem:[#allocation7 + $0x28] sm:$0xff]  ;;  %v4467_v26 = vld [vmem:[#allocation7 + $0x20] sm:$0xff]  ;;  %v4471_v27 = vld [vmem:[#allocation7 + $0x18] sm:$0xff]  ;;  %v4535_v59 = vsub.s32 0, %v4527_v55  ;;  %vm487_vm5 = vcmask 1043459   ;;  %vm490_vm6 = vcmask 60416  }
  0x41   :  { %3640 = vmatpush3.msra.mxu0 %v4385_v2  ;;  %3658 = vmatprep.subr.mxu1 %v5510_v0  ;;  %v4475_v28 = vld [vmem:[#allocation7 + $0x10] sm:$0xff]  ;;  %v4479_v30 = vld [vmem:[#allocation7 + $0x8] sm:$0xff]  ;;  %v4486_v31 = vld [vmem:[#allocation7] sm:$0xff]  ;;  %v346_v54 = vunpack.c.0.s8 %v345_v52  ;;  %vm3067_vm7 = vcmask 1045509   ;;  %vm3069_vm8 = vcmask 1046534   ;;  %vm3071_vm9 = vcmask 1047559  }
  0x42   :  { %3641 = vmatprep.subr.mxu0 %v5510_v0  ;;  %3659 = vmatpush3.msra.mxu1 %v4459_v24  ;;  %v4517_v36 = vld [vmem:[%s5503_s6] ss:$0 sm:$0xff]  ;;  %vm3460_vm10 = vcmask 64512   ;;  %vm3063_vm11 = vcmask 1043456   ;;  %vm3333_vm15 = vcmask 130048  }
  0x43   :  { %3642 = vmatpush3.msra.mxu0 %v4392_v3  ;;  %3660 = vmatprep.subr.mxu1 %v5510_v0  ;;  %v4530_v56 = vsub.s32 %v346_v54, %v4527_v55 }
  0x44   :  { %3643 = vmatprep.subr.mxu0 %v5510_v0  ;;  %3661 = vmatpush3.msra.mxu1 %v4463_v25 }
  0x45   :  { %3644 = vmatpush3.msra.mxu0 %v4399_v4  ;;  %3662 = vmatprep.subr.mxu1 %v5510_v0 }
  0x46   :  { %3645 = vmatprep.subr.mxu0 %v5510_v0  ;;  %3663 = vmatpush3.msra.mxu1 %v4467_v26 }
  0x47   :  { %3646 = vmatpush3.msra.mxu0 %v4406_v5  ;;  %3664 = vmatprep.subr.mxu1 %v5510_v0 }
  0x48   :  { %3647 = vmatprep.subr.mxu0 %v5510_v0  ;;  %3665 = vmatpush3.msra.mxu1 %v4471_v27 }
  0x49   :  { %3648 = vmatpush3.msra.mxu0 %v4413_v6  ;;  %3666 = vmatprep.subr.mxu1 %v5510_v0 }
  0x4a   :  { %3649 = vmatprep.subr.mxu0 %v5510_v0  ;;  %3667 = vmatpush3.msra.mxu1 %v4475_v28 }
  0x4b   :  { %3650 = vmatpush3.msra.mxu0 %v4420_v7  ;;  %3668 = vmatprep.subr.mxu1 %v5510_v0 }
  0x4c   :  { %3651 = vmatprep.subr.mxu0 %v5510_v0  ;;  %3669 = vmatpush3.msra.mxu1 %v4479_v30 }
  0x4d   :  { %3652 = vmatpush3.msra.mxu0 %v4427_v8  ;;  %3670 = vmatprep.subr.mxu1 %v5510_v0 }
  0x4e   :  { %3654 = vmatmul.mubr.f32.vlgmr.msra.gmra.mxu0 %v5510_v0  ;;  %3675 = vmatprep.subr.mxu0 %v5510_v0 }
  0x4f   :  { %3676 = vmatpush3.msra.mxu0 %v4380_v1  ;;  %3691 = vmatprep.mubr.msk.f32.mxu0 %vm4273_vm0, %v5510_v0 }
  0x50   :  { %3677 = vmatprep.subr.mxu0 %v5510_v0  ;;  %3671 = vmatpush3.msra.mxu1 %v4486_v31 }
  0x51   :  { %3678 = vmatpush3.msra.mxu0 %v4385_v2  ;;  %3694 = vmatprep.subr.mxu1 %v5510_v0 }
  0x52   :  { %3679 = vmatprep.subr.mxu0 %v5510_v0 }
  0x53   :  { %3680 = vmatpush3.msra.mxu0 %v4392_v3 }
  0x54   :  { %3681 = vmatprep.subr.mxu0 %v5510_v0 }
  0x55   :  { %3682 = vmatpush3.msra.mxu0 %v4399_v4 }
  0x56   :  { %3683 = vmatprep.subr.mxu0 %v5510_v0 }
  0x57   :  { %3684 = vmatpush3.msra.mxu0 %v4406_v5 }
  0x58   :  { %3685 = vmatprep.subr.mxu0 %v5510_v0 }
  0x59   :  { %3686 = vmatpush3.msra.mxu0 %v4413_v6 }
  0x5a   :  { %3687 = vmatprep.subr.mxu0 %v5510_v0 }
  0x5b   :  { %3688 = vmatpush3.msra.mxu0 %v4420_v7 }
  0x5c   :  { %3689 = vmatprep.subr.mxu0 %v5510_v0 }
  0x5d   :  { %3690 = vmatpush3.msra.mxu0 %v4427_v8 }
  0x5e   :  { %3713 = vmatprep.subr.mxu0 %v5510_v0 }
 0x10e   :  { %v211_v10 = vpop.f32.mrf.mxu0 }
 0x10f   :  { %v215_v11 = vadd.f32 %v211_v10, %v140_v9 }
 0x110   :  { %v3655_v12 = vpop.f32.mrf.mxu0 }
 0x111   :  { %3931 = vtanh.f32 %v215_v11  ;;  %v3476_v14 = vmul.f32 -1.442695, %v215_v11 }
 0x113   :  { %3933 = vpow2.f32 %v3476_v14  ;;  %v112_v14 = vld [vmem:[%s5498_s1] sm:$0xf] }
 0x11e   :  { %v3932_v13 = vpop.eup %3931 }
 0x11f   :  { %225 = vrot.lane.b32.xlu0 %v3932_v13, %s4269_s21  ;;  %v4545_v13 = vsub.s32 1, %v4527_v55 }
 0x120   :  { %v3934_v15 = vpop.eup %3933 }
 0x121   :  { %v219_v16 = vadd.f32 1.0, %v3934_v15 }
 0x123   :  { %3935 = vrcp.f32 %v219_v16 }
 0x130   :  { %v3936_v17 = vpop.eup %3935 }
 0x131   :  { %v223_v20 = vmul.f32 0.0, %v3936_v17 }
 0x191   :  { %v226_v18 = vpop.permute.xlu0 %225 }
 0x192   :  { %v228_v19 = vmul.f32 %v3936_v17, %v226_v18  ;;  %v416_v18 = vrot.slane %v112_v14, %v4535_v59 }
 0x194   :  { %230 = vrot.lane.b32.xlu0 %v228_v19, %s4274_s24  ;;  %v4557_v19 = vld [vmem:[#allocation2] sm:$0xff] }
 0x206   :  { %v231_v21 = vpop.permute.xlu0 %230 }
 0x207   :  { %v4454_v22 = vadd.f32 %v231_v21, %v223_v20  ;;  %v4559_v21 = vld [vmem:[#allocation2 + $0x8] sm:$0xff] }
 0x209   :  { %3937 = vtanh.f32 %v4454_v22 }
 0x216   :  { %v3938_v29 = vpop.eup %3937 }
 0x217   :  { %236 = vrot.lane.b32.xlu1 %v3938_v29, %s4269_s21 }
 0x289   :  { %v237_v32 = vpop.permute.xlu1 %236 }
 0x28a   :  { %v4490_v33 = vmul.f32 %v3936_v17, %v237_v32  ;;  %v423_v17 = vrot.slane %v112_v14, %v4545_v13 }
 0x28c   :  { %241 = vrot.lane.b32.xlu1 %v4490_v33, %s4274_s24 }
 0x2fe   :  { %v242_v34 = vpop.permute.xlu1 %241 }
 0x2ff   :  { %v245_v35 = vsel %vm244_vm1, %v242_v34, 0.0  ;;  %v4562_v34 = vld [vmem:[#allocation2 + $0x10] sm:$0xff] }
 0x300   :  { %3673 = vmatmul.mubr.msk.f32.vlgmr.msra.gmra.mxu1 %vm141_vm2, %v245_v35 }
 0x301   :  { %3695 = vmatpush3.msra.mxu1 %v4457_v23  ;;  %3710 = vmatprep.mubr.msk.f32.mxu1 %vm4273_vm0, %v5510_v0 }
 0x302   :  { %3696 = vmatprep.subr.mxu1 %v5510_v0 }
 0x303   :  { %3697 = vmatpush3.msra.mxu1 %v4459_v24 }
 0x304   :  { %3698 = vmatprep.subr.mxu1 %v5510_v0 }
 0x305   :  { %3699 = vmatpush3.msra.mxu1 %v4463_v25 }
 0x306   :  { %3700 = vmatprep.subr.mxu1 %v5510_v0 }
 0x307   :  { %3701 = vmatpush3.msra.mxu1 %v4467_v26 }
 0x308   :  { %3702 = vmatprep.subr.mxu1 %v5510_v0 }
 0x309   :  { %3703 = vmatpush3.msra.mxu1 %v4471_v27 }
 0x30a   :  { %3704 = vmatprep.subr.mxu1 %v5510_v0 }
 0x30b   :  { %3705 = vmatpush3.msra.mxu1 %v4475_v28 }
 0x30c   :  { %3706 = vmatprep.subr.mxu1 %v5510_v0 }
 0x30d   :  { %3707 = vmatpush3.msra.mxu1 %v4479_v30 }
 0x30e   :  { %3708 = vmatprep.subr.mxu1 %v5510_v0 }
 0x30f   :  { %3709 = vmatpush3.msra.mxu1 %v4486_v31 }
 0x310   :  { %3732 = vmatprep.subr.mxu1 %v5510_v0 }
 0x3c0   :  { %v315_v37 = vpop.f32.mrf.mxu1 }
 0x3c1   :  { %v316_v38 = vadd.f32 %v4517_v36, %v315_v37 }
 0x3c2   :  { %v3674_v39 = vpop.f32.mrf.mxu1 }
 0x3c3   :  { %3939 = vtanh.f32 %v316_v38  ;;  %v3478_v41 = vmul.f32 -1.442695, %v316_v38  ;;  %v4566_v39 = vld [vmem:[#allocation2 + $0x18] sm:$0xff] }
 0x3c5   :  { %3941 = vpow2.f32 %v3478_v41 }
 0x3d0   :  { %v3940_v40 = vpop.eup %3939 }
 0x3d1   :  { %328 = vrot.lane.b32.xlu0 %v3940_v40, %s4269_s21 }
 0x3d2   :  { %v3942_v42 = vpop.eup %3941 }
 0x3d3   :  { %v322_v43 = vadd.f32 1.0, %v3942_v42 }
 0x3d5   :  { %3943 = vrcp.f32 %v322_v43 }
 0x3e2   :  { %v3944_v44 = vpop.eup %3943 }
 0x3e3   :  { %v326_v47 = vmul.f32 0.0, %v3944_v44 }
 0x443   :  { %v329_v45 = vpop.permute.xlu0 %328 }
 0x444   :  { %v331_v46 = vmul.f32 %v3944_v44, %v329_v45 }
 0x446   :  { %333 = vrot.lane.b32.xlu1 %v331_v46, %s4274_s24  ;;  %v4276_v46 = vmov 0  }
 0x447   :  { %3929 = vset.pattern.permute.xlu1 %v4276_v46  ;;  %3930 = vset.pattern.permute.xlu0 %v4276_v46 }
 0x4b8   :  { %v334_v48 = vpop.permute.xlu1 %333 }
 0x4b9   :  { %v4522_v49 = vadd.f32 %v334_v48, %v326_v47  ;;  %v4574_v47 = vsub.s32 2, %v4527_v55 }
 0x4bb   :  { %3945 = vtanh.f32 %v4522_v49  ;;  %v430_v48 = vrot.slane %v112_v14, %v4574_v47 }
 0x4c8   :  { %v3946_v50 = vpop.eup %3945 }
 0x4c9   :  { %339 = vrot.lane.b32.xlu0 %v3946_v50, %s4269_s21  ;;  %v4578_v50 = vsub.s32 3, %v4527_v55 }
 0x4cb   :  { %v437_v51 = vrot.slane %v112_v14, %v4578_v50 }
 0x53b   :  { %v340_v57 = vpop.permute.xlu0 %339 }
 0x53c   :  { %v4532_v58 = vmul.f32 %v3944_v44, %v340_v57 }
 0x53e   :  { %5525 = vst [vmem:[#allocation13_spill] sm:$0xff] %v4532_v58  ;;  %v350_v60 = vrot.slane %v4532_v58, %v4530_v56 }
 0x540   :  { %v358_v61 = vrot.slane %v350_v60, %v4530_v56  ;;  %v351_v62 = vcombine.high %v350_v60, %v350_v60 }
 0x542   :  { %v371_v63 = vrot.slane %v358_v61, %v4535_v59  ;;  %v365_v9 = vrot.slane %v351_v62, %v4530_v56  ;;  %v366_v10 = vcombine.high %v358_v61, %v358_v61 }
 0x544   :  { %384 = vrot.lane.b32.xlu1 %v371_v63, %s4274_s24  ;;  %v375_v11 = vrot.slane %v365_v9, %v4535_v59  ;;  %v367_v12 = vcombine.high %v365_v9, %v365_v9  ;;  %v379_v15 = vrot.slane %v366_v10, %v4535_v59 }
 0x546   :  { %386 = vrot.lane.b32.xlu0 %v375_v11, %s4274_s24  ;;  %v383_v16 = vrot.slane %v367_v12, %v4535_v59 }
 0x548   :  { %388 = vrot.lane.b32.xlu1 %v379_v15, %s4274_s24  ;;  %v466_v15 = vand.u32 127, %v347_v53 }
 0x54a   :  { %390 = vrot.lane.b32.xlu0 %v383_v16, %s4274_s24 }
 0x54c   :  { %425 = vbcast.lane.b32.xlu1 %v423_v17, 256 }
 0x54e   :  { %418 = vbcast.lane.b32.xlu0 %v416_v18, 256  ;;  %v4595_v18 = vsub.s32 %v466_v15, %v4527_v55 }
 0x5b6   :  { %v385_v20 = vpop.permute.xlu1 %384 }
 0x5b7   :  { %v396_v29 = vmul.f32 %v385_v20, %v4557_v19 }
 0x5b8   :  { %v387_v32 = vpop.permute.xlu0 %386 }
 0x5b9   :  { %v397_v35 = vmul.f32 %v387_v32, %v4559_v21  ;;  %v400_v37 = vsel %vm244_vm1, %v396_v29, 0.0 }
 0x5ba   :  { %v389_v38 = vpop.permute.xlu1 %388  ;;  %401 = vadd.xlane.f32.xlu1 %v400_v37 }
 0x5bb   :  { %v398_v40 = vmul.f32 %v389_v38, %v4562_v34  ;;  %v403_v41 = vsel %vm244_vm1, %v397_v35, 0.0 }
 0x5bc   :  { %v391_v42 = vpop.permute.xlu0 %390  ;;  %404 = vadd.xlane.f32.xlu0 %v403_v41 }
 0x5bd   :  { %v399_v43 = vmul.f32 %v391_v42, %v4566_v39  ;;  %v406_v44 = vsel %vm244_vm1, %v398_v40, 0.0 }
 0x5be   :  { %v4581_v52 = vpop.permute.xlu1 %425 }
 0x5bf   :  { %v409_v45 = vsel %vm244_vm1, %v399_v43, 0.0 }
 0x5c0   :  { %407 = vadd.xlane.f32.xlu0 %v406_v44  ;;  %410 = vadd.xlane.f32.xlu1 %v409_v45  ;;  %v4583_v54 = vpop.permute.xlu0 %418 }
 0x5d1   :  { %432 = vbcast.lane.b32.xlu1 %v430_v48, 256 }
 0x5d6   :  { %439 = vbcast.lane.b32.xlu0 %v437_v51, 256 }
 0x643   :  { %v402_v57 = vpop.xlane.xlu1 %401 }
 0x644   :  { %v445_v60 = vadd.f32 %v4583_v54, %v402_v57 }
 0x645   :  { %v405_v61 = vpop.xlane.xlu0 %404 }
 0x646   :  { %v446_v62 = vadd.f32 %v4581_v52, %v405_v61  ;;  %454 = vperm.xlu1 %3929, %v445_v60  }
 0x648   :  { %457 = vperm.xlu0 %3930, %v446_v62  }
 0x649   :  { %v408_v63 = vpop.xlane.xlu0 %407  ;;  %v411_v9 = vpop.xlane.xlu1 %410 }
 0x64d   :  { %v4587_v10 = vpop.permute.xlu1 %432  ;;  %v4590_v12 = vpop.permute.xlu0 %439 }
 0x64e   :  { %v447_v11 = vadd.f32 %v4587_v10, %v408_v63  ;;  %v448_v14 = vadd.f32 %v4590_v12, %v411_v9 }
 0x650   :  { %460 = vperm.xlu1 %3929, %v447_v11  }
 0x654   :  { %463 = vperm.xlu1 %3929, %v448_v14  }
 0x6c1   :  { %v455_v16 = vpop.permute.xlu1 %454 }
 0x6c2   :  { %v470_v35 = vrot.slane %v455_v16, %v4595_v18 }
 0x6c3   :  { %v458_v17 = vpop.permute.xlu0 %457 }
 0x6c4   :  { %v474_v29 = vrot.slane %v458_v17, %v4595_v18 }
 0x6c6   :  { %v484_v53 = vsel %vm483_vm3, %v474_v29, %v470_v35 }
 0x6cb   :  { %v461_v20 = vpop.permute.xlu1 %460 }
 0x6cc   :  { %v478_v32 = vrot.slane %v461_v20, %v4595_v18 }
 0x6ce   :  { %v486_v40 = vsel %vm485_vm4, %v478_v32, %v484_v53 }
 0x6cf   :  { %v464_v37 = vpop.permute.xlu1 %463 }
 0x6d0   :  { %v482_v38 = vrot.slane %v464_v37, %v4595_v18 }
 0x6d2   :  { %v488_v55 = vsel %vm487_vm5, %v482_v38, %v486_v40 }
 0x6d3   :  { %v491_v41 = vsel %vm490_vm6, %v488_v55, -inf }
 0x6d4   :  { %492 = vmax.xlane.f32.xlu0 %v491_v41 }
 0x75d   :  { %v493_v42 = vpop.xlane.xlu0 %492 }
 0x75e   :  { %v498_v43 = vrot.slane %v493_v42, %v4535_v59  ;;  %v502_v44 = vrot.slane %v493_v42, %v4545_v13  ;;  %v506_v45 = vrot.slane %v493_v42, %v4574_v47  ;;  %v510_v57 = vrot.slane %v493_v42, %v4578_v50 }
 0x760   :  { %v515_v46 = vsub.f32 %v445_v60, %v498_v43  ;;  %v516_v48 = vsub.f32 %v446_v62, %v502_v44  ;;  %v517_v61 = vsub.f32 %v447_v11, %v506_v45  ;;  %v518_v9 = vsub.f32 %v448_v14, %v510_v57 }
 0x762   :  { %v519_v51 = vmul.f32 1.442695, %v515_v46  ;;  %v521_v63 = vmul.f32 1.442695, %v516_v48  ;;  %v523_v15 = vmul.f32 1.442695, %v517_v61 }
 0x763   :  { %v525_v16 = vmul.f32 1.442695, %v518_v9 }
 0x764   :  { %3947 = vpow2.f32 %v519_v51 }
 0x765   :  { %3949 = vpow2.f32 %v521_v63 }
 0x766   :  { %3951 = vpow2.f32 %v523_v15 }
 0x767   :  { %3953 = vpow2.f32 %v525_v16 }
 0x771   :  { %v3948_v17 = vpop.eup %3947 }
 0x772   :  { %532 = vperm.xlu1 %3929, %v3948_v17   ;;  %v3950_v20 = vpop.eup %3949 }
 0x773   :  { %v3952_v29 = vpop.eup %3951 }
 0x774   :  { %v3954_v60 = vpop.eup %3953 }
 0x776   :  { %535 = vperm.xlu1 %3929, %v3950_v20  }
 0x77a   :  { %538 = vperm.xlu1 %3929, %v3952_v29  }
 0x77e   :  { %541 = vperm.xlu1 %3929, %v3954_v60  }
 0x7ed   :  { %v533_v62 = vpop.permute.xlu1 %532 }
 0x7ee   :  { %v546_v37 = vrot.slane %v533_v62, %v4595_v18 }
 0x7f1   :  { %v536_v32 = vpop.permute.xlu1 %535 }
 0x7f2   :  { %v550_v11 = vrot.slane %v536_v32, %v4595_v18  ;;  %v4623_v32 = vld [vmem:[#allocation4] sm:$0xff] }
 0x7f4   :  { %v559_v40 = vsel %vm483_vm3, %v550_v11, %v546_v37 }
 0x7f5   :  { %v539_v35 = vpop.permute.xlu1 %538 }
 0x7f6   :  { %v554_v14 = vrot.slane %v539_v35, %v4595_v18  ;;  %v4625_v35 = vld [vmem:[#allocation4 + $0x8] sm:$0xff] }
 0x7f7   :  { %5526 = vst [vmem:[#allocation14_spill] sm:$0xff] %v4625_v35 }
 0x7f8   :  { %v560_v55 = vsel %vm485_vm4, %v554_v14, %v559_v40 }
 0x7f9   :  { %v542_v38 = vpop.permute.xlu1 %541 }
 0x7fa   :  { %v558_v53 = vrot.slane %v542_v38, %v4595_v18 }
 0x7fc   :  { %v561_v41 = vsel %vm487_vm5, %v558_v53, %v560_v55 }
 0x7fd   :  { %v563_v42 = vsel %vm490_vm6, %v561_v41, 0.0  ;;  %v4643_v41 = vld [vmem:[#allocation4 + $0x18] sm:$0xff] }
 0x7fe   :  { %564 = vadd.xlane.f32.xlu1 %v563_v42 }
 0x887   :  { %v565_v43 = vpop.xlane.xlu1 %564 }
 0x888   :  { %v570_v44 = vrot.slane %v565_v43, %v4535_v59  ;;  %v574_v45 = vrot.slane %v565_v43, %v4545_v13  ;;  %v578_v46 = vrot.slane %v565_v43, %v4574_v47  ;;  %v582_v48 = vrot.slane %v565_v43, %v4578_v50 }
 0x88a   :  { %3955 = vrcp.f32 %v570_v44 }
 0x88b   :  { %3957 = vrcp.f32 %v574_v45 }
 0x88c   :  { %3959 = vrcp.f32 %v578_v46 }
 0x88d   :  { %3961 = vrcp.f32 %v582_v48 }
 0x897   :  { %v3956_v51 = vpop.eup %3955 }
 0x898   :  { %v3958_v57 = vpop.eup %3957  ;;  %v588_v61 = vmul.f32 %v3956_v51, %v3948_v17 }
 0x899   :  { %v3960_v63 = vpop.eup %3959  ;;  %v590_v9 = vmul.f32 %v3958_v57, %v3950_v20 }
 0x89a   :  { %597 = vperm.xlu0 %3930, %v588_v61   ;;  %v592_v15 = vmul.f32 %v3960_v63, %v3952_v29  ;;  %v3962_v16 = vpop.eup %3961  ;;  %v4635_v29 = vld [vmem:[#allocation4 + $0x10] sm:$0xff] }
 0x89b   :  { %602 = vperm.xlu1 %3929, %v590_v9   ;;  %v594_v62 = vmul.f32 %v3962_v16, %v3954_v60  ;;  %5527 = vst [vmem:[#allocation15_spill] sm:$0xff] %v4635_v29 }
 0x89e   :  { %607 = vperm.xlu0 %3930, %v592_v15  }
 0x8a2   :  { %612 = vperm.xlu0 %3930, %v594_v62  }
 0x8a6   :  { %655 = vrot.lane.b32.xlu0 %v4490_v33, %s4269_s21 }
 0x915   :  { %v4627_v11 = vpop.permute.xlu0 %597 }
 0x916   :  { %v4629_v14 = vpop.permute.xlu1 %602  ;;  %v615_v17 = vmul.f32 %v4627_v11, %v4623_v32 }
 0x917   :  { %v616_v20 = vmul.f32 %v4629_v14, %v4625_v35 }
 0x918   :  { %v619_v60 = vsel %vm244_vm1, %v615_v17, 0.0 }
 0x919   :  { %v626_v33 = vsel %vm244_vm1, %v616_v20, 0.0  ;;  %v620_v37 = vrot.slane %v619_v60, 4  ;;  %v4639_v38 = vpop.permute.xlu0 %607 }
 0x91a   :  { %5528 = vst [vmem:[#allocation16_spill] sm:$0xff] %v4639_v38  ;;  %v627_v53 = vrot.slane %v626_v33, 4  ;;  %v617_v40 = vmul.f32 %v4639_v38, %v4635_v29 }
 0x91b   :  { %v621_v55 = vadd.f32 %v620_v37, %v619_v60 }
 0x91c   :  { %v628_v42 = vadd.f32 %v627_v53, %v626_v33  ;;  %v633_v43 = vsel %vm244_vm1, %v617_v40, 0.0 }
 0x91d   :  { %v622_v44 = vrot.slane %v621_v55, 2  ;;  %v634_v45 = vrot.slane %v633_v43, 4  ;;  %v4646_v46 = vpop.permute.xlu0 %612 }
 0x91e   :  { %v629_v48 = vrot.slane %v628_v42, 2  ;;  %v618_v51 = vmul.f32 %v4646_v46, %v4643_v41 }
 0x91f   :  { %v623_v57 = vadd.f32 %v622_v44, %v621_v55  ;;  %v635_v61 = vadd.f32 %v634_v45, %v633_v43 }
 0x920   :  { %v630_v63 = vadd.f32 %v629_v48, %v628_v42  ;;  %v640_v9 = vsel %vm244_vm1, %v618_v51, 0.0  ;;  %v5530_v48 = vmov 0.0  }
 0x921   :  { %v636_v15 = vrot.slane %v635_v61, 2  ;;  %v641_v16 = vrot.slane %v640_v9, 4  ;;  %v624_v17 = vrot.slane %v623_v57, 1  ;;  %v656_v44 = vpop.permute.xlu0 %655 }
 0x922   :  { %v631_v62 = vrot.slane %v630_v63, 1 }
 0x923   :  { %v637_v20 = vadd.f32 %v636_v15, %v635_v61  ;;  %v642_v60 = vadd.f32 %v641_v16, %v640_v9  ;;  %v625_v40 = vadd.f32 %v624_v17, %v623_v57 }
 0x924   :  { %v632_v53 = vadd.f32 %v631_v62, %v630_v63 }
 0x925   :  { %v638_v33 = vrot.slane %v637_v20, 1  ;;  %v643_v37 = vrot.slane %v642_v60, 2 }
 0x926   :  { %v651_v55 = vsel %vm483_vm3, %v632_v53, %v625_v40 }
 0x927   :  { %v644_v0 = vadd.f32 %v643_v37, %v642_v60  ;;  %v639_v29 = vadd.f32 %v638_v33, %v637_v20 }
 0x929   :  { %v645_v38 = vrot.slane %v644_v0, 1  ;;  %v652_v42 = vsel %vm485_vm4, %v639_v29, %v651_v55 }
 0x92b   :  { %v646_v35 = vadd.f32 %v645_v38, %v644_v0  ;;  %v660_v0 = vld [vmem:[#allocation6 + $0x4] sm:$0xf] }
 0x92d   :  { %v4654_v43 = vsel %vm487_vm5, %v646_v35, %v652_v42 }
 0x92e   :  { %5529 = vst [vmem:[#allocation17_spill] sm:$0xff] %v4654_v43  ;;  %v658_v45 = vsel %vm244_vm1, %v4654_v43, %v656_v44 }
 0x92f   :  { %3692 = vmatmul.mubr.msk.f32.vlgmr.msra.gmra.mxu0 %vm141_vm2, %v658_v45 }
 0x930   :  { %3714 = vmatpush3.msra.mxu0 %v4380_v1  ;;  %3729 = vmatprep.mubr.msk.f32.mxu0 %vm4273_vm0, %v5530_v48 }
 0x931   :  { %3715 = vmatprep.subr.mxu0 %v5530_v48 }
 0x932   :  { %3716 = vmatpush3.msra.mxu0 %v4385_v2 }
 0x933   :  { %3717 = vmatprep.subr.mxu0 %v5530_v48 }
 0x934   :  { %3718 = vmatpush3.msra.mxu0 %v4392_v3 }
 0x935   :  { %3719 = vmatprep.subr.mxu0 %v5530_v48 }
 0x936   :  { %3720 = vmatpush3.msra.mxu0 %v4399_v4 }
 0x937   :  { %3721 = vmatprep.subr.mxu0 %v5530_v48 }
 0x938   :  { %3722 = vmatpush3.msra.mxu0 %v4406_v5 }
 0x939   :  { %3723 = vmatprep.subr.mxu0 %v5530_v48 }
 0x93a   :  { %3724 = vmatpush3.msra.mxu0 %v4413_v6 }
 0x93b   :  { %3725 = vmatprep.subr.mxu0 %v5530_v48 }
 0x93c   :  { %3726 = vmatpush3.msra.mxu0 %v4420_v7 }
 0x93d   :  { %3727 = vmatprep.subr.mxu0 %v5530_v48 }
 0x93e   :  { %3728 = vmatpush3.msra.mxu0 %v4427_v8 }
 0x93f   :  { %3751 = vmatprep.subr.mxu0 %v5530_v48 }
 0x9ef   :  { %v730_v1 = vpop.f32.mrf.mxu0 }
 0x9f0   :  { %v734_v2 = vadd.f32 %v730_v1, %v660_v0 }
 0x9f1   :  { %v3693_v3 = vpop.f32.mrf.mxu0 }
 0x9f2   :  { %3963 = vtanh.f32 %v734_v2  ;;  %v3480_v5 = vmul.f32 -1.442695, %v734_v2 }
 0x9f4   :  { %3965 = vpow2.f32 %v3480_v5 }
 0x9ff   :  { %v3964_v4 = vpop.eup %3963 }
 0xa00   :  { %744 = vrot.lane.b32.xlu0 %v3964_v4, %s4269_s21 }
 0xa01   :  { %v3966_v6 = vpop.eup %3965 }
 0xa02   :  { %v738_v35 = vadd.f32 1.0, %v3966_v6 }
 0xa04   :  { %3967 = vrcp.f32 %v738_v35 }
 0xa11   :  { %v3968_v7 = vpop.eup %3967 }
 0xa12   :  { %v742_v8 = vmul.f32 %v3968_v7, %v4454_v22 }
 0xa72   :  { %v745_v29 = vpop.permute.xlu0 %744 }
 0xa73   :  { %v747_v38 = vmul.f32 %v3968_v7, %v745_v29 }
 0xa75   :  { %749 = vrot.lane.b32.xlu0 %v747_v38, %s4274_s24 }
 0xae7   :  { %v750_v51 = vpop.permute.xlu0 %749 }
 0xae8   :  { %v4680_v57 = vadd.f32 %v750_v51, %v742_v8 }
 0xaea   :  { %3969 = vtanh.f32 %v4680_v57 }
 0xaf7   :  { %v3970_v61 = vpop.eup %3969 }
 0xaf8   :  { %755 = vrot.lane.b32.xlu1 %v3970_v61, %s4269_s21 }
 0xafc   :  { %763 = vrot.lane.b32.xlu1 %v4532_v58, %s4269_s21 }
 0xb6a   :  { %v756_v63 = vpop.permute.xlu1 %755 }
 0xb6b   :  { %v4686_v9 = vmul.f32 %v3968_v7, %v756_v63 }
 0xb6d   :  { %760 = vrot.lane.b32.xlu0 %v4686_v9, %s4274_s24 }
 0xb6e   :  { %v764_v15 = vpop.permute.xlu1 %763 }
 0xbdf   :  { %v761_v16 = vpop.permute.xlu0 %760 }
 0xbe0   :  { %v766_v22 = vsel %vm244_vm1, %v761_v16, %v764_v15 }
 0xbe1   :  { %3711 = vmatmul.mubr.msk.f32.vlgmr.msra.gmra.mxu1 %vm141_vm2, %v766_v22 }
 0xbe2   :  { %3733 = vmatpush3.msra.mxu1 %v4457_v23  ;;  %3748 = vmatprep.mubr.msk.f32.mxu1 %vm4273_vm0, %v5530_v48 }
 0xbe3   :  { %3734 = vmatprep.subr.mxu1 %v5530_v48 }
 0xbe4   :  { %3735 = vmatpush3.msra.mxu1 %v4459_v24 }
 0xbe5   :  { %3736 = vmatprep.subr.mxu1 %v5530_v48 }
 0xbe6   :  { %3737 = vmatpush3.msra.mxu1 %v4463_v25 }
 0xbe7   :  { %3738 = vmatprep.subr.mxu1 %v5530_v48 }
 0xbe8   :  { %3739 = vmatpush3.msra.mxu1 %v4467_v26 }
 0xbe9   :  { %3740 = vmatprep.subr.mxu1 %v5530_v48 }
 0xbea   :  { %3741 = vmatpush3.msra.mxu1 %v4471_v27 }
 0xbeb   :  { %3742 = vmatprep.subr.mxu1 %v5530_v48 }
 0xbec   :  { %3743 = vmatpush3.msra.mxu1 %v4475_v28 }
 0xbed   :  { %3744 = vmatprep.subr.mxu1 %v5530_v48 }
 0xbee   :  { %3745 = vmatpush3.msra.mxu1 %v4479_v30 }
 0xbef   :  { %3746 = vmatprep.subr.mxu1 %v5530_v48 }
 0xbf0   :  { %3747 = vmatpush3.msra.mxu1 %v4486_v31 }
 0xbf1   :  { %3770 = vmatprep.subr.mxu1 %v5530_v48 }
 0xca1   :  { %v836_v23 = vpop.f32.mrf.mxu1 }
 0xca2   :  { %v837_v24 = vadd.f32 %v4517_v36, %v836_v23 }
 0xca3   :  { %v3712_v25 = vpop.f32.mrf.mxu1 }
 0xca4   :  { %3971 = vtanh.f32 %v837_v24  ;;  %v3482_v27 = vmul.f32 -1.442695, %v837_v24 }
 0xca6   :  { %3973 = vpow2.f32 %v3482_v27 }
 0xcb1   :  { %v3972_v26 = vpop.eup %3971 }
 0xcb2   :  { %849 = vrot.lane.b32.xlu0 %v3972_v26, %s4269_s21 }
 0xcb3   :  { %v3974_v28 = vpop.eup %3973 }
 0xcb4   :  { %v843_v62 = vadd.f32 1.0, %v3974_v28 }
 0xcb6   :  { %3975 = vrcp.f32 %v843_v62 }
 0xcc3   :  { %v3976_v30 = vpop.eup %3975 }
 0xcc4   :  { %v847_v31 = vmul.f32 %v3976_v30, %v4522_v49 }
 0xd24   :  { %v850_v17 = vpop.permute.xlu0 %849 }
 0xd25   :  { %v852_v20 = vmul.f32 %v3976_v30, %v850_v17 }
 0xd27   :  { %854 = vrot.lane.b32.xlu1 %v852_v20, %s4274_s24 }
 0xd99   :  { %v855_v60 = vpop.permute.xlu1 %854 }
 0xd9a   :  { %v4714_v33 = vadd.f32 %v855_v60, %v847_v31 }
 0xd9c   :  { %3977 = vtanh.f32 %v4714_v33 }
 0xda9   :  { %v3978_v36 = vpop.eup %3977 }
 0xdaa   :  { %860 = vrot.lane.b32.xlu0 %v3978_v36, %s4269_s21 }
 0xe1c   :  { %v861_v37 = vpop.permute.xlu0 %860 }
 0xe1d   :  { %v4718_v53 = vmul.f32 %v3976_v30, %v861_v37 }
 0xe1f   :  { %5531 = vst [vmem:[#allocation18_spill] sm:$0xff] %v4718_v53  ;;  %v871_v40 = vrot.slane %v4718_v53, %v4530_v56 }
 0xe21   :  { %v879_v55 = vrot.slane %v871_v40, %v4530_v56  ;;  %v872_v42 = vcombine.high %v871_v40, %v871_v40 }
 0xe23   :  { %v892_v44 = vrot.slane %v879_v55, %v4535_v59  ;;  %v886_v49 = vrot.slane %v872_v42, %v4530_v56  ;;  %v887_v45 = vcombine.high %v879_v55, %v879_v55 }
 0xe25   :  { %905 = vrot.lane.b32.xlu1 %v892_v44, %s4274_s24  ;;  %v896_v0 = vrot.slane %v886_v49, %v4535_v59  ;;  %v888_v1 = vcombine.high %v886_v49, %v886_v49  ;;  %v900_v2 = vrot.slane %v887_v45, %v4535_v59 }
 0xe27   :  { %907 = vrot.lane.b32.xlu0 %v896_v0, %s4274_s24  ;;  %v904_v3 = vrot.slane %v888_v1, %v4535_v59 }
 0xe29   :  { %909 = vrot.lane.b32.xlu1 %v900_v2, %s4274_s24 }
 0xe2b   :  { %911 = vrot.lane.b32.xlu0 %v904_v3, %s4274_s24 }
 0xe97   :  { %v906_v4 = vpop.permute.xlu1 %905 }
 0xe98   :  { %v917_v5 = vmul.f32 %v906_v4, %v4557_v19 }
 0xe99   :  { %v908_v6 = vpop.permute.xlu0 %907 }
 0xe9a   :  { %v918_v35 = vmul.f32 %v908_v6, %v4559_v21  ;;  %v921_v7 = vsel %vm244_vm1, %v917_v5, 0.0 }
 0xe9b   :  { %922 = vadd.xlane.f32.xlu1 %v921_v7  ;;  %v910_v29 = vpop.permute.xlu1 %909 }
 0xe9c   :  { %v919_v38 = vmul.f32 %v910_v29, %v4562_v34  ;;  %v924_v8 = vsel %vm244_vm1, %v918_v35, 0.0 }
 0xe9d   :  { %925 = vadd.xlane.f32.xlu0 %v924_v8  ;;  %v912_v51 = vpop.permute.xlu0 %911 }
 0xe9e   :  { %v920_v61 = vmul.f32 %v912_v51, %v4566_v39  ;;  %v927_v63 = vsel %vm244_vm1, %v919_v38, 0.0 }
 0xea0   :  { %v930_v15 = vsel %vm244_vm1, %v920_v61, 0.0 }
 0xea1   :  { %928 = vadd.xlane.f32.xlu0 %v927_v63  ;;  %931 = vadd.xlane.f32.xlu1 %v930_v15 }
 0xf24   :  { %v923_v19 = vpop.xlane.xlu1 %922 }
 0xf25   :  { %v933_v21 = vadd.f32 %v923_v19, %v4583_v54 }
 0xf26   :  { %v926_v16 = vpop.xlane.xlu0 %925 }
 0xf27   :  { %v934_v22 = vadd.f32 %v926_v16, %v4581_v52  ;;  %942 = vperm.xlu0 %3930, %v933_v21  }
 0xf29   :  { %945 = vperm.xlu1 %3929, %v934_v22  }
 0xf2a   :  { %v932_v34 = vpop.xlane.xlu1 %931  ;;  %v929_v23 = vpop.xlane.xlu0 %928 }
 0xf2b   :  { %v936_v24 = vadd.f32 %v932_v34, %v4590_v12  ;;  %v935_v39 = vadd.f32 %v929_v23, %v4587_v10 }
 0xf2d   :  { %951 = vperm.xlu0 %3930, %v936_v24   ;;  %948 = vperm.xlu1 %3929, %v935_v39  }
 0xfa2   :  { %v943_v25 = vpop.permute.xlu0 %942 }
 0xfa3   :  { %v956_v28 = vrot.slane %v943_v25, %v4595_v18 }
 0xfa4   :  { %v946_v26 = vpop.permute.xlu1 %945 }
 0xfa5   :  { %v960_v27 = vrot.slane %v946_v26, %v4595_v18 }
 0xfa7   :  { %v969_v31 = vsel %vm483_vm3, %v960_v27, %v956_v28 }
 0xfa8   :  { %v949_v62 = vpop.permute.xlu1 %948  ;;  %v952_v30 = vpop.permute.xlu0 %951 }
 0xfa9   :  { %v964_v17 = vrot.slane %v949_v62, %v4595_v18  ;;  %v968_v20 = vrot.slane %v952_v30, %v4595_v18 }
 0xfab   :  { %v970_v60 = vsel %vm485_vm4, %v964_v17, %v969_v31 }
 0xfac   :  { %v971_v36 = vsel %vm487_vm5, %v968_v20, %v970_v60 }
 0xfad   :  { %v973_v37 = vsel %vm490_vm6, %v971_v36, -inf }
 0xfae   :  { %974 = vmax.xlane.f32.xlu1 %v973_v37 }
0x1037   :  { %v975_v40 = vpop.xlane.xlu1 %974 }
0x1038   :  { %v980_v55 = vrot.slane %v975_v40, %v4535_v59  ;;  %v984_v42 = vrot.slane %v975_v40, %v4545_v13  ;;  %v988_v44 = vrot.slane %v975_v40, %v4574_v47  ;;  %v992_v1 = vrot.slane %v975_v40, %v4578_v50 }
0x103a   :  { %v997_v49 = vsub.f32 %v933_v21, %v980_v55  ;;  %v998_v45 = vsub.f32 %v934_v22, %v984_v42  ;;  %v999_v2 = vsub.f32 %v935_v39, %v988_v44  ;;  %v1000_v4 = vsub.f32 %v936_v24, %v992_v1  ;;  %v5533_v1 = vld [vmem:[#allocation16_spill] sm:$0xff] }
0x103b   :  { %v3344_v44 = vrot.slane %v4629_v14, %v4595_v18 }
0x103c   :  { %v1001_v0 = vmul.f32 1.442695, %v997_v49  ;;  %v1003_v3 = vmul.f32 1.442695, %v998_v45  ;;  %v1005_v5 = vmul.f32 1.442695, %v999_v2  ;;  %v3340_v49 = vrot.slane %v4627_v11, %v4595_v18 }
0x103d   :  { %v1007_v6 = vmul.f32 1.442695, %v1000_v4  ;;  %v5532_v45 = vld [vmem:[#allocation14_spill] sm:$0xff]  ;;  %v3348_v2 = vrot.slane %v5533_v1, %v4595_v18  ;;  %v5534_v11 = vld [vmem:[#allocation15_spill] sm:$0xff] }
0x103e   :  { %3979 = vpow2.f32 %v1001_v0 }
0x103f   :  { %3981 = vpow2.f32 %v1003_v3 }
0x1040   :  { %3983 = vpow2.f32 %v1005_v5 }
0x1041   :  { %3985 = vpow2.f32 %v1007_v6 }
0x104b   :  { %v3980_v35 = vpop.eup %3979 }
0x104c   :  { %1014 = vperm.xlu0 %3930, %v3980_v35   ;;  %v3982_v7 = vpop.eup %3981 }
0x104d   :  { %v3984_v29 = vpop.eup %3983 }
0x104e   :  { %v3986_v38 = vpop.eup %3985 }
0x1050   :  { %1017 = vperm.xlu0 %3930, %v3982_v7  }
0x1054   :  { %1020 = vperm.xlu0 %3930, %v3984_v29  }
0x1058   :  { %1023 = vperm.xlu0 %3930, %v3986_v38  }
0x10c7   :  { %v1015_v8 = vpop.permute.xlu0 %1014 }
0x10c8   :  { %v1028_v19 = vrot.slane %v1015_v8, %v4595_v18 }
0x10cb   :  { %v1018_v51 = vpop.permute.xlu0 %1017 }
0x10cc   :  { %v1032_v63 = vrot.slane %v1018_v51, %v4595_v18 }
0x10ce   :  { %v1041_v22 = vsel %vm483_vm3, %v1032_v63, %v1028_v19 }
0x10cf   :  { %v1021_v61 = vpop.permute.xlu0 %1020 }
0x10d0   :  { %v1036_v15 = vrot.slane %v1021_v61, %v4595_v18 }
0x10d2   :  { %v1042_v34 = vsel %vm485_vm4, %v1036_v15, %v1041_v22 }
0x10d3   :  { %v1024_v21 = vpop.permute.xlu0 %1023 }
0x10d4   :  { %v1040_v16 = vrot.slane %v1024_v21, %v4595_v18 }
0x10d6   :  { %v1043_v23 = vsel %vm487_vm5, %v1040_v16, %v1042_v34 }
0x10d7   :  { %v1045_v24 = vsel %vm490_vm6, %v1043_v23, 0.0 }
0x10d8   :  { %1046 = vadd.xlane.f32.xlu0 %v1045_v24 }
0x1161   :  { %v1047_v39 = vpop.xlane.xlu0 %1046 }
0x1162   :  { %v1052_v25 = vrot.slane %v1047_v39, %v4535_v59  ;;  %v1056_v26 = vrot.slane %v1047_v39, %v4545_v13  ;;  %v1060_v27 = vrot.slane %v1047_v39, %v4574_v47  ;;  %v1064_v28 = vrot.slane %v1047_v39, %v4578_v50 }
0x1164   :  { %3987 = vrcp.f32 %v1052_v25 }
0x1165   :  { %3989 = vrcp.f32 %v1056_v26 }
0x1166   :  { %3991 = vrcp.f32 %v1060_v27 }
0x1167   :  { %3993 = vrcp.f32 %v1064_v28 }
0x1171   :  { %v3988_v62 = vpop.eup %3987 }
0x1172   :  { %v3990_v30 = vpop.eup %3989  ;;  %v1070_v17 = vmul.f32 %v3988_v62, %v3980_v35 }
0x1173   :  { %v3992_v20 = vpop.eup %3991  ;;  %v1072_v31 = vmul.f32 %v3990_v30, %v3982_v7 }
0x1174   :  { %1079 = vperm.xlu1 %3929, %v1070_v17   ;;  %v1074_v60 = vmul.f32 %v3992_v20, %v3984_v29  ;;  %v3994_v36 = vpop.eup %3993  ;;  %v3353_v29 = vsel %vm483_vm3, %v3344_v44, %v3340_v49 }
0x1175   :  { %1084 = vperm.xlu0 %3930, %v1072_v31   ;;  %v1076_v37 = vmul.f32 %v3994_v36, %v3986_v38  ;;  %v3354_v51 = vsel %vm485_vm4, %v3348_v2, %v3353_v29  ;;  %v4851_v29 = vld [vmem:[%s5501_s4 + $0x10] sm:$0xff] }
0x1178   :  { %1089 = vperm.xlu1 %3929, %v1074_v60  }
0x117c   :  { %1094 = vperm.xlu1 %3929, %v1076_v37  }
0x1180   :  { %1137 = vrot.lane.b32.xlu1 %v4686_v9, %s4269_s21  ;;  %v3352_v9 = vrot.slane %v4646_v46, %v4595_v18 }
0x1182   :  { %v3355_v63 = vsel %vm487_vm5, %v3352_v9, %v3354_v51  ;;  %v1142_v51 = vld [vmem:[#allocation6 + $0x8] sm:$0xf] }
0x11ef   :  { %v1080_v40 = vpop.permute.xlu1 %1079 }
0x11f0   :  { %v1085_v55 = vpop.permute.xlu0 %1084  ;;  %v1097_v42 = vmul.f32 %v1080_v40, %v4623_v32  ;;  %v3360_v35 = vrot.slane %v1080_v40, %v4595_v18 }
0x11f1   :  { %v1098_v0 = vmul.f32 %v1085_v55, %v5532_v45  ;;  %v3364_v14 = vrot.slane %v1085_v55, %v4595_v18 }
0x11f2   :  { %v1101_v3 = vsel %vm244_vm1, %v1097_v42, 0.0 }
0x11f3   :  { %v1108_v4 = vsel %vm244_vm1, %v1098_v0, 0.0  ;;  %v1102_v5 = vrot.slane %v1101_v3, 4  ;;  %v1090_v32 = vpop.permute.xlu1 %1089  ;;  %v3373_v22 = vsel %vm3067_vm7, %v3364_v14, %v3360_v35  ;;  %v4823_v14 = vld [vmem:[%s5501_s4 + $0x30] sm:$0xff]  ;;  %v4830_v35 = vld [vmem:[%s5501_s4 + $0x28] sm:$0xff] }
0x11f4   :  { %v1109_v6 = vrot.slane %v1108_v4, 4  ;;  %v1099_v7 = vmul.f32 %v1090_v32, %v5534_v11  ;;  %v3368_v8 = vrot.slane %v1090_v32, %v4595_v18  ;;  %v4837_v11 = vld [vmem:[%s5501_s4 + $0x20] sm:$0xff] }
0x11f5   :  { %v1103_v38 = vadd.f32 %v1102_v5, %v1101_v3 }
0x11f6   :  { %v1110_v46 = vadd.f32 %v1109_v6, %v1108_v4  ;;  %v1115_v61 = vsel %vm244_vm1, %v1099_v7, 0.0  ;;  %v3374_v25 = vsel %vm3069_vm8, %v3368_v8, %v3373_v22  ;;  %v4814_v6 = vld [vmem:[%s5501_s4 + $0x38] sm:$0xff]  ;;  %v4865_v8 = vld [vmem:[%s5501_s4] sm:$0xff] }
0x11f7   :  { %v1104_v15 = vrot.slane %v1103_v38, 2  ;;  %v1116_v19 = vrot.slane %v1115_v61, 4  ;;  %v1095_v21 = vpop.permute.xlu1 %1094  ;;  %v4844_v7 = vld [vmem:[%s5501_s4 + $0x18] sm:$0xff] }
0x11f8   :  { %v1111_v16 = vrot.slane %v1110_v46, 2  ;;  %v1100_v34 = vmul.f32 %v1095_v21, %v4643_v41  ;;  %v3372_v23 = vrot.slane %v1095_v21, %v4595_v18 }
0x11f9   :  { %v1105_v24 = vadd.f32 %v1104_v15, %v1103_v38  ;;  %v1117_v39 = vadd.f32 %v1116_v19, %v1115_v61  ;;  %v4858_v38 = vld [vmem:[%s5501_s4 + $0x8] sm:$0xff] }
0x11fa   :  { %v1112_v26 = vadd.f32 %v1111_v16, %v1110_v46  ;;  %v1122_v27 = vsel %vm244_vm1, %v1100_v34, 0.0  ;;  %v3375_v28 = vsel %vm3071_vm9, %v3372_v23, %v3374_v25 }
0x11fb   :  { %v1106_v62 = vrot.slane %v1105_v24, 1  ;;  %v1118_v30 = vrot.slane %v1117_v39, 2  ;;  %v1123_v17 = vrot.slane %v1122_v27, 4  ;;  %v3457_v20 = vsel %vm3063_vm11, %v3355_v63, %v3375_v28  ;;  %v1138_v4 = vpop.permute.xlu1 %1137 }
0x11fc   :  { %v1113_v31 = vrot.slane %v1112_v26, 1  ;;  %3461 = vst.msk [vmem:[%s5509_s12] sm:$0xff] %vm3460_vm10, %v3457_v20  ;;  %v4890_v20 = vld [vmem:[#allocation7 + $0x30] sm:$0xff] }
0x11fd   :  { %v1107_v41 = vadd.f32 %v1106_v62, %v1105_v24  ;;  %v1119_v60 = vadd.f32 %v1118_v30, %v1117_v39  ;;  %v1124_v36 = vadd.f32 %v1123_v17, %v1122_v27  ;;  %v4884_v17 = vld [vmem:[#allocation7 + $0x38] sm:$0xff] }
0x11fe   :  { %v1114_v37 = vadd.f32 %v1113_v31, %v1112_v26  ;;  %v4894_v31 = vld [vmem:[#allocation7 + $0x28] sm:$0xff] }
0x11ff   :  { %v1120_v40 = vrot.slane %v1119_v60, 1  ;;  %v1125_v55 = vrot.slane %v1124_v36, 2 }
0x1200   :  { %v3068_v42 = vsel %vm3067_vm7, %v1114_v37, %v1107_v41  ;;  %v1133_v2 = vsel %vm483_vm3, %v1114_v37, %v1107_v41  ;;  %v4898_v41 = vld [vmem:[#allocation7 + $0x20] sm:$0xff]  ;;  %v4910_v37 = vld [vmem:[#allocation7 + $0x8] sm:$0xff] }
0x1201   :  { %v1121_v44 = vadd.f32 %v1120_v40, %v1119_v60  ;;  %v1126_v49 = vadd.f32 %v1125_v55, %v1124_v36  ;;  %v4902_v60 = vld [vmem:[#allocation7 + $0x18] sm:$0xff]  ;;  %v4906_v36 = vld [vmem:[#allocation7 + $0x10] sm:$0xff]  ;;  %v4914_v40 = vld [vmem:[#allocation7] sm:$0xff] }
0x1203   :  { %v1127_v45 = vrot.slane %v1126_v49, 1  ;;  %v3070_v0 = vsel %vm3069_vm8, %v1121_v44, %v3068_v42  ;;  %v1134_v3 = vsel %vm485_vm4, %v1121_v44, %v1133_v2  ;;  %v4921_v42 = vld [vmem:[%s5503_s6] ss:$0 sm:$0xff] }
0x1205   :  { %v1128_v1 = vadd.f32 %v1127_v45, %v1126_v49 }
0x1207   :  { %v1135_v9 = vsel %vm487_vm5, %v1128_v1, %v1134_v3  ;;  %v4807_v5 = vsel %vm3071_vm9, %v1128_v1, %v3070_v0 }
0x1208   :  { %5535 = vst [vmem:[#allocation14_spill] sm:$0xff] %v4807_v5  ;;  %v1140_v32 = vsel %vm244_vm1, %v1135_v9, %v1138_v4 }
0x1209   :  { %3730 = vmatmul.mubr.msk.f32.vlgmr.msra.gmra.mxu0 %vm141_vm2, %v1140_v32 }
0x120a   :  { %3752 = vmatpush3.msra.mxu0 %v4814_v6  ;;  %3767 = vmatprep.mubr.msk.f32.mxu0 %vm4273_vm0, %v5530_v48 }
0x120b   :  { %3753 = vmatprep.subr.mxu0 %v5530_v48 }
0x120c   :  { %3754 = vmatpush3.msra.mxu0 %v4823_v14 }
0x120d   :  { %3755 = vmatprep.subr.mxu0 %v5530_v48 }
0x120e   :  { %3756 = vmatpush3.msra.mxu0 %v4830_v35 }
0x120f   :  { %3757 = vmatprep.subr.mxu0 %v5530_v48 }
0x1210   :  { %3758 = vmatpush3.msra.mxu0 %v4837_v11 }
0x1211   :  { %3759 = vmatprep.subr.mxu0 %v5530_v48 }
0x1212   :  { %3760 = vmatpush3.msra.mxu0 %v4844_v7 }
0x1213   :  { %3761 = vmatprep.subr.mxu0 %v5530_v48 }
0x1214   :  { %3762 = vmatpush3.msra.mxu0 %v4851_v29 }
0x1215   :  { %3763 = vmatprep.subr.mxu0 %v5530_v48 }
0x1216   :  { %3764 = vmatpush3.msra.mxu0 %v4858_v38 }
0x1217   :  { %3765 = vmatprep.subr.mxu0 %v5530_v48 }
0x1218   :  { %3766 = vmatpush3.msra.mxu0 %v4865_v8 }
0x1219   :  { %3789 = vmatprep.subr.mxu0 %v5530_v48 }
0x12c9   :  { %v1212_v46 = vpop.f32.mrf.mxu0 }
0x12ca   :  { %v1216_v61 = vadd.f32 %v1212_v46, %v1142_v51 }
0x12cb   :  { %v3731_v63 = vpop.f32.mrf.mxu0 }
0x12cc   :  { %3995 = vtanh.f32 %v1216_v61  ;;  %v3484_v19 = vmul.f32 -1.442695, %v1216_v61 }
0x12ce   :  { %3997 = vpow2.f32 %v3484_v19 }
0x12d9   :  { %v3996_v15 = vpop.eup %3995 }
0x12da   :  { %1226 = vrot.lane.b32.xlu1 %v3996_v15, %s4269_s21 }
0x12db   :  { %v3998_v21 = vpop.eup %3997 }
0x12dc   :  { %v1220_v16 = vadd.f32 1.0, %v3998_v21 }
0x12de   :  { %3999 = vrcp.f32 %v1220_v16 }
0x12eb   :  { %v4000_v22 = vpop.eup %3999 }
0x12ec   :  { %v1224_v24 = vmul.f32 %v4000_v22, %v4680_v57 }
0x134c   :  { %v1227_v34 = vpop.permute.xlu1 %1226 }
0x134d   :  { %v1229_v23 = vmul.f32 %v4000_v22, %v1227_v34 }
0x134f   :  { %1231 = vrot.lane.b32.xlu1 %v1229_v23, %s4274_s24 }
0x13c1   :  { %v1232_v39 = vpop.permute.xlu1 %1231 }
0x13c2   :  { %v4872_v25 = vadd.f32 %v1232_v39, %v1224_v24 }
0x13c4   :  { %4001 = vtanh.f32 %v4872_v25 }
0x13d1   :  { %v4002_v26 = vpop.eup %4001 }
0x13d2   :  { %1237 = vrot.lane.b32.xlu0 %v4002_v26, %s4269_s21 }
0x13d6   :  { %1245 = vrot.lane.b32.xlu0 %v4718_v53, %s4269_s21 }
0x1444   :  { %v1238_v27 = vpop.permute.xlu0 %1237 }
0x1445   :  { %v4878_v28 = vmul.f32 %v4000_v22, %v1238_v27 }
0x1447   :  { %1242 = vrot.lane.b32.xlu1 %v4878_v28, %s4274_s24 }
0x1448   :  { %v1246_v62 = vpop.permute.xlu0 %1245 }
0x14b9   :  { %v1243_v30 = vpop.permute.xlu1 %1242 }
0x14ba   :  { %v1248_v57 = vsel %vm244_vm1, %v1243_v30, %v1246_v62  ;;  %v4945_v62 = vld [vmem:[#allocation2] sm:$0xff] }
0x14bb   :  { %3749 = vmatmul.mubr.msk.f32.vlgmr.msra.gmra.mxu1 %vm141_vm2, %v1248_v57 }
0x14bc   :  { %3771 = vmatpush3.msra.mxu1 %v4884_v17  ;;  %3786 = vmatprep.mubr.msk.f32.mxu1 %vm4273_vm0, %v5530_v48 }
0x14bd   :  { %3772 = vmatprep.subr.mxu1 %v5530_v48 }
0x14be   :  { %3773 = vmatpush3.msra.mxu1 %v4890_v20 }
0x14bf   :  { %3774 = vmatprep.subr.mxu1 %v5530_v48 }
0x14c0   :  { %3775 = vmatpush3.msra.mxu1 %v4894_v31 }
0x14c1   :  { %3776 = vmatprep.subr.mxu1 %v5530_v48 }
0x14c2   :  { %3777 = vmatpush3.msra.mxu1 %v4898_v41 }
0x14c3   :  { %3778 = vmatprep.subr.mxu1 %v5530_v48 }
0x14c4   :  { %3779 = vmatpush3.msra.mxu1 %v4902_v60 }
0x14c5   :  { %3780 = vmatprep.subr.mxu1 %v5530_v48 }
0x14c6   :  { %3781 = vmatpush3.msra.mxu1 %v4906_v36 }
0x14c7   :  { %3782 = vmatprep.subr.mxu1 %v5530_v48 }
0x14c8   :  { %3783 = vmatpush3.msra.mxu1 %v4910_v37 }
0x14c9   :  { %3784 = vmatprep.subr.mxu1 %v5530_v48 }
0x14ca   :  { %3785 = vmatpush3.msra.mxu1 %v4914_v40 }
0x14cb   :  { %3808 = vmatprep.subr.mxu1 %v5530_v48 }
0x157b   :  { %v1318_v55 = vpop.f32.mrf.mxu1 }
0x157c   :  { %v1319_v44 = vadd.f32 %v4921_v42, %v1318_v55  ;;  %v4948_v55 = vld [vmem:[#allocation2 + $0x8] sm:$0xff] }
0x157d   :  { %v3750_v49 = vpop.f32.mrf.mxu1 }
0x157e   :  { %4003 = vtanh.f32 %v1319_v44  ;;  %v3486_v0 = vmul.f32 -1.442695, %v1319_v44 }
0x1580   :  { %4005 = vpow2.f32 %v3486_v0  ;;  %v4952_v0 = vld [vmem:[#allocation2 + $0x10] sm:$0xff] }
0x158b   :  { %v4004_v45 = vpop.eup %4003 }
0x158c   :  { %1331 = vrot.lane.b32.xlu1 %v4004_v45, %s4269_s21 }
0x158d   :  { %v4006_v1 = vpop.eup %4005 }
0x158e   :  { %v1325_v2 = vadd.f32 1.0, %v4006_v1 }
0x1590   :  { %4007 = vrcp.f32 %v1325_v2 }
0x159d   :  { %v4008_v3 = vpop.eup %4007 }
0x159e   :  { %v1329_v32 = vmul.f32 %v4008_v3, %v4714_v33 }
0x15fe   :  { %v1332_v9 = vpop.permute.xlu1 %1331 }
0x15ff   :  { %v1334_v4 = vmul.f32 %v4008_v3, %v1332_v9  ;;  %v4956_v9 = vld [vmem:[#allocation2 + $0x18] sm:$0xff] }
0x1601   :  { %1336 = vrot.lane.b32.xlu0 %v1334_v4, %s4274_s24 }
0x1673   :  { %v1337_v51 = vpop.permute.xlu0 %1336 }
0x1674   :  { %v4927_v46 = vadd.f32 %v1337_v51, %v1329_v32 }
0x1676   :  { %4009 = vtanh.f32 %v4927_v46 }
0x1683   :  { %v4010_v61 = vpop.eup %4009 }
0x1684   :  { %1342 = vrot.lane.b32.xlu1 %v4010_v61, %s4269_s21 }
0x16f6   :  { %v1343_v63 = vpop.permute.xlu1 %1342 }
0x16f7   :  { %v4931_v15 = vmul.f32 %v4008_v3, %v1343_v63 }
0x16f9   :  { %5536 = vst [vmem:[#allocation16_spill] sm:$0xff] %v4931_v15  ;;  %v1353_v19 = vrot.slane %v4931_v15, %v4530_v56 }
0x16fb   :  { %v1361_v21 = vrot.slane %v1353_v19, %v4530_v56  ;;  %v1354_v16 = vcombine.high %v1353_v19, %v1353_v19 }
0x16fd   :  { %v1374_v22 = vrot.slane %v1361_v21, %v4535_v59  ;;  %v1368_v33 = vrot.slane %v1354_v16, %v4530_v56  ;;  %v1369_v34 = vcombine.high %v1361_v21, %v1361_v21 }
0x16ff   :  { %1387 = vrot.lane.b32.xlu0 %v1374_v22, %s4274_s24  ;;  %v1378_v23 = vrot.slane %v1368_v33, %v4535_v59  ;;  %v1370_v24 = vcombine.high %v1368_v33, %v1368_v33  ;;  %v1382_v39 = vrot.slane %v1369_v34, %v4535_v59 }
0x1701   :  { %1389 = vrot.lane.b32.xlu1 %v1378_v23, %s4274_s24  ;;  %v1386_v26 = vrot.slane %v1370_v24, %v4535_v59 }
0x1703   :  { %1391 = vrot.lane.b32.xlu0 %v1382_v39, %s4274_s24 }
0x1705   :  { %1393 = vrot.lane.b32.xlu1 %v1386_v26, %s4274_s24 }
0x1771   :  { %v1388_v27 = vpop.permute.xlu0 %1387 }
0x1772   :  { %v1399_v30 = vmul.f32 %v4945_v62, %v1388_v27 }
0x1773   :  { %v1390_v57 = vpop.permute.xlu1 %1389 }
0x1774   :  { %v1400_v44 = vmul.f32 %v4948_v55, %v1390_v57  ;;  %v1403_v49 = vsel %vm244_vm1, %v1399_v30, 0.0 }
0x1775   :  { %1404 = vadd.xlane.f32.xlu0 %v1403_v49  ;;  %v1392_v45 = vpop.permute.xlu0 %1391 }
0x1776   :  { %v1401_v1 = vmul.f32 %v4952_v0, %v1392_v45  ;;  %v1406_v2 = vsel %vm244_vm1, %v1400_v44, 0.0 }
0x1777   :  { %1407 = vadd.xlane.f32.xlu1 %v1406_v2  ;;  %v1394_v3 = vpop.permute.xlu1 %1393 }
0x1778   :  { %v1402_v4 = vmul.f32 %v4956_v9, %v1394_v3  ;;  %v1409_v32 = vsel %vm244_vm1, %v1401_v1, 0.0 }
0x1779   :  { %1410 = vadd.xlane.f32.xlu0 %v1409_v32 }
0x177a   :  { %v1412_v51 = vsel %vm244_vm1, %v1402_v4, 0.0 }
0x177d   :  { %1413 = vadd.xlane.f32.xlu0 %v1412_v51 }
0x17fe   :  { %v1405_v61 = vpop.xlane.xlu0 %1404 }
0x17ff   :  { %v1415_v63 = vadd.f32 %v1405_v61, %v4583_v54 }
0x1800   :  { %v1408_v19 = vpop.xlane.xlu1 %1407 }
0x1801   :  { %v1416_v21 = vadd.f32 %v1408_v19, %v4581_v52  ;;  %1424 = vperm.xlu1 %3929, %v1415_v63  }
0x1802   :  { %v1411_v16 = vpop.xlane.xlu0 %1410 }
0x1803   :  { %v1417_v22 = vadd.f32 %v1411_v16, %v4587_v10  ;;  %1427 = vperm.xlu0 %3930, %v1416_v21  }
0x1805   :  { %1430 = vperm.xlu1 %3929, %v1417_v22  }
0x1806   :  { %v1414_v33 = vpop.xlane.xlu0 %1413 }
0x1807   :  { %v1418_v34 = vadd.f32 %v1414_v33, %v4590_v12 }
0x1809   :  { %1433 = vperm.xlu1 %3929, %v1418_v34  }
0x187c   :  { %v1425_v23 = vpop.permute.xlu1 %1424 }
0x187d   :  { %v1438_v27 = vrot.slane %v1425_v23, %v4595_v18 }
0x187e   :  { %v1428_v24 = vpop.permute.xlu0 %1427 }
0x187f   :  { %v1442_v39 = vrot.slane %v1428_v24, %v4595_v18 }
0x1880   :  { %v1431_v26 = vpop.permute.xlu1 %1430 }
0x1881   :  { %v1446_v30 = vrot.slane %v1431_v26, %v4595_v18  ;;  %v1451_v57 = vsel %vm483_vm3, %v1442_v39, %v1438_v27 }
0x1883   :  { %v1452_v45 = vsel %vm485_vm4, %v1446_v30, %v1451_v57 }
0x1884   :  { %v1434_v44 = vpop.permute.xlu1 %1433 }
0x1885   :  { %v1450_v49 = vrot.slane %v1434_v44, %v4595_v18 }
0x1887   :  { %v1453_v1 = vsel %vm487_vm5, %v1450_v49, %v1452_v45 }
0x1888   :  { %v1455_v2 = vsel %vm490_vm6, %v1453_v1, -inf }
0x1889   :  { %1456 = vmax.xlane.f32.xlu0 %v1455_v2 }
0x1912   :  { %v1457_v3 = vpop.xlane.xlu0 %1456 }
0x1913   :  { %v1462_v4 = vrot.slane %v1457_v3, %v4535_v59  ;;  %v1466_v32 = vrot.slane %v1457_v3, %v4545_v13  ;;  %v1470_v51 = vrot.slane %v1457_v3, %v4574_v47  ;;  %v1474_v33 = vrot.slane %v1457_v3, %v4578_v50 }
0x1915   :  { %v1479_v61 = vsub.f32 %v1415_v63, %v1462_v4  ;;  %v1480_v19 = vsub.f32 %v1416_v21, %v1466_v32  ;;  %v1481_v23 = vsub.f32 %v1417_v22, %v1470_v51  ;;  %v1482_v39 = vsub.f32 %v1418_v34, %v1474_v33 }
0x1917   :  { %v1483_v16 = vmul.f32 1.442695, %v1479_v61  ;;  %v1485_v24 = vmul.f32 1.442695, %v1480_v19  ;;  %v1487_v26 = vmul.f32 1.442695, %v1481_v23 }
0x1918   :  { %v1489_v27 = vmul.f32 1.442695, %v1482_v39 }
0x1919   :  { %4011 = vpow2.f32 %v1483_v16 }
0x191a   :  { %4013 = vpow2.f32 %v1485_v24 }
0x191b   :  { %4015 = vpow2.f32 %v1487_v26 }
0x191c   :  { %4017 = vpow2.f32 %v1489_v27 }
0x1926   :  { %v4012_v30 = vpop.eup %4011 }
0x1927   :  { %1496 = vperm.xlu1 %3929, %v4012_v30   ;;  %v4014_v57 = vpop.eup %4013 }
0x1928   :  { %v4016_v44 = vpop.eup %4015 }
0x1929   :  { %v4018_v63 = vpop.eup %4017 }
0x192b   :  { %1499 = vperm.xlu1 %3929, %v4014_v57  }
0x192f   :  { %1502 = vperm.xlu1 %3929, %v4016_v44  }
0x1933   :  { %1505 = vperm.xlu1 %3929, %v4018_v63  }
0x19a2   :  { %v1497_v21 = vpop.permute.xlu1 %1496 }
0x19a3   :  { %v1510_v1 = vrot.slane %v1497_v21, %v4595_v18 }
0x19a6   :  { %v1500_v49 = vpop.permute.xlu1 %1499 }
0x19a7   :  { %v1514_v22 = vrot.slane %v1500_v49, %v4595_v18 }
0x19a9   :  { %v1523_v4 = vsel %vm483_vm3, %v1514_v22, %v1510_v1 }
0x19aa   :  { %v1503_v45 = vpop.permute.xlu1 %1502 }
0x19ab   :  { %v1518_v34 = vrot.slane %v1503_v45, %v4595_v18 }
0x19ad   :  { %v1524_v32 = vsel %vm485_vm4, %v1518_v34, %v1523_v4 }
0x19ae   :  { %v1506_v2 = vpop.permute.xlu1 %1505 }
0x19af   :  { %v1522_v3 = vrot.slane %v1506_v2, %v4595_v18 }
0x19b1   :  { %v1525_v51 = vsel %vm487_vm5, %v1522_v3, %v1524_v32  ;;  %v4995_v3 = vld [vmem:[#allocation4] sm:$0xff] }
0x19b2   :  { %v1527_v61 = vsel %vm490_vm6, %v1525_v51, 0.0 }
0x19b3   :  { %1528 = vadd.xlane.f32.xlu1 %v1527_v61  ;;  %v5007_v61 = vld [vmem:[#allocation4 + $0x10] sm:$0xff] }
0x19b4   :  { %5540 = vst [vmem:[#allocation21_spill] sm:$0xff] %v5007_v61 }
0x1a3c   :  { %v1529_v19 = vpop.xlane.xlu1 %1528 }
0x1a3d   :  { %v1534_v16 = vrot.slane %v1529_v19, %v4535_v59  ;;  %v1538_v33 = vrot.slane %v1529_v19, %v4545_v13  ;;  %v1542_v23 = vrot.slane %v1529_v19, %v4574_v47  ;;  %v1546_v24 = vrot.slane %v1529_v19, %v4578_v50 }
0x1a3f   :  { %4019 = vrcp.f32 %v1534_v16 }
0x1a40   :  { %4021 = vrcp.f32 %v1538_v33 }
0x1a41   :  { %4023 = vrcp.f32 %v1542_v23 }
0x1a42   :  { %4025 = vrcp.f32 %v1546_v24 }
0x1a4c   :  { %v4020_v39 = vpop.eup %4019 }
0x1a4d   :  { %v4022_v26 = vpop.eup %4021  ;;  %v1552_v27 = vmul.f32 %v4020_v39, %v4012_v30 }
0x1a4e   :  { %v4024_v21 = vpop.eup %4023  ;;  %v1554_v49 = vmul.f32 %v4022_v26, %v4014_v57  ;;  %v4999_v57 = vld [vmem:[#allocation4 + $0x8] sm:$0xff] }
0x1a4f   :  { %1561 = vperm.xlu0 %3930, %v1552_v27   ;;  %v1556_v45 = vmul.f32 %v4024_v21, %v4016_v44  ;;  %v4026_v22 = vpop.eup %4025  ;;  %v5014_v21 = vld [vmem:[#allocation4 + $0x18] sm:$0xff] }
0x1a50   :  { %1566 = vperm.xlu1 %3929, %v1554_v49   ;;  %v1558_v34 = vmul.f32 %v4026_v22, %v4018_v63 }
0x1a53   :  { %1571 = vperm.xlu0 %3930, %v1556_v45  }
0x1a57   :  { %1576 = vperm.xlu0 %3930, %v1558_v34  }
0x1a5b   :  { %1619 = vrot.lane.b32.xlu0 %v4878_v28, %s4269_s21 }
0x1aca   :  { %v4991_v1 = vpop.permute.xlu0 %1561 }
0x1acb   :  { %5537 = vst [vmem:[#allocation15_spill] sm:$0xff] %v4991_v1  ;;  %v4993_v2 = vpop.permute.xlu1 %1566  ;;  %v1579_v30 = vmul.f32 %v4995_v3, %v4991_v1 }
0x1acc   :  { %5538 = vst [vmem:[#allocation19_spill] sm:$0xff] %v4993_v2  ;;  %v1580_v44 = vmul.f32 %v4999_v57, %v4993_v2 }
0x1acd   :  { %v1583_v63 = vsel %vm244_vm1, %v1579_v30, 0.0 }
0x1ace   :  { %v1590_v4 = vsel %vm244_vm1, %v1580_v44, 0.0  ;;  %v1584_v32 = vrot.slane %v1583_v63, 4  ;;  %v5005_v28 = vpop.permute.xlu0 %1571 }
0x1acf   :  { %5539 = vst [vmem:[#allocation20_spill] sm:$0xff] %v5005_v28  ;;  %v1591_v51 = vrot.slane %v1590_v4, 4  ;;  %v1581_v19 = vmul.f32 %v5007_v61, %v5005_v28 }
0x1ad0   :  { %v1585_v16 = vadd.f32 %v1584_v32, %v1583_v63 }
0x1ad1   :  { %v1592_v33 = vadd.f32 %v1591_v51, %v1590_v4  ;;  %v1597_v23 = vsel %vm244_vm1, %v1581_v19, 0.0 }
0x1ad2   :  { %v1586_v24 = vrot.slane %v1585_v16, 2  ;;  %v1598_v39 = vrot.slane %v1597_v23, 4  ;;  %v5012_v26 = vpop.permute.xlu0 %1576 }
0x1ad3   :  { %v1593_v27 = vrot.slane %v1592_v33, 2  ;;  %v1582_v49 = vmul.f32 %v5014_v21, %v5012_v26 }
0x1ad4   :  { %v1587_v45 = vadd.f32 %v1586_v24, %v1585_v16  ;;  %v1599_v22 = vadd.f32 %v1598_v39, %v1597_v23 }
0x1ad5   :  { %v1594_v34 = vadd.f32 %v1593_v27, %v1592_v33  ;;  %v1604_v30 = vsel %vm244_vm1, %v1582_v49, 0.0 }
0x1ad6   :  { %v1600_v44 = vrot.slane %v1599_v22, 2  ;;  %v1605_v63 = vrot.slane %v1604_v30, 4  ;;  %v1588_v32 = vrot.slane %v1587_v45, 1  ;;  %v1620_v24 = vpop.permute.xlu0 %1619 }
0x1ad7   :  { %v1595_v4 = vrot.slane %v1594_v34, 1 }
0x1ad8   :  { %v1601_v51 = vadd.f32 %v1600_v44, %v1599_v22  ;;  %v1606_v19 = vadd.f32 %v1605_v63, %v1604_v30  ;;  %v1589_v53 = vadd.f32 %v1588_v32, %v1587_v45 }
0x1ad9   :  { %v1596_v58 = vadd.f32 %v1595_v4, %v1594_v34 }
0x1ada   :  { %v1602_v43 = vrot.slane %v1601_v51, 1  ;;  %v1607_v5 = vrot.slane %v1606_v19, 2 }
0x1adb   :  { %v1615_v16 = vsel %vm483_vm3, %v1596_v58, %v1589_v53  ;;  %v1624_v58 = vld [vmem:[#allocation6 + $0xc] sm:$0xf] }
0x1adc   :  { %v1608_v28 = vadd.f32 %v1607_v5, %v1606_v19  ;;  %v1603_v61 = vadd.f32 %v1602_v43, %v1601_v51 }
0x1ade   :  { %v1609_v1 = vrot.slane %v1608_v28, 1  ;;  %v1616_v33 = vsel %vm485_vm4, %v1603_v61, %v1615_v16 }
0x1ae0   :  { %v1610_v2 = vadd.f32 %v1609_v1, %v1608_v28 }
0x1ae2   :  { %v5022_v23 = vsel %vm487_vm5, %v1610_v2, %v1616_v33 }
0x1ae3   :  { %5541 = vst [vmem:[#allocation22_spill] sm:$0xff] %v5022_v23  ;;  %v1622_v39 = vsel %vm244_vm1, %v5022_v23, %v1620_v24 }
0x1ae4   :  { %3768 = vmatmul.mubr.msk.f32.vlgmr.msra.gmra.mxu0 %vm141_vm2, %v1622_v39 }
0x1ae5   :  { %3790 = vmatpush3.msra.mxu0 %v4814_v6  ;;  %3805 = vmatprep.mubr.msk.f32.mxu0 %vm4273_vm0, %v5530_v48 }
0x1ae6   :  { %3791 = vmatprep.subr.mxu0 %v5530_v48 }
0x1ae7   :  { %3792 = vmatpush3.msra.mxu0 %v4823_v14 }
0x1ae8   :  { %3793 = vmatprep.subr.mxu0 %v5530_v48 }
0x1ae9   :  { %3794 = vmatpush3.msra.mxu0 %v4830_v35 }
0x1aea   :  { %3795 = vmatprep.subr.mxu0 %v5530_v48 }
0x1aeb   :  { %3796 = vmatpush3.msra.mxu0 %v4837_v11 }
0x1aec   :  { %3797 = vmatprep.subr.mxu0 %v5530_v48 }
0x1aed   :  { %3798 = vmatpush3.msra.mxu0 %v4844_v7 }
0x1aee   :  { %3799 = vmatprep.subr.mxu0 %v5530_v48 }
0x1aef   :  { %3800 = vmatpush3.msra.mxu0 %v4851_v29 }
0x1af0   :  { %3801 = vmatprep.subr.mxu0 %v5530_v48 }
0x1af1   :  { %3802 = vmatpush3.msra.mxu0 %v4858_v38 }
0x1af2   :  { %3803 = vmatprep.subr.mxu0 %v5530_v48 }
0x1af3   :  { %3804 = vmatpush3.msra.mxu0 %v4865_v8 }
0x1af4   :  { %3827 = vmatprep.subr.mxu0 %v5530_v48 }
0x1ba4   :  { %v1694_v43 = vpop.f32.mrf.mxu0 }
0x1ba5   :  { %v1698_v53 = vadd.f32 %v1694_v43, %v1624_v58 }
0x1ba6   :  { %v3769_v5 = vpop.f32.mrf.mxu0 }
0x1ba7   :  { %4027 = vtanh.f32 %v1698_v53  ;;  %v3488_v2 = vmul.f32 -1.442695, %v1698_v53 }
0x1ba9   :  { %4029 = vpow2.f32 %v3488_v2 }
0x1bb4   :  { %v4028_v1 = vpop.eup %4027 }
0x1bb5   :  { %1708 = vrot.lane.b32.xlu0 %v4028_v1, %s4269_s21 }
0x1bb6   :  { %v4030_v28 = vpop.eup %4029 }
0x1bb7   :  { %v1702_v61 = vadd.f32 1.0, %v4030_v28 }
0x1bb9   :  { %4031 = vrcp.f32 %v1702_v61 }
0x1bc6   :  { %v4032_v27 = vpop.eup %4031 }
0x1bc7   :  { %v1706_v22 = vmul.f32 %v4032_v27, %v4872_v25 }
0x1c27   :  { %v1709_v49 = vpop.permute.xlu0 %1708 }
0x1c28   :  { %v1711_v45 = vmul.f32 %v4032_v27, %v1709_v49 }
0x1c2a   :  { %1713 = vrot.lane.b32.xlu0 %v1711_v45, %s4274_s24 }
0x1c9c   :  { %v1714_v34 = vpop.permute.xlu0 %1713 }
0x1c9d   :  { %v5048_v30 = vadd.f32 %v1714_v34, %v1706_v22 }
0x1c9f   :  { %4033 = vtanh.f32 %v5048_v30 }
0x1cac   :  { %v4034_v44 = vpop.eup %4033 }
0x1cad   :  { %1719 = vrot.lane.b32.xlu1 %v4034_v44, %s4269_s21 }
0x1cb1   :  { %1727 = vrot.lane.b32.xlu1 %v4931_v15, %s4269_s21 }
0x1d1f   :  { %v1720_v63 = vpop.permute.xlu1 %1719 }
0x1d20   :  { %v5054_v4 = vmul.f32 %v4032_v27, %v1720_v63 }
0x1d22   :  { %1724 = vrot.lane.b32.xlu0 %v5054_v4, %s4274_s24 }
0x1d23   :  { %v1728_v32 = vpop.permute.xlu1 %1727 }
0x1d94   :  { %v1725_v51 = vpop.permute.xlu0 %1724 }
0x1d95   :  { %v1730_v25 = vsel %vm244_vm1, %v1725_v51, %v1728_v32 }
0x1d96   :  { %3787 = vmatmul.mubr.msk.f32.vlgmr.msra.gmra.mxu1 %vm141_vm2, %v1730_v25 }
0x1d97   :  { %3809 = vmatpush3.msra.mxu1 %v4884_v17  ;;  %3824 = vmatprep.mubr.msk.f32.mxu1 %vm4273_vm0, %v5530_v48 }
0x1d98   :  { %3810 = vmatprep.subr.mxu1 %v5530_v48 }
0x1d99   :  { %3811 = vmatpush3.msra.mxu1 %v4890_v20 }
0x1d9a   :  { %3812 = vmatprep.subr.mxu1 %v5530_v48 }
0x1d9b   :  { %3813 = vmatpush3.msra.mxu1 %v4894_v31 }
0x1d9c   :  { %3814 = vmatprep.subr.mxu1 %v5530_v48 }
0x1d9d   :  { %3815 = vmatpush3.msra.mxu1 %v4898_v41 }
0x1d9e   :  { %3816 = vmatprep.subr.mxu1 %v5530_v48 }
0x1d9f   :  { %3817 = vmatpush3.msra.mxu1 %v4902_v60 }
0x1da0   :  { %3818 = vmatprep.subr.mxu1 %v5530_v48 }
0x1da1   :  { %3819 = vmatpush3.msra.mxu1 %v4906_v36 }
0x1da2   :  { %3820 = vmatprep.subr.mxu1 %v5530_v48 }
0x1da3   :  { %3821 = vmatpush3.msra.mxu1 %v4910_v37 }
0x1da4   :  { %3822 = vmatprep.subr.mxu1 %v5530_v48 }
0x1da5   :  { %3823 = vmatpush3.msra.mxu1 %v4914_v40 }
0x1da6   :  { %3846 = vmatprep.subr.mxu1 %v5530_v48 }
0x1e56   :  { %v1800_v19 = vpop.f32.mrf.mxu1 }
0x1e57   :  { %v1801_v16 = vadd.f32 %v4921_v42, %v1800_v19 }
0x1e58   :  { %v3788_v33 = vpop.f32.mrf.mxu1 }
0x1e59   :  { %4035 = vtanh.f32 %v1801_v16  ;;  %v3490_v39 = vmul.f32 -1.442695, %v1801_v16 }
0x1e5b   :  { %4037 = vpow2.f32 %v3490_v39 }
0x1e66   :  { %v4036_v24 = vpop.eup %4035 }
0x1e67   :  { %1813 = vrot.lane.b32.xlu0 %v4036_v24, %s4269_s21 }
0x1e68   :  { %v4038_v58 = vpop.eup %4037 }
0x1e69   :  { %v1807_v43 = vadd.f32 1.0, %v4038_v58 }
0x1e6b   :  { %4039 = vrcp.f32 %v1807_v43 }
0x1e78   :  { %v4040_v53 = vpop.eup %4039 }
0x1e79   :  { %v1811_v2 = vmul.f32 %v4040_v53, %v4927_v46 }
0x1ed9   :  { %v1814_v5 = vpop.permute.xlu0 %1813 }
0x1eda   :  { %v1816_v1 = vmul.f32 %v4040_v53, %v1814_v5 }
0x1edc   :  { %1818 = vrot.lane.b32.xlu1 %v1816_v1, %s4274_s24 }
0x1f4e   :  { %v1819_v28 = vpop.permute.xlu1 %1818 }
0x1f4f   :  { %v5082_v61 = vadd.f32 %v1819_v28, %v1811_v2 }
0x1f51   :  { %4041 = vtanh.f32 %v5082_v61 }
0x1f5e   :  { %v4042_v27 = vpop.eup %4041 }
0x1f5f   :  { %1824 = vrot.lane.b32.xlu0 %v4042_v27, %s4269_s21 }
0x1fd1   :  { %v1825_v49 = vpop.permute.xlu0 %1824 }
0x1fd2   :  { %v5086_v45 = vmul.f32 %v4040_v53, %v1825_v49 }
0x1fd4   :  { %v1835_v22 = vrot.slane %v5086_v45, %v4530_v56 }
0x1fd6   :  { %v1836_v34 = vcombine.high %v1835_v22, %v1835_v22  ;;  %v1843_v44 = vrot.slane %v1835_v22, %v4530_v56 }
0x1fd8   :  { %v1850_v63 = vrot.slane %v1836_v34, %v4530_v56  ;;  %v1851_v46 = vcombine.high %v1843_v44, %v1843_v44  ;;  %v1856_v32 = vrot.slane %v1843_v44, %v4535_v59 }
0x1fda   :  { %1869 = vrot.lane.b32.xlu1 %v1856_v32, %s4274_s24  ;;  %v1860_v51 = vrot.slane %v1850_v63, %v4535_v59  ;;  %v1852_v25 = vcombine.high %v1850_v63, %v1850_v63  ;;  %v1864_v19 = vrot.slane %v1851_v46, %v4535_v59 }
0x1fdc   :  { %1871 = vrot.lane.b32.xlu0 %v1860_v51, %s4274_s24  ;;  %v1868_v16 = vrot.slane %v1852_v25, %v4535_v59 }
0x1fde   :  { %1873 = vrot.lane.b32.xlu1 %v1864_v19, %s4274_s24 }
0x1fe0   :  { %1875 = vrot.lane.b32.xlu0 %v1868_v16, %s4274_s24 }
0x204c   :  { %v1870_v33 = vpop.permute.xlu1 %1869 }
0x204d   :  { %v1881_v24 = vmul.f32 %v4945_v62, %v1870_v33 }
0x204e   :  { %v1872_v39 = vpop.permute.xlu0 %1871 }
0x204f   :  { %v1882_v58 = vmul.f32 %v4948_v55, %v1872_v39  ;;  %v1885_v43 = vsel %vm244_vm1, %v1881_v24, 0.0 }
0x2050   :  { %1886 = vadd.xlane.f32.xlu1 %v1885_v43  ;;  %v1874_v53 = vpop.permute.xlu1 %1873 }
0x2051   :  { %v1883_v5 = vmul.f32 %v4952_v0, %v1874_v53  ;;  %v1888_v1 = vsel %vm244_vm1, %v1882_v58, 0.0 }
0x2052   :  { %1889 = vadd.xlane.f32.xlu0 %v1888_v1  ;;  %v1876_v2 = vpop.permute.xlu0 %1875 }
0x2053   :  { %v1884_v28 = vmul.f32 %v4956_v9, %v1876_v2  ;;  %v1891_v27 = vsel %vm244_vm1, %v1883_v5, 0.0 }
0x2055   :  { %v1894_v49 = vsel %vm244_vm1, %v1884_v28, 0.0 }
0x2056   :  { %1892 = vadd.xlane.f32.xlu0 %v1891_v27  ;;  %1895 = vadd.xlane.f32.xlu1 %v1894_v49 }
0x20d9   :  { %v1887_v22 = vpop.xlane.xlu1 %1886 }
0x20da   :  { %v1897_v34 = vadd.f32 %v1887_v22, %v4583_v54 }
0x20db   :  { %v1890_v44 = vpop.xlane.xlu0 %1889 }
0x20dc   :  { %v1898_v63 = vadd.f32 %v1890_v44, %v4581_v52  ;;  %1906 = vperm.xlu0 %3930, %v1897_v34  }
0x20de   :  { %1909 = vperm.xlu1 %3929, %v1898_v63  }
0x20df   :  { %v1896_v46 = vpop.xlane.xlu1 %1895  ;;  %v1893_v32 = vpop.xlane.xlu0 %1892 }
0x20e0   :  { %v1900_v51 = vadd.f32 %v1896_v46, %v4590_v12  ;;  %v1899_v25 = vadd.f32 %v1893_v32, %v4587_v10 }
0x20e2   :  { %1915 = vperm.xlu0 %3930, %v1900_v51   ;;  %1912 = vperm.xlu1 %3929, %v1899_v25  }
0x2157   :  { %v1907_v19 = vpop.permute.xlu0 %1906 }
0x2158   :  { %v1920_v24 = vrot.slane %v1907_v19, %v4595_v18 }
0x2159   :  { %v1910_v16 = vpop.permute.xlu1 %1909 }
0x215a   :  { %v1924_v33 = vrot.slane %v1910_v16, %v4595_v18 }
0x215c   :  { %v1933_v5 = vsel %vm483_vm3, %v1924_v33, %v1920_v24 }
0x215d   :  { %v1913_v39 = vpop.permute.xlu1 %1912  ;;  %v1916_v58 = vpop.permute.xlu0 %1915 }
0x215e   :  { %v1928_v43 = vrot.slane %v1913_v39, %v4595_v18  ;;  %v1932_v53 = vrot.slane %v1916_v58, %v4595_v18 }
0x2160   :  { %v1934_v1 = vsel %vm485_vm4, %v1928_v43, %v1933_v5 }
0x2161   :  { %v1935_v2 = vsel %vm487_vm5, %v1932_v53, %v1934_v1 }
0x2162   :  { %v1937_v28 = vsel %vm490_vm6, %v1935_v2, -inf }
0x2163   :  { %1938 = vmax.xlane.f32.xlu1 %v1937_v28 }
0x21ec   :  { %v1939_v27 = vpop.xlane.xlu1 %1938 }
0x21ed   :  { %v1944_v49 = vrot.slane %v1939_v27, %v4535_v59  ;;  %v1948_v22 = vrot.slane %v1939_v27, %v4545_v13  ;;  %v1952_v44 = vrot.slane %v1939_v27, %v4574_v47  ;;  %v1956_v16 = vrot.slane %v1939_v27, %v4578_v50 }
0x21ef   :  { %v1961_v46 = vsub.f32 %v1897_v34, %v1944_v49  ;;  %v1962_v32 = vsub.f32 %v1898_v63, %v1948_v22  ;;  %v1963_v33 = vsub.f32 %v1899_v25, %v1952_v44  ;;  %v1964_v39 = vsub.f32 %v1900_v51, %v1956_v16 }
0x21f1   :  { %v1965_v19 = vmul.f32 1.442695, %v1961_v46  ;;  %v1967_v24 = vmul.f32 1.442695, %v1962_v32  ;;  %v1969_v58 = vmul.f32 1.442695, %v1963_v33 }
0x21f2   :  { %v1971_v43 = vmul.f32 1.442695, %v1964_v39 }
0x21f3   :  { %4043 = vpow2.f32 %v1965_v19 }
0x21f4   :  { %4045 = vpow2.f32 %v1967_v24 }
0x21f5   :  { %4047 = vpow2.f32 %v1969_v58 }
0x21f6   :  { %4049 = vpow2.f32 %v1971_v43 }
0x2200   :  { %v4044_v53 = vpop.eup %4043 }
0x2201   :  { %1978 = vperm.xlu0 %3930, %v4044_v53   ;;  %v4046_v5 = vpop.eup %4045 }
0x2202   :  { %v4048_v1 = vpop.eup %4047 }
0x2203   :  { %v4050_v34 = vpop.eup %4049 }
0x2205   :  { %1981 = vperm.xlu0 %3930, %v4046_v5  }
0x2209   :  { %1984 = vperm.xlu0 %3930, %v4048_v1  }
0x220d   :  { %1987 = vperm.xlu0 %3930, %v4050_v34  }
0x227c   :  { %v1979_v63 = vpop.permute.xlu0 %1978 }
0x227d   :  { %v1992_v27 = vrot.slane %v1979_v63, %v4595_v18 }
0x2280   :  { %v1982_v2 = vpop.permute.xlu0 %1981 }
0x2281   :  { %v1996_v25 = vrot.slane %v1982_v2, %v4595_v18 }
0x2283   :  { %v2005_v22 = vsel %vm483_vm3, %v1996_v25, %v1992_v27 }
0x2284   :  { %v1985_v28 = vpop.permute.xlu0 %1984 }
0x2285   :  { %v2000_v51 = vrot.slane %v1985_v28, %v4595_v18 }
0x2287   :  { %v2006_v46 = vsel %vm485_vm4, %v2000_v51, %v2005_v22 }
0x2288   :  { %v1988_v49 = vpop.permute.xlu0 %1987 }
0x2289   :  { %v2004_v44 = vrot.slane %v1988_v49, %v4595_v18 }
0x228b   :  { %v2007_v32 = vsel %vm487_vm5, %v2004_v44, %v2006_v46 }
0x228c   :  { %v2009_v19 = vsel %vm490_vm6, %v2007_v32, 0.0 }
0x228d   :  { %2010 = vadd.xlane.f32.xlu0 %v2009_v19 }
0x2316   :  { %v2011_v16 = vpop.xlane.xlu0 %2010 }
0x2317   :  { %v2016_v33 = vrot.slane %v2011_v16, %v4535_v59  ;;  %v2020_v24 = vrot.slane %v2011_v16, %v4545_v13  ;;  %v2024_v39 = vrot.slane %v2011_v16, %v4574_v47  ;;  %v2028_v58 = vrot.slane %v2011_v16, %v4578_v50 }
0x2319   :  { %4051 = vrcp.f32 %v2016_v33 }
0x231a   :  { %4053 = vrcp.f32 %v2020_v24 }
0x231b   :  { %4055 = vrcp.f32 %v2024_v39 }
0x231c   :  { %4057 = vrcp.f32 %v2028_v58 }
0x2326   :  { %v4052_v43 = vpop.eup %4051 }
0x2327   :  { %v4054_v63 = vpop.eup %4053  ;;  %v2034_v2 = vmul.f32 %v4052_v43, %v4044_v53  ;;  %v5544_v43 = vld [vmem:[#allocation21_spill] sm:$0xff] }
0x2328   :  { %v4056_v28 = vpop.eup %4055  ;;  %v2036_v25 = vmul.f32 %v4054_v63, %v4046_v5  ;;  %v5542_v5 = vld [vmem:[#allocation19_spill] sm:$0xff] }
0x2329   :  { %2043 = vperm.xlu1 %3929, %v2034_v2   ;;  %v2038_v51 = vmul.f32 %v4056_v28, %v4048_v1  ;;  %v4058_v27 = vpop.eup %4057  ;;  %v3384_v19 = vrot.slane %v5542_v5, %v4595_v18  ;;  %v5543_v1 = vld [vmem:[#allocation15_spill] sm:$0xff]  ;;  %v5545_v2 = vld [vmem:[#allocation20_spill] sm:$0xff] }
0x232a   :  { %2048 = vperm.xlu0 %3930, %v2036_v25   ;;  %v2040_v49 = vmul.f32 %v4058_v27, %v4050_v34  ;;  %v3380_v16 = vrot.slane %v5543_v1, %v4595_v18  ;;  %v3388_v28 = vrot.slane %v5545_v2, %v4595_v18  ;;  %v3392_v27 = vrot.slane %v5012_v26, %v4595_v18 }
0x232d   :  { %2053 = vperm.xlu1 %3929, %v2038_v51  }
0x2331   :  { %2058 = vperm.xlu1 %3929, %v2040_v49  }
0x2335   :  { %2101 = vrot.lane.b32.xlu1 %v5054_v4, %s4269_s21 }
0x23a4   :  { %v2044_v22 = vpop.permute.xlu1 %2043 }
0x23a5   :  { %v2049_v44 = vpop.permute.xlu0 %2048  ;;  %v2061_v46 = vmul.f32 %v4995_v3, %v2044_v22  ;;  %v3400_v58 = vrot.slane %v2044_v22, %v4595_v18 }
0x23a6   :  { %v2062_v32 = vmul.f32 %v4999_v57, %v2049_v44  ;;  %v3404_v4 = vrot.slane %v2049_v44, %v4595_v18 }
0x23a7   :  { %v2065_v53 = vsel %vm244_vm1, %v2061_v46, 0.0 }
0x23a8   :  { %v2072_v34 = vsel %vm244_vm1, %v2062_v32, 0.0  ;;  %v2066_v33 = vrot.slane %v2065_v53, 4  ;;  %v2054_v24 = vpop.permute.xlu1 %2053  ;;  %v3393_v32 = vsel %vm483_vm3, %v3384_v19, %v3380_v16  ;;  %v3413_v15 = vsel %vm3067_vm7, %v3404_v4, %v3400_v58 }
0x23a9   :  { %v2073_v39 = vrot.slane %v2072_v34, 4  ;;  %v2063_v63 = vmul.f32 %v5544_v43, %v2054_v24  ;;  %v3408_v51 = vrot.slane %v2054_v24, %v4595_v18 }
0x23aa   :  { %v2067_v25 = vadd.f32 %v2066_v33, %v2065_v53  ;;  %v3394_v33 = vsel %vm485_vm4, %v3388_v28, %v3393_v32 }
0x23ab   :  { %v2074_v49 = vadd.f32 %v2073_v39, %v2072_v34  ;;  %v2079_v46 = vsel %vm244_vm1, %v2063_v63, 0.0  ;;  %v3414_v26 = vsel %vm3069_vm8, %v3408_v51, %v3413_v15  ;;  %v3395_v34 = vsel %vm487_vm5, %v3392_v27, %v3394_v33 }
0x23ac   :  { %v2068_v5 = vrot.slane %v2067_v25, 2  ;;  %v2080_v44 = vrot.slane %v2079_v46, 4  ;;  %v2059_v1 = vpop.permute.xlu1 %2058 }
0x23ad   :  { %v2075_v22 = vrot.slane %v2074_v49, 2  ;;  %v2064_v23 = vmul.f32 %v5014_v21, %v2059_v1  ;;  %v3412_v53 = vrot.slane %v2059_v1, %v4595_v18 }
0x23ae   :  { %v2069_v24 = vadd.f32 %v2068_v5, %v2067_v25  ;;  %v2081_v2 = vadd.f32 %v2080_v44, %v2079_v46 }
0x23af   :  { %v2076_v39 = vadd.f32 %v2075_v22, %v2074_v49  ;;  %v2086_v19 = vsel %vm244_vm1, %v2064_v23, 0.0  ;;  %v3415_v16 = vsel %vm3071_vm9, %v3412_v53, %v3414_v26 }
0x23b0   :  { %v2070_v63 = vrot.slane %v2069_v24, 1  ;;  %v2082_v43 = vrot.slane %v2081_v2, 2  ;;  %v2087_v4 = vrot.slane %v2086_v19, 4  ;;  %v3458_v21 = vsel %vm3063_vm11, %v3395_v34, %v3415_v16 }
0x23b1   :  { %v2077_v58 = vrot.slane %v2076_v39, 1  ;;  %3462 = vst.msk [vmem:[%s5509_s12 + $0x8] sm:$0xff] %vm3460_vm10, %v3458_v21 }
0x23b2   :  { %v2071_v28 = vadd.f32 %v2070_v63, %v2069_v24  ;;  %v2083_v15 = vadd.f32 %v2082_v43, %v2081_v2  ;;  %v2088_v25 = vadd.f32 %v2087_v4, %v2086_v19  ;;  %v2102_v24 = vpop.permute.xlu1 %2101 }
0x23b3   :  { %v2078_v51 = vadd.f32 %v2077_v58, %v2076_v39 }
0x23b4   :  { %v2084_v27 = vrot.slane %v2083_v15, 1  ;;  %v2089_v49 = vrot.slane %v2088_v25, 2 }
0x23b5   :  { %v3074_v23 = vsel %vm3067_vm7, %v2078_v51, %v2071_v28  ;;  %v2097_v22 = vsel %vm483_vm3, %v2078_v51, %v2071_v28 }
0x23b6   :  { %v2085_v46 = vadd.f32 %v2084_v27, %v2083_v15  ;;  %v2090_v32 = vadd.f32 %v2089_v49, %v2088_v25 }
0x23b8   :  { %v2091_v5 = vrot.slane %v2090_v32, 1  ;;  %v3075_v44 = vsel %vm3069_vm8, %v2085_v46, %v3074_v23  ;;  %v2098_v53 = vsel %vm485_vm4, %v2085_v46, %v2097_v22 }
0x23ba   :  { %v2092_v1 = vadd.f32 %v2091_v5, %v2090_v32 }
0x23bc   :  { %v2099_v33 = vsel %vm487_vm5, %v2092_v1, %v2098_v53  ;;  %v5175_v43 = vsel %vm3071_vm9, %v2092_v1, %v3075_v44 }
0x23bd   :  { %v2104_v2 = vsel %vm244_vm1, %v2099_v33, %v2102_v24 }
0x23be   :  { %3806 = vmatmul.mubr.msk.f32.vlgmr.msra.gmra.mxu0 %vm141_vm2, %v2104_v2 }
0x23bf   :  { %3828 = vmatpush3.msra.mxu0 %v4814_v6  ;;  %3843 = vmatprep.mubr.msk.f32.mxu0 %vm4273_vm0, %v5530_v48  ;;  %v2106_v6 = vld [vmem:[#allocation6 + $0x10] sm:$0xf] }
0x23c0   :  { %3829 = vmatprep.subr.mxu0 %v5530_v48 }
0x23c1   :  { %3830 = vmatpush3.msra.mxu0 %v4823_v14 }
0x23c2   :  { %3831 = vmatprep.subr.mxu0 %v5530_v48 }
0x23c3   :  { %3832 = vmatpush3.msra.mxu0 %v4830_v35 }
0x23c4   :  { %3833 = vmatprep.subr.mxu0 %v5530_v48 }
0x23c5   :  { %3834 = vmatpush3.msra.mxu0 %v4837_v11 }
0x23c6   :  { %3835 = vmatprep.subr.mxu0 %v5530_v48 }
0x23c7   :  { %3836 = vmatpush3.msra.mxu0 %v4844_v7 }
0x23c8   :  { %3837 = vmatprep.subr.mxu0 %v5530_v48 }
0x23c9   :  { %3838 = vmatpush3.msra.mxu0 %v4851_v29 }
0x23ca   :  { %3839 = vmatprep.subr.mxu0 %v5530_v48 }
0x23cb   :  { %3840 = vmatpush3.msra.mxu0 %v4858_v38 }
0x23cc   :  { %3841 = vmatprep.subr.mxu0 %v5530_v48 }
0x23cd   :  { %3842 = vmatpush3.msra.mxu0 %v4865_v8 }
0x23ce   :  { %3865 = vmatprep.subr.mxu0 %v5530_v48 }
0x247e   :  { %v2176_v14 = vpop.f32.mrf.mxu0 }
0x247f   :  { %v2180_v35 = vadd.f32 %v2176_v14, %v2106_v6 }
0x2480   :  { %v3807_v11 = vpop.f32.mrf.mxu0 }
0x2481   :  { %4059 = vtanh.f32 %v2180_v35  ;;  %v3492_v26 = vmul.f32 -1.442695, %v2180_v35 }
0x2483   :  { %4061 = vpow2.f32 %v3492_v26 }
0x248e   :  { %v4060_v7 = vpop.eup %4059 }
0x248f   :  { %2190 = vrot.lane.b32.xlu1 %v4060_v7, %s4269_s21 }
0x2490   :  { %v4062_v29 = vpop.eup %4061 }
0x2491   :  { %v2184_v34 = vadd.f32 1.0, %v4062_v29 }
0x2493   :  { %4063 = vrcp.f32 %v2184_v34 }
0x24a0   :  { %v4064_v38 = vpop.eup %4063 }
0x24a1   :  { %v2188_v8 = vmul.f32 %v4064_v38, %v5048_v30 }
0x2501   :  { %v2191_v39 = vpop.permute.xlu1 %2190 }
0x2502   :  { %v2193_v19 = vmul.f32 %v4064_v38, %v2191_v39 }
0x2504   :  { %2195 = vrot.lane.b32.xlu1 %v2193_v19, %s4274_s24 }
0x2576   :  { %v2196_v16 = vpop.permute.xlu1 %2195 }
0x2577   :  { %v5200_v63 = vadd.f32 %v2196_v16, %v2188_v8 }
0x2579   :  { %4065 = vtanh.f32 %v5200_v63 }
0x2586   :  { %v4066_v4 = vpop.eup %4065 }
0x2587   :  { %2201 = vrot.lane.b32.xlu0 %v4066_v4, %s4269_s21 }
0x258b   :  { %2209 = vrot.lane.b32.xlu0 %v5086_v45, %s4269_s21 }
0x25f9   :  { %v2202_v21 = vpop.permute.xlu0 %2201 }
0x25fa   :  { %v5206_v58 = vmul.f32 %v4064_v38, %v2202_v21 }
0x25fc   :  { %2206 = vrot.lane.b32.xlu1 %v5206_v58, %s4274_s24 }
0x25fd   :  { %v2210_v28 = vpop.permute.xlu0 %2209 }
0x266e   :  { %v2207_v15 = vpop.permute.xlu1 %2206 }
0x266f   :  { %v2212_v30 = vsel %vm244_vm1, %v2207_v15, %v2210_v28 }
0x2670   :  { %3825 = vmatmul.mubr.msk.f32.vlgmr.msra.gmra.mxu1 %vm141_vm2, %v2212_v30 }
0x2671   :  { %3847 = vmatpush3.msra.mxu1 %v4884_v17  ;;  %3862 = vmatprep.mubr.msk.f32.mxu1 %vm4273_vm0, %v5530_v48 }
0x2672   :  { %3848 = vmatprep.subr.mxu1 %v5530_v48 }
0x2673   :  { %3849 = vmatpush3.msra.mxu1 %v4890_v20 }
0x2674   :  { %3850 = vmatprep.subr.mxu1 %v5530_v48 }
0x2675   :  { %3851 = vmatpush3.msra.mxu1 %v4894_v31 }
0x2676   :  { %3852 = vmatprep.subr.mxu1 %v5530_v48 }
0x2677   :  { %3853 = vmatpush3.msra.mxu1 %v4898_v41 }
0x2678   :  { %3854 = vmatprep.subr.mxu1 %v5530_v48 }
0x2679   :  { %3855 = vmatpush3.msra.mxu1 %v4902_v60 }
0x267a   :  { %3856 = vmatprep.subr.mxu1 %v5530_v48 }
0x267b   :  { %3857 = vmatpush3.msra.mxu1 %v4906_v36 }
0x267c   :  { %3858 = vmatprep.subr.mxu1 %v5530_v48 }
0x267d   :  { %3859 = vmatpush3.msra.mxu1 %v4910_v37 }
0x267e   :  { %3860 = vmatprep.subr.mxu1 %v5530_v48 }
0x267f   :  { %3861 = vmatpush3.msra.mxu1 %v4914_v40 }
0x2680   :  { %3890 = vmatprep.subr.mxu1 %v5530_v48 }
0x2730   :  { %v2282_v17 = vpop.f32.mrf.mxu1 }
0x2731   :  { %v2283_v20 = vadd.f32 %v4921_v42, %v2282_v17 }
0x2732   :  { %v3826_v31 = vpop.f32.mrf.mxu1 }
0x2733   :  { %4067 = vtanh.f32 %v2283_v20  ;;  %v3494_v60 = vmul.f32 -1.442695, %v2283_v20 }
0x2735   :  { %4069 = vpow2.f32 %v3494_v60 }
0x2740   :  { %v4068_v41 = vpop.eup %4067 }
0x2741   :  { %2295 = vrot.lane.b32.xlu1 %v4068_v41, %s4269_s21 }
0x2742   :  { %v4070_v36 = vpop.eup %4069 }
0x2743   :  { %v2289_v25 = vadd.f32 1.0, %v4070_v36 }
0x2745   :  { %4071 = vrcp.f32 %v2289_v25 }
0x2752   :  { %v4072_v37 = vpop.eup %4071 }
0x2753   :  { %v2293_v40 = vmul.f32 %v4072_v37, %v5082_v61 }
0x27b3   :  { %v2296_v51 = vpop.permute.xlu1 %2295 }
0x27b4   :  { %v2298_v27 = vmul.f32 %v4072_v37, %v2296_v51 }
0x27b6   :  { %2300 = vrot.lane.b32.xlu0 %v2298_v27, %s4274_s24 }
0x2828   :  { %v2301_v49 = vpop.permute.xlu0 %2300 }
0x2829   :  { %v5234_v23 = vadd.f32 %v2301_v49, %v2293_v40 }
0x282b   :  { %4073 = vtanh.f32 %v5234_v23 }
0x2838   :  { %v4074_v42 = vpop.eup %4073 }
0x2839   :  { %2306 = vrot.lane.b32.xlu1 %v4074_v42, %s4269_s21 }
0x28ab   :  { %v2307_v46 = vpop.permute.xlu1 %2306 }
0x28ac   :  { %v5238_v32 = vmul.f32 %v4072_v37, %v2307_v46 }
0x28ae   :  { %v2317_v5 = vrot.slane %v5238_v32, %v4530_v56 }
0x28b0   :  { %v2318_v44 = vcombine.high %v2317_v5, %v2317_v5  ;;  %v2325_v1 = vrot.slane %v2317_v5, %v4530_v56 }
0x28b2   :  { %v2332_v22 = vrot.slane %v2318_v44, %v4530_v56  ;;  %v2333_v61 = vcombine.high %v2325_v1, %v2325_v1  ;;  %v2338_v53 = vrot.slane %v2325_v1, %v4535_v59 }
0x28b4   :  { %2351 = vrot.lane.b32.xlu0 %v2338_v53, %s4274_s24  ;;  %v2342_v33 = vrot.slane %v2332_v22, %v4535_v59  ;;  %v2334_v24 = vcombine.high %v2332_v22, %v2332_v22  ;;  %v2346_v2 = vrot.slane %v2333_v61, %v4535_v59 }
0x28b6   :  { %2353 = vrot.lane.b32.xlu1 %v2342_v33, %s4274_s24  ;;  %v2350_v6 = vrot.slane %v2334_v24, %v4535_v59 }
0x28b8   :  { %2355 = vrot.lane.b32.xlu0 %v2346_v2, %s4274_s24 }
0x28ba   :  { %2357 = vrot.lane.b32.xlu1 %v2350_v6, %s4274_s24 }
0x2926   :  { %v2352_v14 = vpop.permute.xlu0 %2351 }
0x2927   :  { %v2363_v35 = vmul.f32 %v4945_v62, %v2352_v14 }
0x2928   :  { %v2354_v11 = vpop.permute.xlu1 %2353 }
0x2929   :  { %v2364_v7 = vmul.f32 %v4948_v55, %v2354_v11  ;;  %v2367_v26 = vsel %vm244_vm1, %v2363_v35, 0.0 }
0x292a   :  { %2368 = vadd.xlane.f32.xlu0 %v2367_v26  ;;  %v2356_v29 = vpop.permute.xlu0 %2355 }
0x292b   :  { %v2365_v34 = vmul.f32 %v4952_v0, %v2356_v29  ;;  %v2370_v38 = vsel %vm244_vm1, %v2364_v7, 0.0 }
0x292c   :  { %2371 = vadd.xlane.f32.xlu1 %v2370_v38  ;;  %v2358_v39 = vpop.permute.xlu1 %2357 }
0x292d   :  { %v2366_v19 = vmul.f32 %v4956_v9, %v2358_v39  ;;  %v2373_v8 = vsel %vm244_vm1, %v2365_v34, 0.0 }
0x292e   :  { %2374 = vadd.xlane.f32.xlu0 %v2373_v8 }
0x292f   :  { %v2376_v62 = vsel %vm244_vm1, %v2366_v19, 0.0 }
0x2932   :  { %2377 = vadd.xlane.f32.xlu0 %v2376_v62 }
0x29b3   :  { %v2369_v16 = vpop.xlane.xlu0 %2368 }
0x29b4   :  { %v2379_v55 = vadd.f32 %v2369_v16, %v4583_v54 }
0x29b5   :  { %v2372_v4 = vpop.xlane.xlu1 %2371 }
0x29b6   :  { %v2380_v21 = vadd.f32 %v2372_v4, %v4581_v52  ;;  %2388 = vperm.xlu1 %3929, %v2379_v55  }
0x29b7   :  { %v2375_v0 = vpop.xlane.xlu0 %2374 }
0x29b8   :  { %v2381_v28 = vadd.f32 %v2375_v0, %v4587_v10  ;;  %2391 = vperm.xlu0 %3930, %v2380_v21  }
0x29ba   :  { %2394 = vperm.xlu1 %3929, %v2381_v28  }
0x29bb   :  { %v2378_v15 = vpop.xlane.xlu0 %2377 }
0x29bc   :  { %v2382_v9 = vadd.f32 %v2378_v15, %v4590_v12 }
0x29be   :  { %2397 = vperm.xlu1 %3929, %v2382_v9  }
0x2a31   :  { %v2389_v30 = vpop.permute.xlu1 %2388 }
0x2a32   :  { %v2402_v41 = vrot.slane %v2389_v30, %v4595_v18 }
0x2a33   :  { %v2392_v17 = vpop.permute.xlu0 %2391 }
0x2a34   :  { %v2406_v20 = vrot.slane %v2392_v17, %v4595_v18 }
0x2a35   :  { %v2395_v31 = vpop.permute.xlu1 %2394 }
0x2a36   :  { %v2410_v60 = vrot.slane %v2395_v31, %v4595_v18  ;;  %v2415_v36 = vsel %vm483_vm3, %v2406_v20, %v2402_v41 }
0x2a38   :  { %v2416_v51 = vsel %vm485_vm4, %v2410_v60, %v2415_v36 }
0x2a39   :  { %v2398_v25 = vpop.permute.xlu1 %2397 }
0x2a3a   :  { %v2414_v37 = vrot.slane %v2398_v25, %v4595_v18 }
0x2a3c   :  { %v2417_v27 = vsel %vm487_vm5, %v2414_v37, %v2416_v51 }
0x2a3d   :  { %v2419_v40 = vsel %vm490_vm6, %v2417_v27, -inf }
0x2a3e   :  { %2420 = vmax.xlane.f32.xlu0 %v2419_v40 }
0x2ac7   :  { %v2421_v49 = vpop.xlane.xlu0 %2420 }
0x2ac8   :  { %v2426_v42 = vrot.slane %v2421_v49, %v4535_v59  ;;  %v2430_v46 = vrot.slane %v2421_v49, %v4545_v13  ;;  %v2434_v5 = vrot.slane %v2421_v49, %v4574_v47  ;;  %v2438_v61 = vrot.slane %v2421_v49, %v4578_v50 }
0x2aca   :  { %v2443_v44 = vsub.f32 %v2379_v55, %v2426_v42  ;;  %v2444_v1 = vsub.f32 %v2380_v21, %v2430_v46  ;;  %v2445_v53 = vsub.f32 %v2381_v28, %v2434_v5  ;;  %v2446_v24 = vsub.f32 %v2382_v9, %v2438_v61 }
0x2acc   :  { %v2447_v22 = vmul.f32 1.442695, %v2443_v44  ;;  %v2449_v33 = vmul.f32 1.442695, %v2444_v1  ;;  %v2451_v2 = vmul.f32 1.442695, %v2445_v53 }
0x2acd   :  { %v2453_v6 = vmul.f32 1.442695, %v2446_v24  ;;  %v5546_v53 = vld [vmem:[#allocation21_spill] sm:$0xff] }
0x2ace   :  { %4075 = vpow2.f32 %v2447_v22 }
0x2acf   :  { %4077 = vpow2.f32 %v2449_v33 }
0x2ad0   :  { %4079 = vpow2.f32 %v2451_v2 }
0x2ad1   :  { %4081 = vpow2.f32 %v2453_v6 }
0x2adb   :  { %v4076_v14 = vpop.eup %4075 }
0x2adc   :  { %2460 = vperm.xlu1 %3929, %v4076_v14   ;;  %v4078_v35 = vpop.eup %4077 }
0x2add   :  { %v4080_v11 = vpop.eup %4079 }
0x2ade   :  { %v4082_v7 = vpop.eup %4081 }
0x2ae0   :  { %2463 = vperm.xlu1 %3929, %v4078_v35  }
0x2ae4   :  { %2466 = vperm.xlu1 %3929, %v4080_v11  }
0x2ae8   :  { %2469 = vperm.xlu1 %3929, %v4082_v7  }
0x2b57   :  { %v2461_v26 = vpop.permute.xlu1 %2460 }
0x2b58   :  { %v2474_v19 = vrot.slane %v2461_v26, %v4595_v18  ;;  %v5301_v26 = vld [vmem:[#allocation4 + $0x18] sm:$0xff] }
0x2b5b   :  { %v2464_v29 = vpop.permute.xlu1 %2463 }
0x2b5c   :  { %v2478_v38 = vrot.slane %v2464_v29, %v4595_v18 }
0x2b5e   :  { %v2487_v62 = vsel %vm483_vm3, %v2478_v38, %v2474_v19 }
0x2b5f   :  { %v2467_v34 = vpop.permute.xlu1 %2466 }
0x2b60   :  { %v2482_v39 = vrot.slane %v2467_v34, %v4595_v18 }
0x2b62   :  { %v2488_v55 = vsel %vm485_vm4, %v2482_v39, %v2487_v62 }
0x2b63   :  { %v2470_v8 = vpop.permute.xlu1 %2469 }
0x2b64   :  { %v2486_v16 = vrot.slane %v2470_v8, %v4595_v18 }
0x2b66   :  { %v2489_v4 = vsel %vm487_vm5, %v2486_v16, %v2488_v55 }
0x2b67   :  { %v2491_v21 = vsel %vm490_vm6, %v2489_v4, 0.0 }
0x2b68   :  { %2492 = vadd.xlane.f32.xlu1 %v2491_v21 }
0x2bf1   :  { %v2493_v0 = vpop.xlane.xlu1 %2492 }
0x2bf2   :  { %v2498_v28 = vrot.slane %v2493_v0, %v4535_v59  ;;  %v2502_v15 = vrot.slane %v2493_v0, %v4545_v13  ;;  %v2506_v9 = vrot.slane %v2493_v0, %v4574_v47  ;;  %v2510_v30 = vrot.slane %v2493_v0, %v4578_v50 }
0x2bf4   :  { %4083 = vrcp.f32 %v2498_v28 }
0x2bf5   :  { %4085 = vrcp.f32 %v2502_v15 }
0x2bf6   :  { %4087 = vrcp.f32 %v2506_v9 }
0x2bf7   :  { %4089 = vrcp.f32 %v2510_v30 }
0x2c01   :  { %v4084_v17 = vpop.eup %4083 }
0x2c02   :  { %v4086_v20 = vpop.eup %4085  ;;  %v2516_v31 = vmul.f32 %v4084_v17, %v4076_v14 }
0x2c03   :  { %v4088_v41 = vpop.eup %4087  ;;  %v2518_v60 = vmul.f32 %v4086_v20, %v4078_v35 }
0x2c04   :  { %2525 = vperm.xlu0 %3930, %v2516_v31   ;;  %v2520_v36 = vmul.f32 %v4088_v41, %v4080_v11  ;;  %v4090_v25 = vpop.eup %4089 }
0x2c05   :  { %2530 = vperm.xlu1 %3929, %v2518_v60   ;;  %v2522_v37 = vmul.f32 %v4090_v25, %v4082_v7 }
0x2c08   :  { %2535 = vperm.xlu0 %3930, %v2520_v36  }
0x2c0c   :  { %2540 = vperm.xlu0 %3930, %v2522_v37  }
0x2c10   :  { %2583 = vrot.lane.b32.xlu0 %v5206_v58, %s4269_s21 }
0x2c7f   :  { %v2526_v51 = vpop.permute.xlu0 %2525 }
0x2c80   :  { %v2531_v27 = vpop.permute.xlu1 %2530  ;;  %v2543_v40 = vmul.f32 %v4995_v3, %v2526_v51  ;;  %v3420_v46 = vrot.slane %v2526_v51, %v4595_v18 }
0x2c81   :  { %v2544_v49 = vmul.f32 %v4999_v57, %v2531_v27  ;;  %v3424_v42 = vrot.slane %v2531_v27, %v4595_v18 }
0x2c82   :  { %v2547_v5 = vsel %vm244_vm1, %v2543_v40, 0.0  ;;  %v2588_v40 = vld [vmem:[#allocation6 + $0x14] sm:$0xf] }
0x2c83   :  { %v2554_v44 = vsel %vm244_vm1, %v2544_v49, 0.0  ;;  %v2548_v1 = vrot.slane %v2547_v5, 4  ;;  %v2536_v22 = vpop.permute.xlu0 %2535  ;;  %v3433_v3 = vsel %vm483_vm3, %v3424_v42, %v3420_v46 }
0x2c84   :  { %v2555_v61 = vrot.slane %v2554_v44, 4  ;;  %v2545_v33 = vmul.f32 %v5546_v53, %v2536_v22  ;;  %v3428_v58 = vrot.slane %v2536_v22, %v4595_v18 }
0x2c85   :  { %v2549_v24 = vadd.f32 %v2548_v1, %v2547_v5 }
0x2c86   :  { %v2556_v2 = vadd.f32 %v2555_v61, %v2554_v44  ;;  %v2561_v57 = vsel %vm244_vm1, %v2545_v33, 0.0  ;;  %v3434_v6 = vsel %vm485_vm4, %v3428_v58, %v3433_v3 }
0x2c87   :  { %v2550_v14 = vrot.slane %v2549_v24, 2  ;;  %v2562_v35 = vrot.slane %v2561_v57, 4  ;;  %v2541_v11 = vpop.permute.xlu0 %2540 }
0x2c88   :  { %v2557_v7 = vrot.slane %v2556_v2, 2  ;;  %v2546_v29 = vmul.f32 %v5301_v26, %v2541_v11  ;;  %v3432_v34 = vrot.slane %v2541_v11, %v4595_v18 }
0x2c89   :  { %v2551_v38 = vadd.f32 %v2550_v14, %v2549_v24  ;;  %v2563_v39 = vadd.f32 %v2562_v35, %v2561_v57 }
0x2c8a   :  { %v2558_v19 = vadd.f32 %v2557_v7, %v2556_v2  ;;  %v2568_v8 = vsel %vm244_vm1, %v2546_v29, 0.0  ;;  %v5307_v62 = vsel %vm487_vm5, %v3432_v34, %v3434_v6  ;;  %v4149_v7 = vld [vmem:[%s5503_s6] ss:$0 sm:$0xff] }
0x2c8b   :  { %v2564_v16 = vrot.slane %v2563_v39, 2  ;;  %v2569_v55 = vrot.slane %v2568_v8, 4  ;;  %v2552_v21 = vrot.slane %v2551_v38, 1  ;;  %v2584_v51 = vpop.permute.xlu0 %2583 }
0x2c8c   :  { %v2559_v4 = vrot.slane %v2558_v19, 1 }
0x2c8d   :  { %v2565_v0 = vadd.f32 %v2564_v16, %v2563_v39  ;;  %v2570_v28 = vadd.f32 %v2569_v55, %v2568_v8  ;;  %v2553_v17 = vadd.f32 %v2552_v21, %v2551_v38 }
0x2c8e   :  { %v2560_v30 = vadd.f32 %v2559_v4, %v2558_v19 }
0x2c8f   :  { %v2566_v15 = vrot.slane %v2565_v0, 1  ;;  %v2571_v9 = vrot.slane %v2570_v28, 2 }
0x2c90   :  { %v2579_v36 = vsel %vm483_vm3, %v2560_v30, %v2553_v17 }
0x2c91   :  { %v2572_v20 = vadd.f32 %v2571_v9, %v2570_v28  ;;  %v2567_v31 = vadd.f32 %v2566_v15, %v2565_v0 }
0x2c93   :  { %v2573_v41 = vrot.slane %v2572_v20, 1  ;;  %v2580_v25 = vsel %vm485_vm4, %v2567_v31, %v2579_v36 }
0x2c95   :  { %v2574_v60 = vadd.f32 %v2573_v41, %v2572_v20 }
0x2c97   :  { %v5312_v37 = vsel %vm487_vm5, %v2574_v60, %v2580_v25 }
0x2c98   :  { %v2586_v27 = vsel %vm244_vm1, %v5312_v37, %v2584_v51 }
0x2c99   :  { %3844 = vmatmul.mubr.msk.f32.vlgmr.msra.gmra.mxu0 %vm141_vm2, %v2586_v27 }
0x2c9a   :  { %3881 = vmatprep.mubr.msk.f32.mxu0 %vm4273_vm0, %v5530_v48 }
0x2d59   :  { %v2658_v49 = vpop.f32.mrf.mxu0 }
0x2d5a   :  { %v2662_v42 = vadd.f32 %v2658_v49, %v2588_v40 }
0x2d5b   :  { %v3845_v46 = vpop.f32.mrf.mxu0 }
0x2d5c   :  { %4091 = vtanh.f32 %v2662_v42  ;;  %v3496_v44 = vmul.f32 -1.442695, %v2662_v42  ;;  %v4151_v46 = vld [vmem:[#allocation2 + $0x8] sm:$0xff] }
0x2d5e   :  { %4093 = vpow2.f32 %v3496_v44 }
0x2d69   :  { %v4092_v5 = vpop.eup %4091 }
0x2d6a   :  { %2672 = vrot.lane.b32.xlu0 %v4092_v5, %s4269_s21 }
0x2d6b   :  { %v4094_v1 = vpop.eup %4093 }
0x2d6c   :  { %v2666_v22 = vadd.f32 1.0, %v4094_v1 }
0x2d6e   :  { %4095 = vrcp.f32 %v2666_v22  ;;  %v4152_v22 = vld [vmem:[#allocation2 + $0x10] sm:$0xff] }
0x2d7b   :  { %v4096_v61 = vpop.eup %4095 }
0x2d7c   :  { %v2670_v58 = vmul.f32 %v4096_v61, %v5200_v63 }
0x2ddc   :  { %v2673_v53 = vpop.permute.xlu0 %2672 }
0x2ddd   :  { %v2675_v33 = vmul.f32 %v4096_v61, %v2673_v53 }
0x2ddf   :  { %2677 = vrot.lane.b32.xlu0 %v2675_v33, %s4274_s24 }
0x2e51   :  { %v2678_v24 = vpop.permute.xlu0 %2677 }
0x2e52   :  { %v2680_v3 = vadd.f32 %v2678_v24, %v2670_v58  ;;  %v4153_v58 = vld [vmem:[#allocation2 + $0x18] sm:$0xff] }
0x2e54   :  { %4097 = vtanh.f32 %v2680_v3 }
0x2e61   :  { %v4098_v2 = vpop.eup %4097 }
0x2e62   :  { %2683 = vrot.lane.b32.xlu1 %v4098_v2, %s4269_s21 }
0x2e66   :  { %2691 = vrot.lane.b32.xlu1 %v5238_v32, %s4269_s21 }
0x2ed4   :  { %v2684_v57 = vpop.permute.xlu1 %2683 }
0x2ed5   :  { %v2686_v6 = vmul.f32 %v4096_v61, %v2684_v57 }
0x2ed7   :  { %2688 = vrot.lane.b32.xlu0 %v2686_v6, %s4274_s24 }
0x2ed8   :  { %v2692_v14 = vpop.permute.xlu1 %2691 }
0x2f49   :  { %v2689_v35 = vpop.permute.xlu0 %2688 }
0x2f4a   :  { %v2694_v11 = vsel %vm244_vm1, %v2689_v35, %v2692_v14 }
0x2f4b   :  { %3863 = vmatmul.mubr.msk.f32.vlgmr.msra.gmra.mxu1 %vm141_vm2, %v2694_v11 }
0x2f4c   :  { %3906 = vmatprep.mubr.msk.f32.mxu1 %vm4273_vm0, %v5530_v48 }
0x300b   :  { %v2764_v63 = vpop.f32.mrf.mxu1 }
0x300c   :  { %v2765_v29 = vadd.f32 %v4149_v7, %v2764_v63 }
0x300d   :  { %v3864_v34 = vpop.f32.mrf.mxu1 }
0x300e   :  { %4099 = vtanh.f32 %v2765_v29  ;;  %v3498_v39 = vmul.f32 -1.442695, %v2765_v29 }
0x3010   :  { %4101 = vpow2.f32 %v3498_v39 }
0x301b   :  { %v4100_v38 = vpop.eup %4099 }
0x301c   :  { %2777 = vrot.lane.b32.xlu0 %v4100_v38, %s4269_s21 }
0x301d   :  { %v4102_v19 = vpop.eup %4101 }
0x301e   :  { %v2771_v8 = vadd.f32 1.0, %v4102_v19 }
0x3020   :  { %4103 = vrcp.f32 %v2771_v8 }
0x302d   :  { %v4104_v16 = vpop.eup %4103 }
0x302e   :  { %v2775_v21 = vmul.f32 %v4104_v16, %v5234_v23 }
0x308e   :  { %v2778_v55 = vpop.permute.xlu0 %2777 }
0x308f   :  { %v2780_v4 = vmul.f32 %v4104_v16, %v2778_v55 }
0x3091   :  { %2782 = vrot.lane.b32.xlu1 %v2780_v4, %s4274_s24 }
0x3103   :  { %v2783_v0 = vpop.permute.xlu1 %2782 }
0x3104   :  { %v2785_v28 = vadd.f32 %v2783_v0, %v2775_v21 }
0x3106   :  { %4105 = vtanh.f32 %v2785_v28 }
0x3113   :  { %v4106_v15 = vpop.eup %4105 }
0x3114   :  { %2788 = vrot.lane.b32.xlu0 %v4106_v15, %s4269_s21 }
0x3186   :  { %v2789_v9 = vpop.permute.xlu0 %2788 }
0x3187   :  { %v5337_v30 = vmul.f32 %v4104_v16, %v2789_v9 }
0x3189   :  { %v2799_v17 = vrot.slane %v5337_v30, %v4530_v56 }
0x318b   :  { %v2800_v20 = vcombine.high %v2799_v17, %v2799_v17  ;;  %v2807_v31 = vrot.slane %v2799_v17, %v4530_v56 }
0x318d   :  { %v2814_v41 = vrot.slane %v2800_v20, %v4530_v56  ;;  %v2815_v60 = vcombine.high %v2807_v31, %v2807_v31  ;;  %v2820_v23 = vrot.slane %v2807_v31, %v4535_v59  ;;  %v4150_v56 = vld [vmem:[#allocation2] sm:$0xff] }
0x318f   :  { %v2816_v36 = vcombine.high %v2814_v41, %v2814_v41  ;;  %2833 = vrot.lane.b32.xlu1 %v2820_v23, %s4274_s24  ;;  %v2824_v25 = vrot.slane %v2814_v41, %v4535_v59  ;;  %v2828_v51 = vrot.slane %v2815_v60, %v4535_v59 }
0x3191   :  { %2835 = vrot.lane.b32.xlu0 %v2824_v25, %s4274_s24  ;;  %v2832_v27 = vrot.slane %v2816_v36, %v4535_v59 }
0x3193   :  { %2837 = vrot.lane.b32.xlu1 %v2828_v51, %s4274_s24 }
0x3195   :  { %2839 = vrot.lane.b32.xlu0 %v2832_v27, %s4274_s24 }
0x3201   :  { %v2834_v40 = vpop.permute.xlu1 %2833 }
0x3202   :  { %v2845_v49 = vmul.f32 %v4150_v56, %v2834_v40 }
0x3203   :  { %v2836_v42 = vpop.permute.xlu0 %2835 }
0x3204   :  { %v2846_v5 = vmul.f32 %v4151_v46, %v2836_v42  ;;  %v2849_v44 = vsel %vm244_vm1, %v2845_v49, 0.0 }
0x3205   :  { %2850 = vadd.xlane.f32.xlu1 %v2849_v44  ;;  %v2838_v1 = vpop.permute.xlu1 %2837 }
0x3206   :  { %v2847_v61 = vmul.f32 %v4152_v22, %v2838_v1  ;;  %v2852_v53 = vsel %vm244_vm1, %v2846_v5, 0.0 }
0x3207   :  { %2853 = vadd.xlane.f32.xlu0 %v2852_v53  ;;  %v2840_v33 = vpop.permute.xlu0 %2839 }
0x3208   :  { %v2848_v24 = vmul.f32 %v4153_v58, %v2840_v33  ;;  %v2855_v3 = vsel %vm244_vm1, %v2847_v61, 0.0 }
0x320a   :  { %v2858_v2 = vsel %vm244_vm1, %v2848_v24, 0.0 }
0x320b   :  { %2856 = vadd.xlane.f32.xlu0 %v2855_v3  ;;  %2859 = vadd.xlane.f32.xlu1 %v2858_v2 }
0x328e   :  { %v2851_v57 = vpop.xlane.xlu1 %2850 }
0x328f   :  { %v2861_v6 = vadd.f32 %v2851_v57, %v4583_v54 }
0x3290   :  { %v2854_v14 = vpop.xlane.xlu0 %2853 }
0x3291   :  { %v2862_v35 = vadd.f32 %v2854_v14, %v4581_v52  ;;  %2870 = vperm.xlu0 %3930, %v2861_v6  }
0x3293   :  { %2873 = vperm.xlu1 %3929, %v2862_v35  }
0x3294   :  { %v2860_v11 = vpop.xlane.xlu1 %2859  ;;  %v2857_v63 = vpop.xlane.xlu0 %2856 }
0x3295   :  { %v2864_v7 = vadd.f32 %v2860_v11, %v4590_v12  ;;  %v2863_v29 = vadd.f32 %v2857_v63, %v4587_v10 }
0x3297   :  { %2879 = vperm.xlu0 %3930, %v2864_v7   ;;  %2876 = vperm.xlu1 %3929, %v2863_v29  }
0x330c   :  { %v2871_v34 = vpop.permute.xlu0 %2870 }
0x330d   :  { %v2884_v19 = vrot.slane %v2871_v34, %v4595_v18  ;;  %v3123_v34 = vld [vmem:[#allocation9 + $0x38] sm:$0xff] }
0x330e   :  { %v2874_v38 = vpop.permute.xlu1 %2873  ;;  %3866 = vmatpush3.msra.mxu0 %v3123_v34 }
0x330f   :  { %v2888_v39 = vrot.slane %v2874_v38, %v4595_v18  ;;  %3867 = vmatprep.subr.mxu0 %v5530_v48  ;;  %v5547_v38 = vld [vmem:[#allocation22_spill] sm:$0xff] }
0x3311   :  { %v2897_v55 = vsel %vm483_vm3, %v2888_v39, %v2884_v19  ;;  %v3121_v39 = vld [vmem:[#allocation9 + $0x28] sm:$0xff] }
0x3312   :  { %v2877_v54 = vpop.permute.xlu1 %2876  ;;  %v2880_v8 = vpop.permute.xlu0 %2879 }
0x3313   :  { %v2892_v52 = vrot.slane %v2877_v54, %v4595_v18  ;;  %v2896_v16 = vrot.slane %v2880_v8, %v4595_v18  ;;  %v3120_v54 = vld [vmem:[#allocation9 + $0x20] sm:$0xff]  ;;  %v5548_v8 = vld [vmem:[#allocation18_spill] sm:$0xff] }
0x3315   :  { %v2898_v12 = vsel %vm485_vm4, %v2892_v52, %v2897_v55  ;;  %v3057_v52 = vrot.slane %v5548_v8, 4  ;;  %v5549_v55 = vld [vmem:[#allocation13_spill] sm:$0xff] }
0x3316   :  { %v2899_v10 = vsel %vm487_vm5, %v2896_v16, %v2898_v12  ;;  %v3119_v16 = vld [vmem:[#allocation9 + $0x18] sm:$0xff] }
0x3317   :  { %v2901_v4 = vsel %vm490_vm6, %v2899_v10, -inf  ;;  %v3064_v12 = vsel %vm3063_vm11, %v5549_v55, %v3057_v52  ;;  %v3117_v10 = vld [vmem:[#allocation9 + $0x8] sm:$0xff] }
0x3318   :  { %2902 = vmax.xlane.f32.xlu1 %v2901_v4  ;;  %v3116_v4 = vld [vmem:[#allocation9] sm:$0xff]  ;;  %v3233_v55 = vld [vmem:[%s5506_s9 + $0x20] sm:$0xff] }
0x33a1   :  { %v2903_v21 = vpop.xlane.xlu1 %2902 }
0x33a2   :  { %v2908_v0 = vrot.slane %v2903_v21, %v4535_v59  ;;  %v2912_v28 = vrot.slane %v2903_v21, %v4545_v13  ;;  %v2916_v15 = vrot.slane %v2903_v21, %v4574_v47  ;;  %v2920_v31 = vrot.slane %v2903_v21, %v4578_v50 }
0x33a3   :  { %v3059_v21 = vrot.slane %v5086_v45, 4 }
0x33a4   :  { %v2925_v9 = vsub.f32 %v2861_v6, %v2908_v0  ;;  %v2926_v17 = vsub.f32 %v2862_v35, %v2912_v28  ;;  %v2927_v41 = vsub.f32 %v2863_v29, %v2916_v15  ;;  %v2928_v23 = vsub.f32 %v2864_v7, %v2920_v31  ;;  %v5550_v0 = vld [vmem:[#allocation14_spill] sm:$0xff]  ;;  %v5551_v28 = vld [vmem:[#allocation17_spill] sm:$0xff] }
0x33a5   :  { %v3086_v15 = vsel %vm3063_vm11, %v5551_v28, %v5550_v0  ;;  %v3232_v0 = vld [vmem:[%s5506_s9 + $0x18] sm:$0xff] }
0x33a6   :  { %v2929_v20 = vmul.f32 1.442695, %v2925_v9  ;;  %v2931_v60 = vmul.f32 1.442695, %v2926_v17  ;;  %v2933_v36 = vmul.f32 1.442695, %v2927_v41 }
0x33a7   :  { %v2935_v25 = vmul.f32 1.442695, %v2928_v23  ;;  %v3061_v9 = vrot.slane %v5337_v30, 4  ;;  %v5552_v17 = vld [vmem:[#allocation16_spill] sm:$0xff] }
0x33a8   :  { %4107 = vpow2.f32 %v2929_v20  ;;  %v3065_v20 = vsel %vm3063_vm11, %v5552_v17, %v3059_v21 }
0x33a9   :  { %4109 = vpow2.f32 %v2931_v60  ;;  %v3066_v31 = vsel %vm3063_vm11, %v5238_v32, %v3061_v9  ;;  %v4154_v60 = vld [vmem:[#allocation4] sm:$0xff]  ;;  %v4156_v32 = vld [vmem:[#allocation4 + $0x10] sm:$0xff] }
0x33aa   :  { %4111 = vpow2.f32 %v2933_v36  ;;  %v4155_v36 = vld [vmem:[#allocation4 + $0x8] sm:$0xff] }
0x33ab   :  { %4113 = vpow2.f32 %v2935_v25 }
0x33b5   :  { %v4108_v51 = vpop.eup %4107 }
0x33b6   :  { %2942 = vperm.xlu0 %3930, %v4108_v51   ;;  %v4110_v27 = vpop.eup %4109 }
0x33b7   :  { %v4112_v40 = vpop.eup %4111 }
0x33b8   :  { %v4114_v56 = vpop.eup %4113 }
0x33ba   :  { %2945 = vperm.xlu0 %3930, %v4110_v27  }
0x33be   :  { %2948 = vperm.xlu0 %3930, %v4112_v40  }
0x33c2   :  { %2951 = vperm.xlu0 %3930, %v4114_v56  }
0x3431   :  { %v2943_v49 = vpop.permute.xlu0 %2942 }
0x3432   :  { %v2956_v1 = vrot.slane %v2943_v49, %v4595_v18 }
0x3435   :  { %v2946_v42 = vpop.permute.xlu0 %2945 }
0x3436   :  { %v2960_v5 = vrot.slane %v2946_v42, %v4595_v18 }
0x3438   :  { %v2969_v61 = vsel %vm483_vm3, %v2960_v5, %v2956_v1 }
0x3439   :  { %v2949_v46 = vpop.permute.xlu0 %2948 }
0x343a   :  { %v2964_v44 = vrot.slane %v2949_v46, %v4595_v18 }
0x343c   :  { %v2970_v33 = vsel %vm485_vm4, %v2964_v44, %v2969_v61 }
0x343d   :  { %v2952_v22 = vpop.permute.xlu0 %2951 }
0x343e   :  { %v2968_v53 = vrot.slane %v2952_v22, %v4595_v18 }
0x3440   :  { %v2971_v58 = vsel %vm487_vm5, %v2968_v53, %v2970_v33 }
0x3441   :  { %v2973_v24 = vsel %vm490_vm6, %v2971_v58, 0.0 }
0x3442   :  { %2974 = vadd.xlane.f32.xlu0 %v2973_v24 }
0x34cb   :  { %v2975_v3 = vpop.xlane.xlu0 %2974 }
0x34cc   :  { %v2980_v2 = vrot.slane %v2975_v3, %v4535_v59  ;;  %v2984_v57 = vrot.slane %v2975_v3, %v4545_v13  ;;  %v2988_v6 = vrot.slane %v2975_v3, %v4574_v47  ;;  %v2992_v14 = vrot.slane %v2975_v3, %v4578_v50  ;;  %v3122_v13 = vld [vmem:[#allocation9 + $0x30] sm:$0xff] }
0x34cd   :  { %3868 = vmatpush3.msra.mxu0 %v3122_v13  ;;  %v3087_v50 = vsel %vm3063_vm11, %v5547_v38, %v5175_v43  ;;  %v3118_v43 = vld [vmem:[#allocation9 + $0x10] sm:$0xff]  ;;  %v3236_v38 = vld [vmem:[%s5506_s9 + $0x38] sm:$0xff] }
0x34ce   :  { %4115 = vrcp.f32 %v2980_v2  ;;  %3869 = vmatprep.subr.mxu0 %v5530_v48  ;;  %3891 = vmatpush3.msra.mxu1 %v3236_v38 }
0x34cf   :  { %4117 = vrcp.f32 %v2984_v57  ;;  %3870 = vmatpush3.msra.mxu0 %v3121_v39  ;;  %3892 = vmatprep.subr.mxu1 %v5530_v48 }
0x34d0   :  { %4119 = vrcp.f32 %v2988_v6  ;;  %3871 = vmatprep.subr.mxu0 %v5530_v48 }
0x34d1   :  { %4121 = vrcp.f32 %v2992_v14  ;;  %3872 = vmatpush3.msra.mxu0 %v3120_v54  ;;  %v3234_v54 = vld [vmem:[%s5506_s9 + $0x28] sm:$0xff] }
0x34d2   :  { %3873 = vmatprep.subr.mxu0 %v5530_v48 }
0x34d3   :  { %3874 = vmatpush3.msra.mxu0 %v3119_v16 }
0x34d4   :  { %3875 = vmatprep.subr.mxu0 %v5530_v48 }
0x34d5   :  { %3876 = vmatpush3.msra.mxu0 %v3118_v43 }
0x34d6   :  { %3877 = vmatprep.subr.mxu0 %v5530_v48 }
0x34d7   :  { %3878 = vmatpush3.msra.mxu0 %v3117_v10 }
0x34d8   :  { %3879 = vmatprep.subr.mxu0 %v5530_v48 }
0x34d9   :  { %3880 = vmatpush3.msra.mxu0 %v3116_v4 }
0x34db   :  { %v4116_v35 = vpop.eup %4115 }
0x34dc   :  { %v4118_v11 = vpop.eup %4117  ;;  %v2998_v63 = vmul.f32 %v4116_v35, %v4108_v51 }
0x34dd   :  { %v4120_v7 = vpop.eup %4119  ;;  %v3000_v29 = vmul.f32 %v4118_v11, %v4110_v27 }
0x34de   :  { %3007 = vperm.xlu1 %3929, %v2998_v63   ;;  %v3002_v59 = vmul.f32 %v4120_v7, %v4112_v40  ;;  %v4122_v47 = vpop.eup %4121 }
0x34df   :  { %3012 = vperm.xlu0 %3930, %v3000_v29   ;;  %v3004_v19 = vmul.f32 %v4122_v47, %v4114_v56 }
0x34e2   :  { %3017 = vperm.xlu1 %3929, %v3002_v59  }
0x34e3   :  { %3106 = vrot.lane.b32.xlu0 %v3087_v50, %s4274_s24  ;;  %v3235_v50 = vld [vmem:[%s5506_s9 + $0x30] sm:$0xff] }
0x34e4   :  { %3893 = vmatpush3.msra.mxu1 %v3235_v50 }
0x34e5   :  { %3894 = vmatprep.subr.mxu1 %v5530_v48 }
0x34e6   :  { %3022 = vperm.xlu1 %3929, %v3004_v19   ;;  %3895 = vmatpush3.msra.mxu1 %v3234_v54 }
0x34e7   :  { %3896 = vmatprep.subr.mxu1 %v5530_v48 }
0x34e8   :  { %3897 = vmatpush3.msra.mxu1 %v3233_v55 }
0x34e9   :  { %3898 = vmatprep.subr.mxu1 %v5530_v48 }
0x34ea   :  { %3092 = vrot.lane.b32.xlu1 %v3064_v12, %s4274_s24  ;;  %3899 = vmatpush3.msra.mxu1 %v3232_v0 }
0x34eb   :  { %3900 = vmatprep.subr.mxu1 %v5530_v48 }
0x34ee   :  { %3104 = vrot.lane.b32.xlu1 %v3086_v15, %s4274_s24 }
0x34f2   :  { %3094 = vrot.lane.b32.xlu1 %v3065_v20, %s4274_s24 }
0x34f6   :  { %3096 = vrot.lane.b32.xlu1 %v3066_v31, %s4274_s24 }
0x3559   :  { %v3008_v45 = vpop.permute.xlu1 %3007 }
0x355a   :  { %v3013_v41 = vpop.permute.xlu0 %3012  ;;  %v3025_v23 = vmul.f32 %v4154_v60, %v3008_v45  ;;  %v3440_v42 = vrot.slane %v3008_v45, %v4595_v18  ;;  %v3231_v45 = vld [vmem:[%s5506_s9 + $0x10] sm:$0xff] }
0x355b   :  { %v3026_v25 = vmul.f32 %v4155_v36, %v3013_v41  ;;  %v3444_v49 = vrot.slane %v3013_v41, %v4595_v18  ;;  %3901 = vmatpush3.msra.mxu1 %v3231_v45  ;;  %v3230_v41 = vld [vmem:[%s5506_s9 + $0x8] sm:$0xff] }
0x355c   :  { %v3029_v51 = vsel %vm244_vm1, %v3025_v23, 0.0  ;;  %3902 = vmatprep.subr.mxu1 %v5530_v48 }
0x355d   :  { %v3036_v30 = vsel %vm244_vm1, %v3026_v25, 0.0  ;;  %v3030_v27 = vrot.slane %v3029_v51, 4  ;;  %v3018_v40 = vpop.permute.xlu1 %3017  ;;  %v3453_v24 = vsel %vm3067_vm7, %v3444_v49, %v3440_v42  ;;  %3903 = vmatpush3.msra.mxu1 %v3230_v41  ;;  %v3499_v25 = vld [vmem:[%s5505_s8] ss:$0 sm:$0xff] }
0x355e   :  { %v3037_v56 = vrot.slane %v3036_v30, 4  ;;  %v3027_v46 = vmul.f32 %v4156_v32, %v3018_v40  ;;  %v3448_v44 = vrot.slane %v3018_v40, %v4595_v18  ;;  %v3107_v10 = vpop.permute.xlu0 %3106  ;;  %3904 = vmatprep.subr.mxu1 %v5530_v48 }
0x355f   :  { %v3031_v5 = vadd.f32 %v3030_v27, %v3029_v51 }
0x3560   :  { %v3038_v1 = vadd.f32 %v3037_v56, %v3036_v30  ;;  %v3043_v22 = vsel %vm244_vm1, %v3027_v46, 0.0  ;;  %v3454_v14 = vsel %vm3069_vm8, %v3448_v44, %v3453_v24 }
0x3561   :  { %v3032_v61 = vrot.slane %v3031_v5, 2  ;;  %v3044_v53 = vrot.slane %v3043_v22, 4  ;;  %v3023_v33 = vpop.permute.xlu1 %3022 }
0x3562   :  { %v3039_v58 = vrot.slane %v3038_v1, 2  ;;  %v3028_v3 = vmul.f32 %v5301_v26, %v3023_v33  ;;  %v3452_v2 = vrot.slane %v3023_v33, %v4595_v18  ;;  %v3503_v33 = vld [vmem:[%s5507_s10] ss:$0 sm:$0xff] }
0x3563   :  { %v3033_v57 = vadd.f32 %v3032_v61, %v3031_v5  ;;  %v3045_v6 = vadd.f32 %v3044_v53, %v3043_v22 }
0x3564   :  { %v3040_v35 = vadd.f32 %v3039_v58, %v3038_v1  ;;  %v3050_v11 = vsel %vm244_vm1, %v3028_v3, 0.0  ;;  %v3455_v63 = vsel %vm3071_vm9, %v3452_v2, %v3454_v14 }
0x3565   :  { %v3046_v7 = vrot.slane %v3045_v6, 2  ;;  %v3051_v29 = vrot.slane %v3050_v11, 4  ;;  %v3459_v34 = vsel %vm3063_vm11, %v5307_v62, %v3455_v63  ;;  %v3093_v59 = vpop.permute.xlu1 %3092  ;;  %v3034_v26 = vrot.slane %v3033_v57, 1 }
0x3566   :  { %3463 = vst.msk [vmem:[%s5509_s12 + $0x10] sm:$0xff] %vm3460_vm10, %v3459_v34  ;;  %v3041_v18 = vrot.slane %v3040_v35, 1 }
0x3567   :  { %v3047_v13 = vadd.f32 %v3046_v7, %v3045_v6  ;;  %v3052_v47 = vadd.f32 %v3051_v29, %v3050_v11  ;;  %v3035_v16 = vadd.f32 %v3034_v26, %v3033_v57 }
0x3568   :  { %v3042_v52 = vadd.f32 %v3041_v18, %v3040_v35 }
0x3569   :  { %v3048_v62 = vrot.slane %v3047_v13, 1  ;;  %v3053_v39 = vrot.slane %v3052_v47, 2  ;;  %v3105_v19 = vpop.permute.xlu1 %3104 }
0x356a   :  { %v3113_v8 = vsel %vm244_vm1, %v3093_v59, %v3105_v19  ;;  %v3082_v9 = vsel %vm3067_vm7, %v3042_v52, %v3035_v16 }
0x356b   :  { %v3054_v43 = vadd.f32 %v3053_v39, %v3052_v47  ;;  %3882 = vmatmul.mubr.msk.f32.vlgmr.msra.gmra.mxu0 %vm141_vm2, %v3113_v8  ;;  %v3049_v12 = vadd.f32 %v3048_v62, %v3047_v13 }
0x356c   :  { %3884 = vmatprep.mubr.msk.f32.mxu0 %vm4273_vm0, %v5530_v48 }
0x356d   :  { %v3055_v4 = vrot.slane %v3054_v43, 1  ;;  %v3095_v21 = vpop.permute.xlu1 %3094  ;;  %v3083_v17 = vsel %vm3069_vm8, %v3049_v12, %v3082_v9 }
0x356e   :  { %v3114_v28 = vsel %vm244_vm1, %v3095_v21, %v3107_v10 }
0x356f   :  { %v3056_v15 = vadd.f32 %v3055_v4, %v3054_v43  ;;  %3885 = vmatmul.mubr.msk.f32.gmra.mxu0 %vm141_vm2, %v3114_v28 }
0x3570   :  { %3887 = vmatprep.mubr.msk.f32.mxu0 %vm4273_vm0, %v5530_v48 }
0x3571   :  { %v3084_v20 = vsel %vm3071_vm9, %v3056_v15, %v3083_v17  ;;  %v3097_v60 = vpop.permute.xlu1 %3096 }
0x3572   :  { %v3088_v31 = vsel %vm3063_vm11, %v5312_v37, %v3084_v20  ;;  %v3229_v37 = vld [vmem:[%s5506_s9] sm:$0xff] }
0x3573   :  { %3108 = vrot.lane.b32.xlu0 %v3088_v31, %s4274_s24  ;;  %3905 = vmatpush3.msra.mxu1 %v3229_v37 }
0x35e5   :  { %v3109_v23 = vpop.permute.xlu0 %3108 }
0x35e6   :  { %v3115_v36 = vsel %vm244_vm1, %v3097_v60, %v3109_v23 }
0x35e7   :  { %3888 = vmatmul.mubr.msk.f32.gmra.mxu0 %vm141_vm2, %v3115_v36 }
0x362b   :  { %v3206_v51 = vpop.f32.mrf.mxu0 }
0x362c   :  { %v3207_v30 = vadd.f32 %v3499_v25, %v3206_v51 }
0x362d   :  { %v3883_v27 = vpop.f32.mrf.mxu0 }
0x362e   :  { %vm3220_vm12 = vcmp.ge.f32.partialorder %v3207_v30, 0.0  ;;  %v3223_v40 = vmul.f32 0.9, %v3207_v30 }
0x362f   :  { %v3211_v56 = vpop.f32.mrf.mxu0 }
0x3630   :  { %v3226_v49 = vsel %vm3220_vm12, %v3207_v30, %v3223_v40  ;;  %v3212_v42 = vadd.f32 %v3499_v25, %v3211_v56 }
0x3631   :  { %v3886_v32 = vpop.f32.mrf.mxu0  ;;  %3907 = vmatmul.mubr.msk.f32.vlgmr.msra.gmra.mxu1 %vm141_vm2, %v3226_v49 }
0x3632   :  { %vm3221_vm13 = vcmp.ge.f32.partialorder %v3212_v42, 0.0  ;;  %v3224_v46 = vmul.f32 0.9, %v3212_v42  ;;  %3909 = vmatprep.mubr.msk.f32.mxu1 %vm4273_vm0, %v5530_v48 }
0x3634   :  { %v3227_v5 = vsel %vm3221_vm13, %v3212_v42, %v3224_v46 }
0x3635   :  { %3910 = vmatmul.mubr.msk.f32.gmra.mxu1 %vm141_vm2, %v3227_v5 }
0x3636   :  { %3912 = vmatprep.mubr.msk.f32.mxu1 %vm4273_vm0, %v5530_v48 }
0x36a7   :  { %v3216_v44 = vpop.f32.mrf.mxu0 }
0x36a8   :  { %v3217_v1 = vadd.f32 %v3499_v25, %v3216_v44 }
0x36a9   :  { %v3889_v22 = vpop.f32.mrf.mxu0 }
0x36aa   :  { %vm3222_vm14 = vcmp.ge.f32.partialorder %v3217_v1, 0.0  ;;  %v3225_v61 = vmul.f32 0.9, %v3217_v1 }
0x36ac   :  { %v3228_v53 = vsel %vm3222_vm14, %v3217_v1, %v3225_v61 }
0x36ad   :  { %3913 = vmatmul.mubr.msk.f32.gmra.mxu1 %vm141_vm2, %v3228_v53 }
0x36f1   :  { %v3319_v58 = vpop.f32.mrf.mxu1 }
0x36f2   :  { %v3320_v24 = vadd.f32 %v3503_v33, %v3319_v58 }
0x36f3   :  { %v3908_v3 = vpop.f32.mrf.mxu1 }
0x36f4   :  { %3334 = vst.msk [vmem:[%s5508_s11] sm:$0xff] %vm3333_vm15, %v3320_v24 }
0x36f5   :  { %v3324_v48 = vpop.f32.mrf.mxu1 }
0x36f6   :  { %v3325_v2 = vadd.f32 %v3503_v33, %v3324_v48 }
0x36f7   :  { %v3911_v57 = vpop.f32.mrf.mxu1 }
0x36f8   :  { %3335 = vst.msk [vmem:[%s5508_s11 + $0x8] sm:$0xff] %vm3333_vm15, %v3325_v2 }
0x376d   :  { %v3329_v6 = vpop.f32.mrf.mxu1 }
0x376e   :  { %v3330_v14 = vadd.f32 %v3503_v33, %v3329_v6 }
0x376f   :  { %v3914_v35 = vpop.f32.mrf.mxu1 }
0x3770   :  { %3336 = vst.msk [vmem:[%s5508_s11 + $0x10] sm:$0xff] %vm3333_vm15, %v3330_v14 }
0x3771   :  { %3472 = vsyncpa [#allocation3], 1 }
0x3772   :  { %3473 = vsyncpa [#allocation5], 1 }
0x3773   :  { %3474 = vsyncpa [#allocation8], 1 }

</bundles_post_ra>
